<compile_context>
chip_gen: v7x
topology: tpu7x:2x2x1
jax: 0.10.0
libtpu: 0.0.40
codegen_flags: <defaults>
</compile_context>

<pallas_src>
import functools

import jax
import jax.numpy as jnp
import numpy as np
from jax.experimental import pallas as pl
from jax.experimental.pallas import tpu as pltpu


# ----------------------------------------------------------------------------
# Fused kernel: per-filter SNP scaling + gene readout + MLP(1024,256,1) + linear head
# Grid = (batch tiles [parallel], gene tiles [arbitrary reduction, last axis])
# ----------------------------------------------------------------------------
def _ugp_fused_kernel(n_filters, snp_ref, filtT_ref, memT_ref, w1_ref,
                      b1_ref, w2_ref, b2_ref, w3_ref, b3_ref,
                      lin_ref, out_ref, h1_acc):
    j = pl.program_id(1)                       # gene-tile reduction axis (last)

    @pl.when(j == 0)
    def _init():
        h1_acc[...] = jnp.zeros_like(h1_acc)

    snp = snp_ref[...]                         # (BT, S)   compute dtype
    filtT = filtT_ref[...]                     # (S, NF)
    memT = memT_ref[...]                       # (S, GT)   gene-membership counts (tile j)

    # Prescaled weight tile W[s, f*GT + g] = filt[f, s] * memT[s, g].  One big MXU matmul
    # replaces the original 8-way loop of tiny per-filter dots; w1 rows were permuted in
    # the wrapper to the same (f, g_local) ordering so no interleave is needed here.
    w_tile = jnp.concatenate(
        [memT * filtT[:, f:f + 1] for f in range(n_filters)], axis=1)       # (S, NF*GT)

    # Gene aggregation for this tile, all filters at once (f32 accumulation).
    y = jnp.dot(snp, w_tile, preferred_element_type=jnp.float32)            # (BT, NF*GT)

    # Fused MLP layer 1: accumulate this tile's contribution; sample_h never hits HBM.
    h1_acc[...] += jnp.dot(y.astype(w1_ref.dtype), w1_ref[...],
                           preferred_element_type=jnp.float32)              # (BT, H1)

    @pl.when(j == pl.num_programs(1) - 1)
    def _finalize():
        # Linear head: lin[b] = sum_s snp[b, s] * sum_f filt[f, s]   (dropout p=0).
        fsum = jnp.sum(filtT.astype(jnp.float32), axis=1, keepdims=True)    # (S, 1)
        lin_ref[...] = jnp.dot(snp.astype(jnp.float32), fsum,
                               preferred_element_type=jnp.float32)          # (BT, 1)
        # MLP layers 2-3 (small weights stay resident in VMEM across the whole grid).
        h1 = jnp.maximum(h1_acc[...] + b1_ref[...], 0.0)
        h2 = jnp.dot(h1.astype(w2_ref.dtype), w2_ref[...],
                     preferred_element_type=jnp.float32) + b2_ref[...]
        h2 = jnp.maximum(h2, 0.0)
        out_ref[...] = jnp.dot(h2.astype(w3_ref.dtype), w3_ref[...],
                               preferred_element_type=jnp.float32) + b3_ref[...]


# ----------------------------------------------------------------------------
# UGP_v2 forward (wrapper / glue)
# ----------------------------------------------------------------------------
def ugp_v2_forward(params, snp, snp_ids, gene_ids, n_genes, *,
                   batch_tile=8, gene_tile=128, compute_dtype=jnp.float32):
    filters = params["filters"]                    # (NF, S) f32 parameters
    NF, S = filters.shape
    w1, b1 = params["w1"], params["b1"]            # (G*NF, 1024), (1, 1024)
    w2, b2 = params["w2"], params["b2"]            # (1024, 256),  (1, 256)
    w3, b3 = params["w3"], params["b3"]            # (256, 1),     (1, 1)
    H1, H2, H3 = w1.shape[1], w2.shape[1], w3.shape[1]
    B = snp.shape[0]
    assert w1.shape[0] == n_genes * NF
    assert batch_tile % 8 == 0 and gene_tile % 128 == 0

    BT, GT = batch_tile, gene_tile
    Bp = ((B + BT - 1) // BT) * BT
    Gp = ((n_genes + GT - 1) // GT) * GT
    nb, ngt = Bp // BT, Gp // GT

    # glue: dense gene-membership matrix (replaces the DGL batched graph + readout 'sum').
    memT = jnp.zeros((S, n_genes), jnp.float32).at[snp_ids, gene_ids].add(1.0)

    # glue: pad batch / genes to tile multiples (zero rows / columns are inert).
    snp_p = jnp.zeros((Bp, S), jnp.float32).at[:B].set(snp.astype(jnp.float32))
    memT_p = jnp.zeros((S, Gp), jnp.float32).at[:, :n_genes].set(memT)

    # glue: permute w1 rows (gene-major d = g*NF+f) into per-gene-tile filter-major blocks
    # (tile j, row f*GT + g_local) matching the kernel's prescaled weight tile.
    w1_p = jnp.zeros((Gp * NF, H1), jnp.float32).at[:n_genes * NF].set(w1)
    w1_p = (w1_p.reshape(ngt, GT, NF, H1)
                 .transpose(0, 2, 1, 3)
                 .reshape(ngt * NF * GT, H1))

    cd = compute_dtype
    snp_c = snp_p.astype(cd)
    filtT_c = filters.T.astype(cd)                 # (S, NF)
    memT_c = memT_p.astype(cd)
    w1_c = w1_p.astype(cd)
    w2_c = w2.astype(cd)
    w3_c = w3.astype(cd)

    # Explicit VMEM budget from the block shapes (keeps v7x's 64 MiB happy).
    itemsize = jnp.dtype(cd).itemsize
    est = (2 * (BT * S + S * NF + S * GT + NF * GT * H1) * itemsize   # streamed, 2x buffers
           + (H1 * H2 + H2 * H3 + H1 + H2 + H3) * 4                   # resident small weights
           + (S * NF * GT + BT * NF * GT) * 4                         # in-kernel W tile / y
           + BT * H1 * 4)                                             # h1 accumulator scratch
    vmem_limit = int(min(max(2 * est, 32 * 1024 * 1024), 64 * 1024 * 1024))

    kernel = functools.partial(_ugp_fused_kernel, NF)

    lin_p, out_p = pl.pallas_call(
        kernel,
        out_shape=(jax.ShapeDtypeStruct((Bp, 1), jnp.float32),
                   jax.ShapeDtypeStruct((Bp, 1), jnp.float32)),
        grid_spec=pltpu.PrefetchScalarGridSpec(
            num_scalar_prefetch=0,
            grid=(nb, ngt),
            in_specs=[
                pl.BlockSpec((BT, S), lambda i, j: (i, 0)),        # snp  (resident per i)
                pl.BlockSpec((S, NF), lambda i, j: (0, 0)),        # filters^T (resident)
                pl.BlockSpec((S, GT), lambda i, j: (0, j)),        # memT tile (streamed)
                pl.BlockSpec((NF * GT, H1), lambda i, j: (j, 0)),  # w1 tile (streamed)
                pl.BlockSpec((1, H1), lambda i, j: (0, 0)),        # b1 (resident)
                pl.BlockSpec((H1, H2), lambda i, j: (0, 0)),       # w2 (resident)
                pl.BlockSpec((1, H2), lambda i, j: (0, 0)),        # b2
                pl.BlockSpec((H2, H3), lambda i, j: (0, 0)),       # w3 (resident)
                pl.BlockSpec((1, H3), lambda i, j: (0, 0)),        # b3
            ],
            out_specs=(
                pl.BlockSpec((BT, 1), lambda i, j: (i, 0)),        # linear_preds
                pl.BlockSpec((BT, 1), lambda i, j: (i, 0)),        # nonlinear_preds
            ),
            scratch_shapes=[pltpu.VMEM((BT, H1), jnp.float32)],    # h1 accumulator
        ),
        compiler_params=pltpu.CompilerParams(
            dimension_semantics=("parallel", "arbitrary"),
            vmem_limit_bytes=vmem_limit,
        ),
    )(snp_c, filtT_c, memT_c, w1_c, b1, w2_c, b2, w3_c, b3)

    return lin_p[:B], out_p[:B], filters


# ----------------------------------------------------------------------------
# Deterministic parameter init (mirrors __init__ + bert_init_params)
# ----------------------------------------------------------------------------
def init_params(key, n_snps, n_genes, n_filters=8, d_emb=8):
    ks = jax.random.split(key, 5)
    din = n_genes * n_filters
    return dict(
        filters=jax.random.normal(ks[0], (n_filters, n_snps), jnp.float32) * 0.001,
        w1=jax.random.normal(ks[1], (din, 1024), jnp.float32) * 0.02,
        b1=jnp.zeros((1, 1024), jnp.float32),
        w2=jax.random.normal(ks[2], (1024, 256), jnp.float32) * 0.02,
        b2=jnp.zeros((1, 256), jnp.float32),
        w3=jax.random.normal(ks[3], (256, 1), jnp.float32) * 0.02,
        b3=jnp.zeros((1, 1), jnp.float32),
        # NOTE: snp_emb = nn.Embedding(10, d_emb) is defined in __init__ but never used
        # in forward(); kept only for completeness.
        snp_emb=jax.random.normal(ks[4], (10, d_emb), jnp.float32) * 0.02,
    )


# ----------------------------------------------------------------------------
# Pure-JAX reference (high-precision f32) for correctness check
# ----------------------------------------------------------------------------
def reference_forward(params, snp, snp_ids, gene_ids, n_genes):
    hp = jax.lax.Precision.HIGHEST
    filters = params["filters"]
    NF, S = filters.shape
    B = snp.shape[0]
    memT = jnp.zeros((S, n_genes), jnp.float32).at[snp_ids, gene_ids].add(1.0)
    snp_h = snp[:, :, None] * filters.T[None, :, :]                     # (B, S, NF)
    sample_h = jnp.einsum("sg,bsf->bgf", memT, snp_h, precision=hp).reshape(B, -1)
    h1 = jax.nn.relu(jnp.dot(sample_h, params["w1"], precision=hp) + params["b1"])
    h2 = jax.nn.relu(jnp.dot(h1, params["w2"], precision=hp) + params["b2"])
    nonlinear = jnp.dot(h2, params["w3"], precision=hp) + params["b3"]
    linear = jnp.sum(snp * jnp.sum(filters, axis=0)[None, :], axis=1, keepdims=True)
    return linear, nonlinear, filters


if __name__ == "__main__":
    # Small but non-trivial shapes: 2 batch tiles (exercises the parallel axis) and
    # 2 gene tiles (exercises the reduction / accumulator path).
    B, n_snps, n_genes, n_filters, d_emb = 12, 128, 160, 8, 8
    n_nodes = 512   # nodes in the batched gene graph

    key = jax.random.PRNGKey(0)
    k_par, k_snp, k_ids = jax.random.split(key, 3)
    params = init_params(k_par, n_snps, n_genes, n_filters, d_emb)

    # snp dosages (0/1/2), snp id per graph node, gene id per graph node
    snp = jax.random.randint(k_snp, (B, n_snps), 0, 3).astype(jnp.float32)
    snp_ids = jax.random.randint(k_ids, (n_nodes,), 0, n_snps, dtype=jnp.int32)
    gene_ids = jnp.arange(n_nodes, dtype=jnp.int32) % n_genes

    # ---- f32 path ----
    fwd_f32 = jax.jit(functools.partial(ugp_v2_forward, n_genes=n_genes))
    lin, nonlin, filt = fwd_f32(params, snp, snp_ids, gene_ids)
    jax.block_until_ready((lin, nonlin, filt))

    lin_ref, nonlin_ref, filt_ref = reference_forward(params, snp, snp_ids, gene_ids, n_genes)
    np.testing.assert_allclose(np.asarray(filt), np.asarray(filt_ref), rtol=0, atol=0)
    np.testing.assert_allclose(np.asarray(lin), np.asarray(lin_ref), rtol=1e-4, atol=1e-6)
    # outputs are O(1e-4) by construction (0.001 / 0.02 inits), so atol is the meaningful bound
    np.testing.assert_allclose(np.asarray(nonlin), np.asarray(nonlin_ref), rtol=1e-3, atol=5e-6)
    assert lin.shape == (B, 1) and nonlin.shape == (B, 1) and filt.shape == (n_filters, n_snps)

    # ---- bf16 operand-feed path (f32 accumulation); looser tolerance for the demo ----
    fwd_bf16 = jax.jit(functools.partial(ugp_v2_forward, n_genes=n_genes,
                                         compute_dtype=jnp.bfloat16))
    lin16, nonlin16, _ = fwd_bf16(params, snp, snp_ids, gene_ids)
    jax.block_until_ready((lin16, nonlin16))
    np.testing.assert_allclose(np.asarray(lin16), np.asarray(lin_ref), rtol=5e-2, atol=1e-4)
    np.testing.assert_allclose(np.asarray(nonlin16), np.asarray(nonlin_ref), rtol=1e-1, atol=5e-6)

    print("KERNEL_OK")
</pallas_src>

<mosaic_0001>
module attributes {stable_mosaic.version = 11 : i64} {
  func.func private @main(%arg0: i32) attributes {dimension_semantics = [#tpu.dimension_semantics<core_parallel>], iteration_bounds = array<i64: 2>, tpu.core_type = #tpu.core_type<sc_scalar_subcore>, window_params = []} {
    return
  }
}

module attributes {stable_mosaic.version = 11 : i64} {
  func.func private @main(%arg0: i32) attributes {dimension_semantics = [#tpu.dimension_semantics<core_parallel>], iteration_bounds = array<i64: 2>, tpu.core_type = #tpu.core_type<sc_scalar_subcore>, window_params = []} {
    return
  }
}

module attributes {stable_mosaic.version = 11 : i64} {
  func.func @_ugp_fused_kernel(%arg0: i32, %arg1: i32, %arg2: memref<8x128xf32, #tpu.memory_space<vmem>>, %arg3: memref<128x8xf32, #tpu.memory_space<vmem>>, %arg4: memref<128x128xf32, #tpu.memory_space<vmem>>, %arg5: memref<1024x1024xf32, #tpu.memory_space<vmem>>, %arg6: memref<1x1024xf32, #tpu.memory_space<vmem>>, %arg7: memref<1024x256xf32, #tpu.memory_space<vmem>>, %arg8: memref<1x256xf32, #tpu.memory_space<vmem>>, %arg9: memref<256x1xf32, #tpu.memory_space<vmem>>, %arg10: memref<1x1xf32, #tpu.memory_space<vmem>>, %arg11: memref<8x1xf32, #tpu.memory_space<vmem>>, %arg12: memref<8x1xf32, #tpu.memory_space<vmem>>, %arg13: memref<8x1024xf32, #tpu.memory_space<vmem>>) attributes {dimension_semantics = [#tpu.dimension_semantics<parallel>, #tpu.dimension_semantics<arbitrary>], iteration_bounds = array<i64: 2, 2>, scalar_prefetch = 0 : i64, scratch_operands = 1 : i64, tpu.core_type = #tpu.core_type<tc>, window_params = [{transform_indices = @transform_0, window_bounds = array<i64: 8, 128>}, {pipeline_mode = #tpu.pipeline_mode<synchronous>, transform_indices = @transform_1, window_bounds = array<i64: 128, 8>}, {transform_indices = @transform_2, window_bounds = array<i64: 128, 128>}, {transform_indices = @transform_3, window_bounds = array<i64: 1024, 1024>}, {pipeline_mode = #tpu.pipeline_mode<synchronous>, transform_indices = @transform_4, window_bounds = array<i64: 1, 1024>}, {pipeline_mode = #tpu.pipeline_mode<synchronous>, transform_indices = @transform_5, window_bounds = array<i64: 1024, 256>}, {pipeline_mode = #tpu.pipeline_mode<synchronous>, transform_indices = @transform_6, window_bounds = array<i64: 1, 256>}, {pipeline_mode = #tpu.pipeline_mode<synchronous>, transform_indices = @transform_7, window_bounds = array<i64: 256, 1>}, {pipeline_mode = #tpu.pipeline_mode<synchronous>, transform_indices = @transform_8, window_bounds = array<i64: 1, 1>}, {transform_indices = @transform_9, window_bounds = array<i64: 8, 1>}, {transform_indices = @transform_10, window_bounds = array<i64: 8, 1>}]} {
    %c0_i32 = arith.constant 0 : i32
    %0 = arith.cmpi eq, %arg1, %c0_i32 : i32
    %1 = arith.extui %0 : i1 to i32
    %c0_i32_0 = arith.constant 0 : i32
    %2 = arith.cmpi ne, %1, %c0_i32_0 : i32
    scf.if %2 {
      %cst_14 = arith.constant 0.000000e+00 : f32
      %40 = vector.broadcast %cst_14 : f32 to vector<8x1024xf32>
      %c0_15 = arith.constant 0 : index
      %c0_16 = arith.constant 0 : index
      %41 = vector.load %arg13[%c0_15, %c0_16] : memref<8x1024xf32, #tpu.memory_space<vmem>>, vector<8x1024xf32>
      tpu.vector_store %arg13[%c0_15, %c0_16], %40 {strides = array<i32>} : memref<8x1024xf32, #tpu.memory_space<vmem>>, vector<8x1024xf32>,
    } else {
    }
    %c0 = arith.constant 0 : index
    %c0_1 = arith.constant 0 : index
    %3 = vector.load %arg2[%c0, %c0_1] : memref<8x128xf32, #tpu.memory_space<vmem>>, vector<8x128xf32>
    %c0_2 = arith.constant 0 : index
    %c0_3 = arith.constant 0 : index
    %4 = vector.load %arg3[%c0_2, %c0_3] : memref<128x8xf32, #tpu.memory_space<vmem>>, vector<128x8xf32>
    %c0_4 = arith.constant 0 : index
    %c0_5 = arith.constant 0 : index
    %5 = vector.load %arg4[%c0_4, %c0_5] : memref<128x128xf32, #tpu.memory_space<vmem>>, vector<128x128xf32>
    %6 = vector.extract_strided_slice %4 {offsets = [0, 0], sizes = [128, 1], strides = [1, 1]} : vector<128x8xf32> to vector<128x1xf32>
    %7 = vector.broadcast %6 : vector<128x1xf32> to vector<128x128xf32>
    %8 = arith.mulf %5, %7 : vector<128x128xf32>
    %9 = vector.extract_strided_slice %4 {offsets = [0, 1], sizes = [128, 1], strides = [1, 1]} : vector<128x8xf32> to vector<128x1xf32>
    %10 = vector.broadcast %9 : vector<128x1xf32> to vector<128x128xf32>
    %11 = arith.mulf %5, %10 : vector<128x128xf32>
    %12 = vector.extract_strided_slice %4 {offsets = [0, 2], sizes = [128, 1], strides = [1, 1]} : vector<128x8xf32> to vector<128x1xf32>
    %13 = vector.broadcast %12 : vector<128x1xf32> to vector<128x128xf32>
    %14 = arith.mulf %5, %13 : vector<128x128xf32>
    %15 = vector.extract_strided_slice %4 {offsets = [0, 3], sizes = [128, 1], strides = [1, 1]} : vector<128x8xf32> to vector<128x1xf32>
    %16 = vector.broadcast %15 : vector<128x1xf32> to vector<128x128xf32>
    %17 = arith.mulf %5, %16 : vector<128x128xf32>
    %18 = vector.extract_strided_slice %4 {offsets = [0, 4], sizes = [128, 1], strides = [1, 1]} : vector<128x8xf32> to vector<128x1xf32>
    %19 = vector.broadcast %18 : vector<128x1xf32> to vector<128x128xf32>
    %20 = arith.mulf %5, %19 : vector<128x128xf32>
    %21 = vector.extract_strided_slice %4 {offsets = [0, 5], sizes = [128, 1], strides = [1, 1]} : vector<128x8xf32> to vector<128x1xf32>
    %22 = vector.broadcast %21 : vector<128x1xf32> to vector<128x128xf32>
    %23 = arith.mulf %5, %22 : vector<128x128xf32>
    %24 = vector.extract_strided_slice %4 {offsets = [0, 6], sizes = [128, 1], strides = [1, 1]} : vector<128x8xf32> to vector<128x1xf32>
    %25 = vector.broadcast %24 : vector<128x1xf32> to vector<128x128xf32>
    %26 = arith.mulf %5, %25 : vector<128x128xf32>
    %27 = vector.extract_strided_slice %4 {offsets = [0, 7], sizes = [128, 1], strides = [1, 1]} : vector<128x8xf32> to vector<128x1xf32>
    %28 = vector.broadcast %27 : vector<128x1xf32> to vector<128x128xf32>
    %29 = arith.mulf %5, %28 : vector<128x128xf32>
    %30 = tpu.concatenate %8, %11, %14, %17, %20, %23, %26, %29 in 1 : vector<128x128xf32>, vector<128x128xf32>, vector<128x128xf32>, vector<128x128xf32>, vector<128x128xf32>, vector<128x128xf32>, vector<128x128xf32>, vector<128x128xf32> -> vector<128x1024xf32>
    %cst = arith.constant dense<0.000000e+00> : vector<8x1024xf32>
    %31 = tpu.matmul %3, %30, %cst {dimension_numbers = #tpu.dot_dimension_numbers<[1], [0], [0], [1], [0, 0, 1, 1], [], []>} : vector<8x128xf32>, vector<128x1024xf32>, vector<8x1024xf32> -> vector<8x1024xf32>
    %c0_6 = arith.constant 0 : index
    %c0_7 = arith.constant 0 : index
    %32 = vector.load %arg13[%c0_6, %c0_7] : memref<8x1024xf32, #tpu.memory_space<vmem>>, vector<8x1024xf32>
    %c0_8 = arith.constant 0 : index
    %c0_9 = arith.constant 0 : index
    %33 = vector.load %arg5[%c0_8, %c0_9] : memref<1024x1024xf32, #tpu.memory_space<vmem>>, vector<1024x1024xf32>
    %cst_10 = arith.constant dense<0.000000e+00> : vector<8x1024xf32>
    %34 = tpu.matmul %31, %33, %cst_10 {dimension_numbers = #tpu.dot_dimension_numbers<[1], [0], [0], [1], [0, 0, 1, 1], [], []>} : vector<8x1024xf32>, vector<1024x1024xf32>, vector<8x1024xf32> -> vector<8x1024xf32>
    %35 = arith.addf %32, %34 : vector<8x1024xf32>
    %c0_11 = arith.constant 0 : index
    %c0_12 = arith.constant 0 : index
    %36 = vector.load %arg13[%c0_11, %c0_12] : memref<8x1024xf32, #tpu.memory_space<vmem>>, vector<8x1024xf32>
    tpu.vector_store %arg13[%c0_11, %c0_12], %35 {strides = array<i32>} : memref<8x1024xf32, #tpu.memory_space<vmem>>, vector<8x1024xf32>,
    %c1_i32 = arith.constant 1 : i32
    %37 = arith.cmpi eq, %arg1, %c1_i32 : i32
    %38 = arith.extui %37 : i1 to i32
    %c0_i32_13 = arith.constant 0 : i32
    %39 = arith.cmpi ne, %38, %c0_i32_13 : i32
    scf.if %39 {
      %cst_14 = arith.constant dense<0.000000e+00> : vector<128xf32>
      %40 = vector.multi_reduction <add>, %4, %cst_14 [1] : vector<128x8xf32> to vector<128xf32>
      %41 = vector.shape_cast %40 : vector<128xf32> to vector<128x1xf32>
      %cst_15 = arith.constant dense<0.000000e+00> : vector<8x1xf32>
      %42 = tpu.matmul %3, %41, %cst_15 {dimension_numbers = #tpu.dot_dimension_numbers<[1], [0], [0], [1], [0, 0, 1, 1], [], []>} : vector<8x128xf32>, vector<128x1xf32>, vector<8x1xf32> -> vector<8x1xf32>
      %c0_16 = arith.constant 0 : index
      %c0_17 = arith.constant 0 : index
      %43 = vector.load %arg11[%c0_16, %c0_17] : memref<8x1xf32, #tpu.memory_space<vmem>>, vector<8x1xf32>
      tpu.vector_store %arg11[%c0_16, %c0_17], %42 {strides = array<i32>} : memref<8x1xf32, #tpu.memory_space<vmem>>, vector<8x1xf32>,
      %c0_18 = arith.constant 0 : index
      %c0_19 = arith.constant 0 : index
      %44 = vector.load %arg13[%c0_18, %c0_19] : memref<8x1024xf32, #tpu.memory_space<vmem>>, vector<8x1024xf32>
      %c0_20 = arith.constant 0 : index
      %c0_21 = arith.constant 0 : index
      %45 = vector.load %arg6[%c0_20, %c0_21] : memref<1x1024xf32, #tpu.memory_space<vmem>>, vector<1x1024xf32>
      %46 = vector.broadcast %45 : vector<1x1024xf32> to vector<8x1024xf32>
      %47 = arith.addf %44, %46 : vector<8x1024xf32>
      %cst_22 = arith.constant 0.000000e+00 : f32
      %48 = vector.broadcast %cst_22 : f32 to vector<8x1024xf32>
      %49 = arith.maximumf %47, %48 : vector<8x1024xf32>
      %c0_23 = arith.constant 0 : index
      %c0_24 = arith.constant 0 : index
      %50 = vector.load %arg7[%c0_23, %c0_24] : memref<1024x256xf32, #tpu.memory_space<vmem>>, vector<1024x256xf32>
      %cst_25 = arith.constant dense<0.000000e+00> : vector<8x256xf32>
      %51 = tpu.matmul %49, %50, %cst_25 {dimension_numbers = #tpu.dot_dimension_numbers<[1], [0], [0], [1], [0, 0, 1, 1], [], []>} : vector<8x1024xf32>, vector<1024x256xf32>, vector<8x256xf32> -> vector<8x256xf32>
      %c0_26 = arith.constant 0 : index
      %c0_27 = arith.constant 0 : index
      %52 = vector.load %arg8[%c0_26, %c0_27] : memref<1x256xf32, #tpu.memory_space<vmem>>, vector<1x256xf32>
      %53 = vector.broadcast %52 : vector<1x256xf32> to vector<8x256xf32>
      %54 = arith.addf %51, %53 : vector<8x256xf32>
      %cst_28 = arith.constant 0.000000e+00 : f32
      %55 = vector.broadcast %cst_28 : f32 to vector<8x256xf32>
      %56 = arith.maximumf %54, %55 : vector<8x256xf32>
      %c0_29 = arith.constant 0 : index
      %c0_30 = arith.constant 0 : index
      %57 = vector.load %arg9[%c0_29, %c0_30] : memref<256x1xf32, #tpu.memory_space<vmem>>, vector<256x1xf32>
      %cst_31 = arith.constant dense<0.000000e+00> : vector<8x1xf32>
      %58 = tpu.matmul %56, %57, %cst_31 {dimension_numbers = #tpu.dot_dimension_numbers<[1], [0], [0], [1], [0, 0, 1, 1], [], []>} : vector<8x256xf32>, vector<256x1xf32>, vector<8x1xf32> -> vector<8x1xf32>
      %c0_32 = arith.constant 0 : index
      %c0_33 = arith.constant 0 : index
      %59 = vector.load %arg10[%c0_32, %c0_33] : memref<1x1xf32, #tpu.memory_space<vmem>>, vector<1x1xf32>
      %60 = vector.broadcast %59 : vector<1x1xf32> to vector<8x1xf32>
      %61 = arith.addf %58, %60 : vector<8x1xf32>
      %c0_34 = arith.constant 0 : index
      %c0_35 = arith.constant 0 : index
      %62 = vector.load %arg12[%c0_34, %c0_35] : memref<8x1xf32, #tpu.memory_space<vmem>>, vector<8x1xf32>
      tpu.vector_store %arg12[%c0_34, %c0_35], %61 {strides = array<i32>} : memref<8x1xf32, #tpu.memory_space<vmem>>, vector<8x1xf32>,
    } else {
    }
    return
  }
  func.func @transform_0(%arg0: i32, %arg1: i32) -> (i32, i32) {
    %c0_i32 = arith.constant 0 : i32
    %c0_i32_0 = arith.constant 0 : i32
    return %arg0, %c0_i32 : i32, i32
  }
  func.func @transform_1(%arg0: i32, %arg1: i32) -> (i32, i32) {
    %c0_i32 = arith.constant 0 : i32
    %c0_i32_0 = arith.constant 0 : i32
    %c0_i32_1 = arith.constant 0 : i32
    return %c0_i32, %c0_i32_0 : i32, i32
  }
  func.func @transform_2(%arg0: i32, %arg1: i32) -> (i32, i32) {
    %c0_i32 = arith.constant 0 : i32
    %c0_i32_0 = arith.constant 0 : i32
    return %c0_i32, %arg1 : i32, i32
  }
  func.func @transform_3(%arg0: i32, %arg1: i32) -> (i32, i32) {
    %c0_i32 = arith.constant 0 : i32
    %c0_i32_0 = arith.constant 0 : i32
    return %arg1, %c0_i32 : i32, i32
  }
  func.func @transform_4(%arg0: i32, %arg1: i32) -> (i32, i32) {
    %c0_i32 = arith.constant 0 : i32
    %c0_i32_0 = arith.constant 0 : i32
    %c0_i32_1 = arith.constant 0 : i32
    return %c0_i32, %c0_i32_0 : i32, i32
  }
  func.func @transform_5(%arg0: i32, %arg1: i32) -> (i32, i32) {
    %c0_i32 = arith.constant 0 : i32
    %c0_i32_0 = arith.constant 0 : i32
    %c0_i32_1 = arith.constant 0 : i32
    return %c0_i32, %c0_i32_0 : i32, i32
  }
  func.func @transform_6(%arg0: i32, %arg1: i32) -> (i32, i32) {
    %c0_i32 = arith.constant 0 : i32
    %c0_i32_0 = arith.constant 0 : i32
    %c0_i32_1 = arith.constant 0 : i32
    return %c0_i32, %c0_i32_0 : i32, i32
  }
  func.func @transform_7(%arg0: i32, %arg1: i32) -> (i32, i32) {
    %c0_i32 = arith.constant 0 : i32
    %c0_i32_0 = arith.constant 0 : i32
    %c0_i32_1 = arith.constant 0 : i32
    return %c0_i32, %c0_i32_0 : i32, i32
  }
  func.func @transform_8(%arg0: i32, %arg1: i32) -> (i32, i32) {
    %c0_i32 = arith.constant 0 : i32
    %c0_i32_0 = arith.constant 0 : i32
    %c0_i32_1 = arith.constant 0 : i32
    return %c0_i32, %c0_i32_0 : i32, i32
  }
  func.func @transform_9(%arg0: i32, %arg1: i32) -> (i32, i32) {
    %c0_i32 = arith.constant 0 : i32
    %c0_i32_0 = arith.constant 0 : i32
    return %arg0, %c0_i32 : i32, i32
  }
  func.func @transform_10(%arg0: i32, %arg1: i32) -> (i32, i32) {
    %c0_i32 = arith.constant 0 : i32
    %c0_i32_0 = arith.constant 0 : i32
    return %arg0, %c0_i32 : i32, i32
  }
}

</mosaic_0001>

<bundles_post_ra>
// kernel: ugp_v2_forward.1
= control target key start
LH: loop header
LB: loop body
LE: loop exit
PB: predicated region body
PF: predicated region fallthrough
CT: control target
= control target key end

     0   :  { %s9212_s0 = inlined_call_operand.vmem [shape: f32[16,128], index: 0, kind: input, shape index: {}]   ;;  %s9213_s1 = inlined_call_operand.vmem [shape: f32[128,8], index: 1, kind: input, shape index: {}]   ;;  %s9214_s2 = inlined_call_operand.vmem [shape: f32[128,256], index: 2, kind: input, shape index: {}]   ;;  %s9215_s3 = inlined_call_operand.vmem [shape: f32[2048,1024], index: 3, kind: input, shape index: {}]   ;;  %s9216_s4 = inlined_call_operand.vmem [shape: f32[1,1024], index: 4, kind: input, shape index: {}]   ;;  %s9217_s5 = inlined_call_operand.vmem [shape: f32[1024,256], index: 5, kind: input, shape index: {}]   ;;  %s9218_s6 = inlined_call_operand.vmem [shape: f32[1,256], index: 6, kind: input, shape index: {}]   ;;  %s9219_s7 = inlined_call_operand.vmem [shape: f32[256,1], index: 7, kind: input, shape index: {}]   ;;  %s9220_s8 = inlined_call_operand.<no memory space> [shape: f32[1,1], index: 8, kind: input, shape index: {}]   ;;  %s9221_s9 = inlined_call_operand.vmem [shape: f32[16,1], index: 9, kind: output, shape index: {0}]   ;;  %s9222_s10 = inlined_call_operand.vmem [shape: f32[16,1], index: 10, kind: output, shape index: {1}]  }
   0x1   :  { %9225 = sst [smem:[#allocation8_spill]] %s9214_s2  ;;  %v16_v0 = vstv %s9220_s8 }
   0x2   :  { %17 = vst [vmem:[#allocation3] sm:$0x1] %v16_v0 }
   0x3   :  { %s6542_s15 = smov 0   ;;  %s6544_s16 = smov 0  }
   0x4   :  { %s6546_s17 = smov 0   ;;  %s6548_s18 = smov 0  }
   0x5   :  { %s6550_s19 = smov 0   ;;  %s6552_s20 = smov 0  }
   0x6   :  { %s6554_s21 = smov 0  }
   0x7 LB: > { %9226 = sst [smem:[#allocation5_spill]] %s6465_s20  ;;  %s32_s8 = sadd.s32 1, %s6461_s19  ;;  %s6469_s21 = sphi %s6554_s21, %s23_s21   ;;  %s6465_s20 = sphi %s6552_s20, %s9237_s20   ;;  %s6461_s19 = sphi %s6550_s19, %s9236_s19   ;;  %s6457_s18 = sphi %s6548_s18, %s9230_s18   ;;  %s6453_s17 = sphi %s6546_s17, %s9235_s17   ;;  %s6449_s16 = sphi %s6544_s16, %s9234_s16   ;;  %s6445_s15 = sphi %s6542_s15, %s9233_s15  }
   0x8   : > { %s35_s22 = sadd.s32 1, %s6465_s20  ;;  %p33_p0 = scmp.ge.s32.totalorder %s32_s8, 2 }
   0x9   : > { %s89_s23 = sadd.s32 1, %s6449_s16  ;;  %p96_p1 = scmp.ne.s32.totalorder %s6449_s16, %s6445_s15 }
   0xa   : > { %p97_p2 = scmp.eq.s32.totalorder %s6469_s21, 0  ;;  %s9239_s8 = smov (%p33_p0, %s32_s8), 0 }
   0xb   : > { %9227 = sst [smem:[#allocation6_spill]] %s9239_s8  ;;  %s9241_s22 = smov (!%p33_p0, %s35_s22), %s6465_s20 }
   0xc   : > { %s86_s24 = ssub.s32 %s6461_s19, %s9239_s8  ;;  %p98_p3 = por %p97_p2, %p96_p1 }
   0xd   : > { %p37_p4 = scmp.ge.s32.totalorder %s9241_s22, 2  ;;  %p87_p5 = scmp.eq.s32.totalorder %s86_s24, 0 }
   0xe   : > { %p4671_p6 = scmp.ge.s32.totalorder %s6469_s21, 4 }
   0xf   : > { %s9243_s22 = smov (%p37_p4, %s9241_s22), 0 }
  0x10   : > { %9228 = sst [smem:[#allocation7_spill]] %s9243_s22  ;;  %323 = sbr.rel (%p4671_p6) target bundleno = 41 (0x29), region = 40 }
  0x11   : > { %s6591_s25 = scalar_select %p87_p5, %s6449_s16, %s89_s23  }
  0x17   : > { %333 = sbr.rel (!%p98_p3) target bundleno = 41 (0x29), region = 48  ;;  %s335_s26 = sand.u32 (%p98_p3), 1, %s6449_s16  }
  0x18   : > { %s4673_s27 = sshll.u32 (%p98_p3), %s6461_s19, 3  ;;  %s4672_s28 = sshll.u32 (%p98_p3), %s335_s26, 7 }
  0x19   : > { %s9229_s2 = sld [smem:[#allocation8_spill]] (%p98_p3)  ;;  %s337_s12 = scalar_lea.vmem (%p98_p3), [#allocation4], %s4672_s28 }
  0x1f   : > { %s6599_s11 = scalar_lea.vmem %s9229_s2, %s4673_s27 }
  0x20   : > { %v397_v1 = vld [vmem:[%s6599_s11] sm:$0xff]  ;;  %v399_v2 = vld [vmem:[%s6599_s11 + $0x10] sm:$0xff] }
  0x21   : > { %v401_v3 = vld [vmem:[%s6599_s11 + $0x20] sm:$0xff]  ;;  %398 = vst [vmem:[%s337_s12] sm:$0xff] %v397_v1  ;;  %400 = vst [vmem:[%s337_s12 + $0x8] sm:$0xff] %v399_v2  ;;  %v403_v4 = vld [vmem:[%s6599_s11 + $0x30] sm:$0xff] }
  0x22   : > { %402 = vst [vmem:[%s337_s12 + $0x10] sm:$0xff] %v401_v3  ;;  %v405_v5 = vld [vmem:[%s6599_s11 + $0x40] sm:$0xff]  ;;  %v407_v6 = vld [vmem:[%s6599_s11 + $0x50] sm:$0xff]  ;;  %404 = vst [vmem:[%s337_s12 + $0x18] sm:$0xff] %v403_v4 }
  0x23   : > { %406 = vst [vmem:[%s337_s12 + $0x20] sm:$0xff] %v405_v5  ;;  %408 = vst [vmem:[%s337_s12 + $0x28] sm:$0xff] %v407_v6  ;;  %v409_v7 = vld [vmem:[%s6599_s11 + $0x60] sm:$0xff]  ;;  %v411_v8 = vld [vmem:[%s6599_s11 + $0x70] sm:$0xff] }
  0x24   : > { %v413_v9 = vld [vmem:[%s6599_s11 + $0x80] sm:$0xff]  ;;  %410 = vst [vmem:[%s337_s12 + $0x30] sm:$0xff] %v409_v7  ;;  %412 = vst [vmem:[%s337_s12 + $0x38] sm:$0xff] %v411_v8  ;;  %v415_v10 = vld [vmem:[%s6599_s11 + $0x90] sm:$0xff] }
  0x25   : > { %414 = vst [vmem:[%s337_s12 + $0x40] sm:$0xff] %v413_v9  ;;  %v417_v11 = vld [vmem:[%s6599_s11 + $0xa0] sm:$0xff]  ;;  %v419_v12 = vld [vmem:[%s6599_s11 + $0xb0] sm:$0xff]  ;;  %416 = vst [vmem:[%s337_s12 + $0x48] sm:$0xff] %v415_v10 }
  0x26   : > { %418 = vst [vmem:[%s337_s12 + $0x50] sm:$0xff] %v417_v11  ;;  %420 = vst [vmem:[%s337_s12 + $0x58] sm:$0xff] %v419_v12  ;;  %v421_v13 = vld [vmem:[%s6599_s11 + $0xc0] sm:$0xff]  ;;  %v423_v14 = vld [vmem:[%s6599_s11 + $0xd0] sm:$0xff] }
  0x27   : > { %v425_v15 = vld [vmem:[%s6599_s11 + $0xe0] sm:$0xff]  ;;  %422 = vst [vmem:[%s337_s12 + $0x60] sm:$0xff] %v421_v13  ;;  %424 = vst [vmem:[%s337_s12 + $0x68] sm:$0xff] %v423_v14  ;;  %v427_v16 = vld [vmem:[%s6599_s11 + $0xf0] sm:$0xff] }
  0x28   : > { %426 = vst [vmem:[%s337_s12 + $0x70] sm:$0xff] %v425_v15  ;;  %428 = vst [vmem:[%s337_s12 + $0x78] sm:$0xff] %v427_v16 }
  0x29 PF: > { %p4674_p7 = scmp.ge.s32.totalorder %s6469_s21, 1  ;;  %p443_p8 = scmp.lt.s32.totalorder %s6469_s21, 5 }
  0x2b   : > { %p444_p9 = pnand %p4674_p7, %p443_p8 }
  0x2c   : > { %s450_s13 = sand.u32 (!%p444_p9), 1, %s6445_s15   ;;  %p500_p10 = scmp.lt.s32.totalorder (!%p444_p9), %s6457_s18, 1 }
  0x2d   : > { %447 = sbr.rel (%p444_p9) target bundleno = 1960 (0x7a8), region = 90  ;;  %s4675_s14 = sshll.u32 (!%p444_p9), %s450_s13, 7 }
  0x2e   : > { %s4677_s23 = sshll.u32 (!%p444_p9), %s6453_s17, 7  ;;  %s6644_s20 = scalar_lea.vmem (!%p444_p9), [#allocation4], %s4675_s14 }
  0x2f   : > { %p505_p11 = scmp.lt.s32.totalorder (!%p444_p9), %s4677_s23, 255  ;;  %p4682_p12 = scmp.ne.s32.totalorder (!%p444_p9), %s6453_s17, 0 }
  0x34   : > { %s9245_s18 = smov (!%p500_p10, %s6457_s18), 1  ;;  %s9247_s23 = smov (!%p505_p11, %s4677_s23), 255 }
  0x35   : > { %s6623_s24 = sshll.u32 %s9245_s18, 3  ;;  %s4687_s29 = sshll.u32 %s9247_s23, 6  ;;  %v6471_v17 = vmov (!%p4682_p12), 0.0  }
  0x36   : > { %s6629_s28 = scalar_lea.vmem %s9212_s0, %s6623_s24  ;;  %s6634_s15 = scalar_lea.vmem %s9215_s3, %s4687_s29  ;;  %523 = vst [vmem:[#allocation2] sm:$0xff] (!%p4682_p12), %v6471_v17  ;;  %524 = vst [vmem:[#allocation2 + $0x8] sm:$0xff] (!%p4682_p12), %v6471_v17 }
  0x37   : > { %s514_s2 = scalar_lea.vmem %s9221_s9, %s6623_s24  ;;  %s518_s8 = scalar_lea.vmem %s9222_s10, %s6623_s24  ;;  %525 = vst [vmem:[#allocation2 + $0x10] sm:$0xff] (!%p4682_p12), %v6471_v17  ;;  %526 = vst [vmem:[#allocation2 + $0x18] sm:$0xff] (!%p4682_p12), %v6471_v17 }
  0x38   : > { %522 = sbr.rel (%p4682_p12) target bundleno = 63 (0x3f), region = 98  ;;  %527 = vst [vmem:[#allocation2 + $0x20] sm:$0xff] (!%p4682_p12), %v6471_v17  ;;  %528 = vst [vmem:[#allocation2 + $0x28] sm:$0xff] (!%p4682_p12), %v6471_v17 }
  0x39   : > { %529 = vst [vmem:[#allocation2 + $0x30] sm:$0xff] (!%p4682_p12), %v6471_v17  ;;  %530 = vst [vmem:[#allocation2 + $0x38] sm:$0xff] (!%p4682_p12), %v6471_v17 }
  0x3f PF: > { %v6650_v18 = vld [vmem:[%s9213_s1] sm:$0xff]  ;;  %v6472_v19 = vmov 1   ;;  %v6473_v20 = vmov 0   ;;  %v6659_v21 = vld [vmem:[%s9213_s1 + $0x8] sm:$0xff]  ;;  %v6666_v22 = vld [vmem:[%s9213_s1 + $0x10] sm:$0xff]  ;;  %v6474_v33 = vmov 3  }
  0x40   : > { %6340 = vset.pattern.permute.xlu0 %v6472_v19  ;;  %6341 = vset.pattern.permute.xlu1 %v6473_v20  ;;  %v6671_v23 = vld [vmem:[%s9213_s1 + $0x18] sm:$0xff]  ;;  %v6679_v24 = vld [vmem:[%s9213_s1 + $0x28] sm:$0xff]  ;;  %v6686_v25 = vld [vmem:[%s9213_s1 + $0x30] sm:$0xff]  ;;  %v6475_v37 = vmov 2   ;;  %v6476_v38 = vmov 4   ;;  %v6477_v39 = vmov 5  }
  0x41   : > { %566 = vperm.xlu1 %6341, %v6650_v18   ;;  %661 = vperm.xlu0 %6340, %v6650_v18   ;;  %v6693_v26 = vld [vmem:[%s9213_s1 + $0x20] sm:$0xff]  ;;  %v6698_v27 = vld [vmem:[%s9213_s1 + $0x48] sm:$0xff]  ;;  %v6706_v28 = vld [vmem:[%s9213_s1 + $0x50] sm:$0xff]  ;;  %v6478_v2 = vmov 7   ;;  %p4683_p13 = scmp.ne.s32.totalorder %s6453_s17, 1 }
  0x42   : > { %v6714_v29 = vld [vmem:[%s9213_s1 + $0x68] sm:$0xff]  ;;  %v6721_v30 = vld [vmem:[%s9213_s1 + $0x70] sm:$0xff]  ;;  %v6726_v31 = vld [vmem:[%s9213_s1 + $0x38] sm:$0xff]  ;;  %vm3692_vm0 = vcmask (!%p4683_p13), 64512   ;;  %vm6482_vm1 = vmmov (!%p4683_p13), 0   ;;  %vm3811_vm2 = vcmask (!%p4683_p13), 7168  }
  0x43   : > { %v6738_v32 = vld [vmem:[%s9213_s1 + $0x40] sm:$0xff]  ;;  %v6752_v34 = vld [vmem:[%s9213_s1 + $0x58] sm:$0xff]  ;;  %v6818_v43 = vld [vmem:[%s6644_s20 + $0x8] sm:$0xff] }
  0x44   : > { %v6764_v35 = vld [vmem:[%s9213_s1 + $0x60] sm:$0xff]  ;;  %v6777_v36 = vld [vmem:[%s9213_s1 + $0x78] sm:$0xff]  ;;  %v6859_v7 = vld [vmem:[%s6644_s20 + $0x28] sm:$0xff] }
  0x45   : > { %571 = vperm.xlu1 %6341, %v6659_v21   ;;  %665 = vperm.xlu0 %6340, %v6659_v21   ;;  %v6814_v42 = vld [vmem:[%s6644_s20] sm:$0xff]  ;;  %v6827_v50 = vld [vmem:[%s6644_s20 + $0x10] sm:$0xff]  ;;  %v6832_v51 = vld [vmem:[%s6644_s20 + $0x18] sm:$0xff] }
  0x46   : > { %v6862_v8 = vld [vmem:[%s6644_s20 + $0x20] sm:$0xff]  ;;  %v6871_v13 = vld [vmem:[%s6644_s20 + $0x30] sm:$0xff]  ;;  %v6874_v14 = vld [vmem:[%s6644_s20 + $0x38] sm:$0xff] }
  0x49   : > { %6342 = vset.pattern.permute.xlu1 %v6472_v19  ;;  %669 = vperm.xlu0 %6340, %v6666_v22  }
  0x4a   : > { %673 = vperm.xlu1 %6342, %v6671_v23  }
  0x4d   : > { %681 = vperm.xlu0 %6340, %v6679_v24  }
  0x4e   : > { %6343 = vset.pattern.permute.xlu1 %v6473_v20 }
  0x4f   : > { %581 = vperm.xlu1 %6343, %v6671_v23  }
  0x51   : > { %685 = vperm.xlu0 %6340, %v6686_v25  }
  0x53   : > { %6344 = vset.pattern.permute.xlu1 %v6472_v19 }
  0x54   : > { %677 = vperm.xlu1 %6344, %v6693_v26  }
  0x55   : > { %697 = vperm.xlu0 %6340, %v6698_v27  }
  0x58   : > { %6345 = vset.pattern.permute.xlu1 %v6473_v20 }
  0x59   : > { %586 = vperm.xlu1 %6345, %v6693_v26   ;;  %701 = vperm.xlu0 %6340, %v6706_v28  }
  0x5d   : > { %591 = vperm.xlu1 %6345, %v6679_v24   ;;  %713 = vperm.xlu0 %6340, %v6714_v29  }
  0x61   : > { %6346 = vset.pattern.permute.xlu1 %v6472_v19  ;;  %717 = vperm.xlu0 %6340, %v6721_v30  }
  0x62   : > { %689 = vperm.xlu1 %6346, %v6726_v31  }
  0x65   : > { %6354 = vset.pattern.permute.xlu0 %v6473_v20 }
  0x66   : > { %6347 = vset.pattern.permute.xlu1 %v6473_v20  ;;  %576 = vperm.xlu0 %6354, %v6666_v22  }
  0x67   : > { %601 = vperm.xlu1 %6347, %v6726_v31  }
  0x6a   : > { %596 = vperm.xlu0 %6354, %v6686_v25  }
  0x6b   : > { %6348 = vset.pattern.permute.xlu1 %v6472_v19 }
  0x6c   : > { %693 = vperm.xlu1 %6348, %v6738_v32  }
  0x6e   : > { %616 = vperm.xlu0 %6354, %v6706_v28  }
  0x70   : > { %6349 = vset.pattern.permute.xlu1 %v6473_v20 }
  0x71   : > { %606 = vperm.xlu1 %6349, %v6738_v32  }
  0x72   : > { %636 = vperm.xlu0 %6354, %v6721_v30  }
  0x75   : > { %611 = vperm.xlu1 %6349, %v6698_v27  }
  0x76   : > { %6358 = vset.pattern.permute.xlu0 %v6474_v33 }
  0x77   : > { %825 = vperm.xlu0 %6358, %v6659_v21  }
  0x79   : > { %6350 = vset.pattern.permute.xlu1 %v6472_v19 }
  0x7a   : > { %705 = vperm.xlu1 %6350, %v6752_v34  }
  0x7b   : > { %829 = vperm.xlu0 %6358, %v6666_v22  }
  0x7e   : > { %6351 = vset.pattern.permute.xlu1 %v6473_v20 }
  0x7f   : > { %621 = vperm.xlu1 %6351, %v6752_v34   ;;  %841 = vperm.xlu0 %6358, %v6679_v24  }
  0x83   : > { %6352 = vset.pattern.permute.xlu1 %v6472_v19  ;;  %845 = vperm.xlu0 %6358, %v6686_v25  }
  0x84   : > { %709 = vperm.xlu1 %6352, %v6764_v35  }
  0x87   : > { %857 = vperm.xlu0 %6358, %v6698_v27  }
  0x88   : > { %6353 = vset.pattern.permute.xlu1 %v6473_v20 }
  0x89   : > { %626 = vperm.xlu1 %6353, %v6764_v35  }
  0x8b   : > { %861 = vperm.xlu0 %6358, %v6706_v28  }
  0x8d   : > { %631 = vperm.xlu1 %6353, %v6714_v29  }
  0x8f   : > { %873 = vperm.xlu0 %6358, %v6714_v29  }
  0x91   : > { %6355 = vset.pattern.permute.xlu1 %v6472_v19 }
  0x92   : > { %721 = vperm.xlu1 %6355, %v6777_v36  }
  0x93   : > { %877 = vperm.xlu0 %6358, %v6721_v30  }
  0x96   : > { %6356 = vset.pattern.permute.xlu1 %v6473_v20 }
  0x97   : > { %641 = vperm.xlu1 %6356, %v6777_v36   ;;  %6372 = vset.pattern.permute.xlu0 %v6475_v37 }
  0x98   : > { %749 = vperm.xlu0 %6372, %v6666_v22  }
  0x9b   : > { %6357 = vset.pattern.permute.xlu1 %v6474_v33 }
  0x9c   : > { %821 = vperm.xlu1 %6357, %v6650_v18   ;;  %765 = vperm.xlu0 %6372, %v6686_v25  }
  0xa0   : > { %6359 = vset.pattern.permute.xlu1 %v6475_v37  ;;  %781 = vperm.xlu0 %6372, %v6706_v28  }
  0xa1   : > { %741 = vperm.xlu1 %6359, %v6650_v18  }
  0xa4   : > { %797 = vperm.xlu0 %6372, %v6721_v30  }
  0xa5   : > { %745 = vperm.xlu1 %6359, %v6659_v21  }
  0xa8   : > { %6378 = vset.pattern.permute.xlu0 %v6476_v38 }
  0xa9   : > { %6360 = vset.pattern.permute.xlu1 %v6474_v33  ;;  %909 = vperm.xlu0 %6378, %v6666_v22  }
  0xaa   : > { %833 = vperm.xlu1 %6360, %v6671_v23  }
  0xad   : > { %925 = vperm.xlu0 %6378, %v6686_v25  }
  0xae   : > { %6361 = vset.pattern.permute.xlu1 %v6475_v37 }
  0xaf   : > { %753 = vperm.xlu1 %6361, %v6671_v23  }
  0xb1   : > { %941 = vperm.xlu0 %6378, %v6706_v28  }
  0xb3   : > { %6362 = vset.pattern.permute.xlu1 %v6474_v33 }
  0xb4   : > { %837 = vperm.xlu1 %6362, %v6693_v26  }
  0xb5   : > { %953 = vperm.xlu0 %6378, %v6714_v29  }
  0xb8   : > { %6363 = vset.pattern.permute.xlu1 %v6475_v37 }
  0xb9   : > { %757 = vperm.xlu1 %6363, %v6693_v26   ;;  %6392 = vset.pattern.permute.xlu0 %v6477_v39 }
  0xba   : > { %985 = vperm.xlu0 %6392, %v6659_v21  }
  0xbd   : > { %761 = vperm.xlu1 %6363, %v6679_v24  }
  0xbe   : > { %989 = vperm.xlu0 %6392, %v6666_v22  }
  0xc0   : > { %v567_v40 = vpop.permute.xlu1 %566  ;;  %v662_v41 = vpop.permute.xlu0 %661 }
  0xc1   : > { %6364 = vset.pattern.permute.xlu1 %v6474_v33  ;;  %v724_v44 = vmul.f32 %v662_v41, %v6814_v42  ;;  %v644_v47 = vmul.f32 %v567_v40, %v6814_v42 }
  0xc2   : > { %849 = vperm.xlu1 %6364, %v6726_v31   ;;  %1001 = vperm.xlu0 %6392, %v6679_v24  }
  0xc4   : > { %v572_v45 = vpop.permute.xlu1 %571  ;;  %v666_v46 = vpop.permute.xlu0 %665 }
  0xc5   : > { %v645_v48 = vmul.f32 %v572_v45, %v6818_v43  ;;  %v725_v49 = vmul.f32 %v666_v46, %v6818_v43  ;;  %v6884_v45 = vld [vmem:[%s6644_s20 + $0x48] sm:$0xff] }
  0xc6   : > { %6365 = vset.pattern.permute.xlu1 %v6475_v37  ;;  %1005 = vperm.xlu0 %6392, %v6686_v25  }
  0xc7   : > { %769 = vperm.xlu1 %6365, %v6726_v31   ;;  %v4775_v52 = vpack.c.bf16 %v725_v49, %v724_v44  ;;  %v4777_v53 = vpack.c.bf16 %v645_v48, %v644_v47  ;;  %v6888_v47 = vld [vmem:[%s6644_s20 + $0x40] sm:$0xff]  ;;  %v6479_v49 = vmov 6  }
  0xc8   : > { %v670_v54 = vpop.permute.xlu0 %669 }
  0xc9   : > { %v674_v55 = vpop.permute.xlu1 %673  ;;  %4776 = vmatprep.subr.bf16.mxu0 %v4775_v52  ;;  %v726_v56 = vmul.f32 %v670_v54, %v6827_v50 }
  0xca   : > { %v727_v57 = vmul.f32 %v674_v55, %v6832_v51  ;;  %4778 = vmatpush1.bf16.msra.mxu0 %v4777_v53  ;;  %1017 = vperm.xlu0 %6392, %v6698_v27  }
  0xcb   : > { %6366 = vset.pattern.permute.xlu1 %v6474_v33 }
  0xcc   : > { %v4779_v58 = vpack.c.bf16 %v727_v57, %v726_v56  ;;  %853 = vperm.xlu1 %6366, %v6738_v32   ;;  %v682_v59 = vpop.permute.xlu0 %681 }
  0xcd   : > { %v729_v9 = vmul.f32 %v682_v59, %v6859_v7 }
  0xce   : > { %v582_v60 = vpop.permute.xlu1 %581  ;;  %4780 = vmatprep.subr.bf16.mxu0 %v4779_v58  ;;  %1021 = vperm.xlu0 %6392, %v6706_v28  }
  0xcf   : > { %v647_v12 = vmul.f32 %v582_v60, %v6832_v51 }
  0xd0   : > { %6367 = vset.pattern.permute.xlu1 %v6475_v37  ;;  %v686_v61 = vpop.permute.xlu0 %685 }
  0xd1   : > { %773 = vperm.xlu1 %6367, %v6738_v32   ;;  %v730_v20 = vmul.f32 %v686_v61, %v6871_v13 }
  0xd2   : > { %1029 = vperm.xlu0 %6392, %v6764_v35  }
  0xd3   : > { %v678_v62 = vpop.permute.xlu1 %677 }
  0xd4   : > { %v698_v63 = vpop.permute.xlu0 %697  ;;  %v728_v10 = vmul.f32 %v678_v62, %v6862_v8 }
  0xd5   : > { %777 = vperm.xlu1 %6367, %v6698_v27   ;;  %v733_v54 = vmul.f32 %v698_v63, %v6884_v45 }
  0xd6   : > { %1041 = vperm.xlu0 %6392, %v6777_v36   ;;  %v4783_v40 = vpack.c.bf16 %v729_v9, %v728_v10 }
  0xd8   : > { %v587_v0 = vpop.permute.xlu1 %586  ;;  %v6845_v1 = vpop.permute.xlu0 %701 }
  0xd9   : > { %6368 = vset.pattern.permute.xlu1 %v6474_v33  ;;  %v648_v46 = vmul.f32 %v587_v0, %v6862_v8  ;;  %v6904_v0 = vld [vmem:[%s6644_s20 + $0x50] sm:$0xff] }
  0xda   : > { %865 = vperm.xlu1 %6368, %v6752_v34   ;;  %6396 = vset.pattern.permute.xlu0 %v6478_v2  ;;  %v734_v10 = vmul.f32 %v6845_v1, %v6904_v0  ;;  %v6922_v1 = vld [vmem:[%s6644_s20 + $0x68] sm:$0xff] }
  0xdb   : > { %1145 = vperm.xlu0 %6396, %v6659_v21  }
  0xdc   : > { %v592_v3 = vpop.permute.xlu1 %591  ;;  %v6851_v4 = vpop.permute.xlu0 %713 }
  0xdd   : > { %v649_v17 = vmul.f32 %v592_v3, %v6859_v7 }
  0xde   : > { %6369 = vset.pattern.permute.xlu1 %v6475_v37 }
  0xdf   : > { %785 = vperm.xlu1 %6369, %v6752_v34   ;;  %1157 = vperm.xlu0 %6396, %v6693_v26   ;;  %v4785_v52 = vpack.c.bf16 %v649_v17, %v648_v46  ;;  %v737_v46 = vmul.f32 %v6851_v4, %v6922_v1 }
  0xe0   : > { %v6856_v5 = vpop.permute.xlu0 %717 }
  0xe1   : > { %v690_v6 = vpop.permute.xlu1 %689 }
  0xe2   : > { %v731_v41 = vmul.f32 %v690_v6, %v6874_v14 }
  0xe3   : > { %6370 = vset.pattern.permute.xlu1 %v6474_v33  ;;  %1173 = vperm.xlu0 %6396, %v6738_v32  }
  0xe4   : > { %869 = vperm.xlu1 %6370, %v6764_v35   ;;  %v4787_v55 = vpack.c.bf16 %v731_v41, %v730_v20  ;;  %v6931_v41 = vld [vmem:[%s6644_s20 + $0x60] sm:$0xff] }
  0xe5   : > { %v577_v11 = vpop.permute.xlu0 %576 }
  0xe6   : > { %v646_v15 = vmul.f32 %v577_v11, %v6827_v50  ;;  %v602_v16 = vpop.permute.xlu1 %601 }
  0xe7   : > { %1189 = vperm.xlu0 %6396, %v6764_v35   ;;  %v651_v57 = vmul.f32 %v602_v16, %v6874_v14 }
  0xe8   : > { %v4781_v19 = vpack.c.bf16 %v647_v12, %v646_v15  ;;  %6371 = vset.pattern.permute.xlu1 %v6475_v37 }
  0xe9   : > { %789 = vperm.xlu1 %6371, %v6764_v35   ;;  %v597_v44 = vpop.permute.xlu0 %596 }
  0xea   : > { %4782 = vmatpush1.bf16.msra.mxu0 %v4781_v19  ;;  %v650_v53 = vmul.f32 %v597_v44, %v6871_v13  ;;  %v6480_v44 = vmov 0.0  }
  0xeb   : > { %v694_v48 = vpop.permute.xlu1 %693  ;;  %4784 = vmatprep.subr.bf16.mxu0 %v4783_v40  ;;  %6406 = vset.pattern.permute.xlu0 %v6479_v49 }
  0xec   : > { %1069 = vperm.xlu0 %6406, %v6666_v22   ;;  %v732_v56 = vmul.f32 %v694_v48, %v6888_v47  ;;  %v4789_v58 = vpack.c.bf16 %v651_v57, %v650_v53  ;;  %1284 = vmatprep.mubr.f32.mxu0 %v6480_v44  ;;  %v6948_v57 = vld [vmem:[%s6644_s20 + $0x70] sm:$0xff] }
  0xed   : > { %793 = vperm.xlu1 %6371, %v6714_v29   ;;  %v617_v60 = vpop.permute.xlu0 %616  ;;  %1355 = vmatprep.mubr.f32.mxu1 %v6480_v44 }
  0xee   : > { %4786 = vmatpush1.bf16.msra.mxu0 %v4785_v52  ;;  %v4791_v61 = vpack.c.bf16 %v733_v54, %v732_v56  ;;  %v654_v16 = vmul.f32 %v617_v60, %v6904_v0 }
  0xef   : > { %4788 = vmatprep.subr.bf16.mxu0 %v4787_v55 }
  0xf0   : > { %v607_v59 = vpop.permute.xlu1 %606  ;;  %1081 = vperm.xlu0 %6406, %v6679_v24  }
  0xf1   : > { %6373 = vset.pattern.permute.xlu1 %v6474_v33  ;;  %v6900_v63 = vpop.permute.xlu0 %636  ;;  %v652_v3 = vmul.f32 %v607_v59, %v6888_v47  ;;  %v6911_v33 = vld [vmem:[%s6644_s20 + $0x58] sm:$0xff] }
  0xf2   : > { %881 = vperm.xlu1 %6373, %v6777_v36   ;;  %4790 = vmatpush1.bf16.msra.mxu0 %v4789_v58 }
  0xf3   : > { %4792 = vmatprep.subr.bf16.mxu0 %v4791_v61  ;;  %v6955_v61 = vld [vmem:[%s6644_s20 + $0x78] sm:$0xff] }
  0xf4   : > { %v612_v62 = vpop.permute.xlu1 %611  ;;  %1085 = vperm.xlu0 %6406, %v6686_v25  }
  0xf5   : > { %v653_v6 = vmul.f32 %v612_v62, %v6884_v45  ;;  %v738_v62 = vmul.f32 %v6856_v5, %v6948_v57 }
  0xf6   : > { %6374 = vset.pattern.permute.xlu1 %v6475_v37  ;;  %v826_v15 = vpop.permute.xlu0 %825 }
  0xf7   : > { %v4793_v9 = vpack.c.bf16 %v653_v6, %v652_v3  ;;  %801 = vperm.xlu1 %6374, %v6777_v36  }
  0xf8   : > { %1097 = vperm.xlu0 %6406, %v6698_v27  }
  0xf9   : > { %v706_v11 = vpop.permute.xlu1 %705  ;;  %4794 = vmatpush1.bf16.msra.mxu0 %v4793_v9 }
  0xfa   : > { %v735_v12 = vmul.f32 %v706_v11, %v6911_v33  ;;  %v6926_v20 = vpop.permute.xlu0 %829  ;;  %v658_v11 = vmul.f32 %v6900_v63, %v6948_v57 }
  0xfb   : > { %6375 = vset.pattern.permute.xlu1 %v6477_v39 }
  0xfc   : > { %v4795_v37 = vpack.c.bf16 %v735_v12, %v734_v10  ;;  %981 = vperm.xlu1 %6375, %v6650_v18   ;;  %1101 = vperm.xlu0 %6406, %v6706_v28  }
  0xfe   : > { %v622_v17 = vpop.permute.xlu1 %621  ;;  %4796 = vmatprep.subr.bf16.mxu0 %v4795_v37  ;;  %v6940_v54 = vpop.permute.xlu0 %841 }
  0xff   : > { %v655_v19 = vmul.f32 %v622_v17, %v6911_v33  ;;  %v885_v17 = vmul.f32 %v826_v15, %v6818_v43 }
 0x100   : > { %6376 = vset.pattern.permute.xlu1 %v6476_v38  ;;  %1113 = vperm.xlu0 %6406, %v6714_v29  }
 0x101   : > { %v4797_v40 = vpack.c.bf16 %v655_v19, %v654_v16  ;;  %901 = vperm.xlu1 %6376, %v6650_v18  }
 0x102   : > { %v6945_v56 = vpop.permute.xlu0 %845 }
 0x103   : > { %v710_v48 = vpop.permute.xlu1 %709  ;;  %4798 = vmatpush1.bf16.msra.mxu0 %v4797_v40  ;;  %v6973_v40 = vld [vmem:[%s6629_s28] sm:$0xff] }
 0x104   : > { %v736_v52 = vmul.f32 %v710_v48, %v6931_v41  ;;  %1117 = vperm.xlu0 %6406, %v6721_v30  }
 0x105   : > { %905 = vperm.xlu1 %6376, %v6659_v21  }
 0x106   : > { %v4799_v53 = vpack.c.bf16 %v737_v46, %v736_v52  ;;  %v6960_v9 = vpop.permute.xlu0 %857 }
 0x108   : > { %v627_v55 = vpop.permute.xlu1 %626  ;;  %4800 = vmatprep.subr.bf16.mxu0 %v4799_v53  ;;  %6411 = vset.pattern.permute.xlu0 %v6478_v2 }
 0x109   : > { %6377 = vset.pattern.permute.xlu1 %v6477_v39  ;;  %v656_v58 = vmul.f32 %v627_v55, %v6931_v41 }
 0x10a   : > { %993 = vperm.xlu1 %6377, %v6671_v23   ;;  %v6968_v5 = vpop.permute.xlu0 %861 }
 0x10c   : > { %v632_v4 = vpop.permute.xlu1 %631 }
 0x10d   : > { %v657_v59 = vmul.f32 %v632_v4, %v6922_v1 }
 0x10e   : > { %6379 = vset.pattern.permute.xlu1 %v6476_v38  ;;  %v6977_v48 = vpop.permute.xlu0 %873 }
 0x10f   : > { %v4801_v60 = vpack.c.bf16 %v657_v59, %v656_v58  ;;  %913 = vperm.xlu1 %6379, %v6671_v23   ;;  %v886_v59 = vmul.f32 %v6926_v20, %v6827_v50  ;;  %v889_v20 = vmul.f32 %v6940_v54, %v6859_v7 }
 0x111   : > { %v722_v3 = vpop.permute.xlu1 %721  ;;  %4802 = vmatpush1.bf16.msra.mxu0 %v4801_v60 }
 0x112   : > { %v739_v6 = vmul.f32 %v722_v3, %v6955_v61  ;;  %v6983_v53 = vpop.permute.xlu0 %877 }
 0x113   : > { %6380 = vset.pattern.permute.xlu1 %v6477_v39 }
 0x114   : > { %v4803_v10 = vpack.c.bf16 %v739_v6, %v738_v62  ;;  %997 = vperm.xlu1 %6380, %v6693_v26  }
 0x116   : > { %v642_v12 = vpop.permute.xlu1 %641  ;;  %4804 = vmatprep.subr.bf16.mxu0 %v4803_v10 }
 0x117   : > { %v659_v37 = vmul.f32 %v642_v12, %v6955_v61  ;;  %v750_v3 = vpop.permute.xlu0 %749 }
 0x118   : > { %6381 = vset.pattern.permute.xlu1 %v6476_v38  ;;  %v806_v10 = vmul.f32 %v750_v3, %v6827_v50 }
 0x119   : > { %v4805_v16 = vpack.c.bf16 %v659_v37, %v658_v11  ;;  %917 = vperm.xlu1 %6381, %v6693_v26  }
 0x11b   : > { %v822_v19 = vpop.permute.xlu1 %821  ;;  %4806 = vmatpush1.bf16.msra.mxu0 %v4805_v16 }
 0x11c   : > { %v884_v46 = vmul.f32 %v822_v19, %v6814_v42 }
 0x11d   : > { %921 = vperm.xlu1 %6381, %v6679_v24  }
 0x11e   : > { %v4807_v63 = vpack.c.bf16 %v885_v17, %v884_v46  ;;  %1285 = vmatmul.mubr.f32.vlgmr.msra.gmra.mrb[0].mxu0 %v6973_v40 }
 0x11f   : > { %1426 = vmatprep.mubr.f32.mxu0 %v6480_v44 }
 0x120   : > { %v742_v52 = vpop.permute.xlu1 %741  ;;  %4808 = vmatprep.subr.bf16.mxu1 %v4807_v63 }
 0x121   : > { %6382 = vset.pattern.permute.xlu1 %v6477_v39  ;;  %v804_v55 = vmul.f32 %v742_v52, %v6814_v42 }
 0x122   : > { %1009 = vperm.xlu1 %6382, %v6726_v31  }
 0x124   : > { %v746_v15 = vpop.permute.xlu1 %745 }
 0x125   : > { %v805_v4 = vmul.f32 %v746_v15, %v6818_v43 }
 0x126   : > { %6383 = vset.pattern.permute.xlu1 %v6476_v38 }
 0x127   : > { %929 = vperm.xlu1 %6383, %v6726_v31   ;;  %v4809_v58 = vpack.c.bf16 %v805_v4, %v804_v55  ;;  %v890_v55 = vmul.f32 %v6945_v56, %v6871_v13  ;;  %v893_v56 = vmul.f32 %v6960_v9, %v6884_v45 }
 0x129   : > { %v834_v60 = vpop.permute.xlu1 %833  ;;  %4810 = vmatpush1.bf16.msra.mxu1 %v4809_v58 }
 0x12a   : > { %v887_v62 = vmul.f32 %v834_v60, %v6832_v51 }
 0x12b   : > { %6384 = vset.pattern.permute.xlu1 %v6477_v39 }
 0x12c   : > { %v4811_v6 = vpack.c.bf16 %v887_v62, %v886_v59  ;;  %1013 = vperm.xlu1 %6384, %v6738_v32   ;;  %v766_v59 = vpop.permute.xlu0 %765 }
 0x12d   : > { %v810_v62 = vmul.f32 %v766_v59, %v6871_v13 }
 0x12e   : > { %v754_v11 = vpop.permute.xlu1 %753  ;;  %4812 = vmatprep.subr.bf16.mxu1 %v4811_v6 }
 0x12f   : > { %v807_v12 = vmul.f32 %v754_v11, %v6832_v51 }
 0x130   : > { %6385 = vset.pattern.permute.xlu1 %v6476_v38 }
 0x131   : > { %v4813_v37 = vpack.c.bf16 %v807_v12, %v806_v10  ;;  %933 = vperm.xlu1 %6385, %v6738_v32  }
 0x133   : > { %v838_v16 = vpop.permute.xlu1 %837  ;;  %4814 = vmatpush1.bf16.msra.mxu1 %v4813_v37 }
 0x134   : > { %v888_v17 = vmul.f32 %v838_v16, %v6862_v8 }
 0x135   : > { %937 = vperm.xlu1 %6385, %v6698_v27  }
 0x136   : > { %v4815_v19 = vpack.c.bf16 %v889_v20, %v888_v17 }
 0x138   : > { %v758_v46 = vpop.permute.xlu1 %757  ;;  %4816 = vmatprep.subr.bf16.mxu1 %v4815_v19 }
 0x139   : > { %6386 = vset.pattern.permute.xlu1 %v6477_v39  ;;  %v808_v52 = vmul.f32 %v758_v46, %v6862_v8  ;;  %v782_v46 = vpop.permute.xlu0 %781 }
 0x13a   : > { %1025 = vperm.xlu1 %6386, %v6752_v34  }
 0x13c   : > { %v762_v63 = vpop.permute.xlu1 %761 }
 0x13d   : > { %v809_v15 = vmul.f32 %v762_v63, %v6859_v7  ;;  %v894_v63 = vmul.f32 %v6968_v5, %v6904_v0 }
 0x13e   : > { %6387 = vset.pattern.permute.xlu1 %v6476_v38 }
 0x13f   : > { %v4817_v54 = vpack.c.bf16 %v809_v15, %v808_v52  ;;  %945 = vperm.xlu1 %6387, %v6752_v34   ;;  %v798_v15 = vpop.permute.xlu0 %797 }
 0x141   : > { %v850_v4 = vpop.permute.xlu1 %849  ;;  %4818 = vmatpush1.bf16.msra.mxu1 %v4817_v54 }
 0x142   : > { %v891_v58 = vmul.f32 %v850_v4, %v6874_v14  ;;  %v814_v4 = vmul.f32 %v782_v46, %v6904_v0 }
 0x143   : > { %6388 = vset.pattern.permute.xlu1 %v6478_v2 }
 0x144   : > { %v4819_v60 = vpack.c.bf16 %v891_v58, %v890_v55  ;;  %1141 = vperm.xlu1 %6388, %v6650_v18  }
 0x146   : > { %v770_v3 = vpop.permute.xlu1 %769  ;;  %4820 = vmatprep.subr.bf16.mxu1 %v4819_v60  ;;  %v7034_v60 = vpop.permute.xlu0 %909 }
 0x147   : > { %v811_v6 = vmul.f32 %v770_v3, %v6874_v14 }
 0x148   : > { %6389 = vset.pattern.permute.xlu1 %v6479_v49 }
 0x149   : > { %v4821_v10 = vpack.c.bf16 %v811_v6, %v810_v62  ;;  %1061 = vperm.xlu1 %6389, %v6650_v18   ;;  %v897_v62 = vmul.f32 %v6977_v48, %v6922_v1 }
 0x14b   : > { %v854_v11 = vpop.permute.xlu1 %853  ;;  %4822 = vmatpush1.bf16.msra.mxu1 %v4821_v10  ;;  %v7042_v10 = vpop.permute.xlu0 %925 }
 0x14c   : > { %v892_v12 = vmul.f32 %v854_v11, %v6888_v47 }
 0x14d   : > { %1065 = vperm.xlu1 %6389, %v6659_v21  }
 0x14e   : > { %v4823_v37 = vpack.c.bf16 %v893_v56, %v892_v12 }
 0x14f   : > { %v7046_v12 = vpop.permute.xlu0 %941 }
 0x150   : > { %v774_v20 = vpop.permute.xlu1 %773  ;;  %4824 = vmatprep.subr.bf16.mxu1 %v4823_v37 }
 0x151   : > { %6390 = vset.pattern.permute.xlu1 %v6477_v39  ;;  %v812_v17 = vmul.f32 %v774_v20, %v6888_v47 }
 0x152   : > { %1033 = vperm.xlu1 %6390, %v6714_v29  }
 0x154   : > { %v778_v16 = vpop.permute.xlu1 %777 }
 0x155   : > { %v813_v19 = vmul.f32 %v778_v16, %v6884_v45 }
 0x156   : > { %6391 = vset.pattern.permute.xlu1 %v6476_v38 }
 0x157   : > { %v4825_v9 = vpack.c.bf16 %v813_v19, %v812_v17  ;;  %949 = vperm.xlu1 %6391, %v6764_v35   ;;  %v898_v17 = vmul.f32 %v6983_v53, %v6948_v57 }
 0x159   : > { %v866_v52 = vpop.permute.xlu1 %865  ;;  %4826 = vmatpush1.bf16.msra.mxu1 %v4825_v9 }
 0x15a   : > { %v895_v54 = vmul.f32 %v866_v52, %v6911_v33 }
 0x15b   : > { %6393 = vset.pattern.permute.xlu1 %v6478_v2 }
 0x15c   : > { %v4827_v55 = vpack.c.bf16 %v895_v54, %v894_v63  ;;  %1149 = vperm.xlu1 %6393, %v6666_v22   ;;  %v818_v63 = vmul.f32 %v798_v15, %v6948_v57 }
 0x15e   : > { %v786_v58 = vpop.permute.xlu1 %785  ;;  %4828 = vmatprep.subr.bf16.mxu1 %v4827_v55 }
 0x15f   : > { %v815_v59 = vmul.f32 %v786_v58, %v6911_v33 }
 0x160   : > { %1153 = vperm.xlu1 %6393, %v6671_v23  }
 0x161   : > { %v4829_v5 = vpack.c.bf16 %v815_v59, %v814_v4 }
 0x163   : > { %v870_v3 = vpop.permute.xlu1 %869  ;;  %4830 = vmatpush1.bf16.msra.mxu1 %v4829_v5 }
 0x164   : > { %v896_v6 = vmul.f32 %v870_v3, %v6931_v41  ;;  %6394 = vset.pattern.permute.xlu1 %v6479_v49 }
 0x165   : > { %1073 = vperm.xlu1 %6394, %v6671_v23  }
 0x166   : > { %v4831_v56 = vpack.c.bf16 %v897_v62, %v896_v6 }
 0x168   : > { %v790_v11 = vpop.permute.xlu1 %789  ;;  %4832 = vmatprep.subr.bf16.mxu1 %v4831_v56 }
 0x169   : > { %6395 = vset.pattern.permute.xlu1 %v6477_v39  ;;  %v816_v37 = vmul.f32 %v790_v11, %v6931_v41  ;;  %v7054_v39 = vpop.permute.xlu0 %953 }
 0x16a   : > { %1037 = vperm.xlu1 %6395, %v6721_v30  }
 0x16c   : > { %v794_v48 = vpop.permute.xlu1 %793 }
 0x16d   : > { %v817_v20 = vmul.f32 %v794_v48, %v6922_v1  ;;  %v986_v54 = vpop.permute.xlu0 %985 }
 0x16e   : > { %6397 = vset.pattern.permute.xlu1 %v6476_v38  ;;  %v1045_v55 = vmul.f32 %v986_v54, %v6818_v43 }
 0x16f   : > { %v4833_v16 = vpack.c.bf16 %v817_v20, %v816_v37  ;;  %957 = vperm.xlu1 %6397, %v6721_v30   ;;  %v966_v20 = vmul.f32 %v7034_v60, %v6827_v50 }
 0x171   : > { %v882_v19 = vpop.permute.xlu1 %881  ;;  %4834 = vmatpush1.bf16.msra.mxu1 %v4833_v16  ;;  %v990_v6 = vpop.permute.xlu0 %989 }
 0x172   : > { %v899_v46 = vmul.f32 %v882_v19, %v6955_v61  ;;  %v1046_v11 = vmul.f32 %v990_v6, %v6827_v50 }
 0x173   : > { %961 = vperm.xlu1 %6397, %v6777_v36  }
 0x174   : > { %v4835_v9 = vpack.c.bf16 %v899_v46, %v898_v17 }
 0x175   : > { %v1002_v19 = vpop.permute.xlu0 %1001 }
 0x176   : > { %v802_v52 = vpop.permute.xlu1 %801  ;;  %4836 = vmatprep.subr.bf16.mxu1 %v4835_v9  ;;  %v1049_v9 = vmul.f32 %v1002_v19, %v6859_v7 }
 0x177   : > { %v819_v38 = vmul.f32 %v802_v52, %v6955_v61  ;;  %6398 = vset.pattern.permute.xlu1 %v6478_v2 }
 0x178   : > { %1161 = vperm.xlu1 %6398, %v6679_v24  }
 0x179   : > { %v4837_v53 = vpack.c.bf16 %v819_v38, %v818_v63 }
 0x17b   : > { %v982_v4 = vpop.permute.xlu1 %981  ;;  %4838 = vmatpush1.bf16.msra.mxu1 %v4837_v53 }
 0x17c   : > { %v1044_v58 = vmul.f32 %v982_v4, %v6814_v42  ;;  %6399 = vset.pattern.permute.xlu1 %v6479_v49  ;;  %v1006_v4 = vpop.permute.xlu0 %1005 }
 0x17d   : > { %1077 = vperm.xlu1 %6399, %v6693_v26  }
 0x17e   : > { %v4839_v15 = vpack.c.bf16 %v1045_v55, %v1044_v58  ;;  %1356 = vmatmul.mubr.f32.vlgmr.msra.gmra.mrb[0].mxu1 %v6973_v40 }
 0x17f   : > { %1497 = vmatprep.mubr.f32.mxu1 %v6480_v44 }
 0x180   : > { %v902_v59 = vpop.permute.xlu1 %901  ;;  %4840 = vmatprep.subr.bf16.mxu0 %v4839_v15  ;;  %v1050_v15 = vmul.f32 %v1006_v4, %v6871_v13 }
 0x181   : > { %6400 = vset.pattern.permute.xlu1 %v6478_v2  ;;  %v964_v62 = vmul.f32 %v902_v59, %v6814_v42 }
 0x182   : > { %1165 = vperm.xlu1 %6400, %v6686_v25  }
 0x184   : > { %v906_v5 = vpop.permute.xlu1 %905 }
 0x185   : > { %v965_v3 = vmul.f32 %v906_v5, %v6818_v43 }
 0x186   : > { %1169 = vperm.xlu1 %6400, %v6726_v31  }
 0x187   : > { %v4841_v56 = vpack.c.bf16 %v965_v3, %v964_v62  ;;  %v970_v3 = vmul.f32 %v7042_v10, %v6871_v13 }
 0x189   : > { %v994_v48 = vpop.permute.xlu1 %993  ;;  %4842 = vmatpush1.bf16.msra.mxu0 %v4841_v56 }
 0x18a   : > { %v1047_v44 = vmul.f32 %v994_v48, %v6832_v51  ;;  %6401 = vset.pattern.permute.xlu1 %v6479_v49 }
 0x18b   : > { %1089 = vperm.xlu1 %6401, %v6726_v31  }
 0x18c   : > { %v4843_v37 = vpack.c.bf16 %v1047_v44, %v1046_v11  ;;  %v1018_v11 = vpop.permute.xlu0 %1017 }
 0x18d   : > { %v1053_v44 = vmul.f32 %v1018_v11, %v6884_v45 }
 0x18e   : > { %v914_v16 = vpop.permute.xlu1 %913  ;;  %4844 = vmatprep.subr.bf16.mxu0 %v4843_v37 }
 0x18f   : > { %v967_v17 = vmul.f32 %v914_v16, %v6832_v51  ;;  %6402 = vset.pattern.permute.xlu1 %v6478_v2 }
 0x190   : > { %1177 = vperm.xlu1 %6402, %v6698_v27   ;;  %v1022_v10 = vpop.permute.xlu0 %1021 }
 0x191   : > { %v4845_v46 = vpack.c.bf16 %v967_v17, %v966_v20 }
 0x193   : > { %v998_v63 = vpop.permute.xlu1 %997  ;;  %4846 = vmatpush1.bf16.msra.mxu0 %v4845_v46 }
 0x194   : > { %v1048_v52 = vmul.f32 %v998_v63, %v6862_v8  ;;  %6403 = vset.pattern.permute.xlu1 %v6479_v49  ;;  %v1030_v19 = vpop.permute.xlu0 %1029 }
 0x195   : > { %1093 = vperm.xlu1 %6403, %v6738_v32  }
 0x196   : > { %v4847_v60 = vpack.c.bf16 %v1049_v9, %v1048_v52 }
 0x198   : > { %v918_v38 = vpop.permute.xlu1 %917  ;;  %4848 = vmatprep.subr.bf16.mxu0 %v4847_v60  ;;  %v1054_v60 = vmul.f32 %v1022_v10, %v6904_v0 }
 0x199   : > { %6404 = vset.pattern.permute.xlu1 %v6478_v2  ;;  %v968_v53 = vmul.f32 %v918_v38, %v6862_v8 }
 0x19a   : > { %1181 = vperm.xlu1 %6404, %v6706_v28  }
 0x19c   : > { %v922_v54 = vpop.permute.xlu1 %921 }
 0x19d   : > { %v969_v55 = vmul.f32 %v922_v54, %v6859_v7  ;;  %v1042_v54 = vpop.permute.xlu0 %1041 }
 0x19e   : > { %1185 = vperm.xlu1 %6404, %v6752_v34  }
 0x19f   : > { %v4849_v58 = vpack.c.bf16 %v969_v55, %v968_v53  ;;  %v974_v55 = vmul.f32 %v7046_v12, %v6904_v0 }
 0x1a1   : > { %v1010_v59 = vpop.permute.xlu1 %1009  ;;  %4850 = vmatpush1.bf16.msra.mxu0 %v4849_v58 }
 0x1a2   : > { %v1051_v5 = vmul.f32 %v1010_v59, %v6874_v14  ;;  %6405 = vset.pattern.permute.xlu1 %v6479_v49 }
 0x1a3   : > { %1105 = vperm.xlu1 %6405, %v6752_v34  }
 0x1a4   : > { %v4851_v62 = vpack.c.bf16 %v1051_v5, %v1050_v15  ;;  %v1146_v15 = vpop.permute.xlu0 %1145 }
 0x1a5   : > { %v1205_v5 = vmul.f32 %v1146_v15, %v6818_v43  ;;  %v1059_v15 = vmul.f32 %v1042_v54, %v6955_v61 }
 0x1a6   : > { %v930_v6 = vpop.permute.xlu1 %929  ;;  %4852 = vmatprep.subr.bf16.mxu0 %v4851_v62 }
 0x1a7   : > { %v971_v56 = vmul.f32 %v930_v6, %v6874_v14  ;;  %6407 = vset.pattern.permute.xlu1 %v6478_v2 }
 0x1a8   : > { %1193 = vperm.xlu1 %6407, %v6714_v29  }
 0x1a9   : > { %v4853_v48 = vpack.c.bf16 %v971_v56, %v970_v3 }
 0x1ab   : > { %v1014_v37 = vpop.permute.xlu1 %1013  ;;  %4854 = vmatpush1.bf16.msra.mxu0 %v4853_v48  ;;  %v1158_v48 = vpop.permute.xlu0 %1157 }
 0x1ac   : > { %v1052_v20 = vmul.f32 %v1014_v37, %v6888_v47  ;;  %6408 = vset.pattern.permute.xlu1 %v6479_v49  ;;  %v1056_v37 = vmul.f32 %v1030_v19, %v6931_v41 }
 0x1ad   : > { %1109 = vperm.xlu1 %6408, %v6764_v35  }
 0x1ae   : > { %v4855_v16 = vpack.c.bf16 %v1053_v44, %v1052_v20 }
 0x1b0   : > { %v934_v17 = vpop.permute.xlu1 %933  ;;  %4856 = vmatprep.subr.bf16.mxu0 %v4855_v16 }
 0x1b1   : > { %6409 = vset.pattern.permute.xlu1 %v6478_v2  ;;  %v972_v9 = vmul.f32 %v934_v17, %v6888_v47  ;;  %v7122_v17 = vpop.permute.xlu0 %1173 }
 0x1b2   : > { %1197 = vperm.xlu1 %6409, %v6721_v30  }
 0x1b4   : > { %v938_v46 = vpop.permute.xlu1 %937 }
 0x1b5   : > { %v973_v63 = vmul.f32 %v938_v46, %v6884_v45  ;;  %v977_v46 = vmul.f32 %v7054_v39, %v6922_v1 }
 0x1b6   : > { %1201 = vperm.xlu1 %6409, %v6777_v36  }
 0x1b7   : > { %v4857_v52 = vpack.c.bf16 %v973_v63, %v972_v9 }
 0x1b9   : > { %v1026_v38 = vpop.permute.xlu1 %1025  ;;  %4858 = vmatpush1.bf16.msra.mxu0 %v4857_v52 }
 0x1ba   : > { %v1055_v53 = vmul.f32 %v1026_v38, %v6911_v33  ;;  %6410 = vset.pattern.permute.xlu1 %v6479_v49 }
 0x1bb   : > { %1121 = vperm.xlu1 %6410, %v6777_v36  }
 0x1bc   : > { %v4859_v2 = vpack.c.bf16 %v1055_v53, %v1054_v60 }
 0x1be   : > { %v946_v4 = vpop.permute.xlu1 %945  ;;  %4860 = vmatprep.subr.bf16.mxu0 %v4859_v2 }
 0x1bf   : > { %v975_v58 = vmul.f32 %v946_v4, %v6911_v33 }
 0x1c1   : > { %v4861_v59 = vpack.c.bf16 %v975_v58, %v974_v55 }
 0x1c3   : > { %v1142_v62 = vpop.permute.xlu1 %1141  ;;  %4862 = vmatpush1.bf16.msra.mxu0 %v4861_v59 }
 0x1c4   : > { %v1204_v3 = vmul.f32 %v1142_v62, %v6814_v42 }
 0x1c6   : > { %v4871_v6 = vpack.c.bf16 %v1205_v5, %v1204_v3 }
 0x1c8   : > { %v1062_v49 = vpop.permute.xlu1 %1061  ;;  %4872 = vmatprep.subr.bf16.mxu1 %v4871_v6  ;;  %v1513_v6 = vld [vmem:[%s6634_s15 + $0x8] sm:$0xff] }
 0x1c9   : > { %v1124_v11 = vmul.f32 %v1062_v49, %v6814_v42 }
 0x1cc   : > { %v1066_v56 = vpop.permute.xlu1 %1065 }
 0x1cd   : > { %v1125_v12 = vmul.f32 %v1066_v56, %v6818_v43  ;;  %v7127_v43 = vpop.permute.xlu0 %1189 }
 0x1cf   : > { %v4873_v44 = vpack.c.bf16 %v1125_v12, %v1124_v11 }
 0x1d1   : > { %v1034_v20 = vpop.permute.xlu1 %1033  ;;  %4874 = vmatpush1.bf16.msra.mxu1 %v4873_v44  ;;  %v1070_v53 = vpop.permute.xlu0 %1069  ;;  %v1512_v44 = vld [vmem:[%s6634_s15] sm:$0xff] }
 0x1d2   : > { %v1057_v10 = vmul.f32 %v1034_v20, %v6922_v1  ;;  %v1126_v39 = vmul.f32 %v1070_v53, %v6827_v50  ;;  %v1545_v53 = vld [vmem:[%s6634_s15 + $0x108] sm:$0xff] }
 0x1d4   : > { %v4863_v16 = vpack.c.bf16 %v1057_v10, %v1056_v37  ;;  %v1520_v37 = vld [vmem:[%s6634_s15 + $0x40] sm:$0xff]  ;;  %v1529_v10 = vld [vmem:[%s6634_s15 + $0x88] sm:$0xff] }
 0x1d6   : > { %v950_v9 = vpop.permute.xlu1 %949  ;;  %4864 = vmatprep.subr.bf16.mxu0 %v4863_v16  ;;  %v1537_v16 = vld [vmem:[%s6634_s15 + $0xc8] sm:$0xff] }
 0x1d7   : > { %v976_v42 = vmul.f32 %v950_v9, %v6931_v41 }
 0x1d9   : > { %v4865_v63 = vpack.c.bf16 %v977_v46, %v976_v42  ;;  %v1208_v46 = vmul.f32 %v1158_v48, %v6862_v8  ;;  %v4905_v42 = vpack.c.bf16 %v1520_v37, %v1512_v44  ;;  %v1585_v44 = vld [vmem:[%s6634_s15 + $0x248] sm:$0xff] }
 0x1db   : > { %v1150_v52 = vpop.permute.xlu1 %1149  ;;  %4866 = vmatpush1.bf16.msra.mxu0 %v4865_v63 }
 0x1dc   : > { %v1206_v60 = vmul.f32 %v1150_v52, %v6827_v50  ;;  %v1521_v50 = vld [vmem:[%s6634_s15 + $0x48] sm:$0xff]  ;;  %v1082_v52 = vpop.permute.xlu0 %1081 }
 0x1dd   : > { %v4903_v12 = vpack.c.bf16 %v1521_v50, %v1513_v6  ;;  %v1129_v48 = vmul.f32 %v1082_v52, %v6859_v7 }
 0x1df   : > { %v1154_v19 = vpop.permute.xlu1 %1153 }
 0x1e0   : > { %v1207_v38 = vmul.f32 %v1154_v19, %v6832_v51  ;;  %v4907_v19 = vpack.c.bf16 %v1537_v16, %v1529_v10  ;;  %v1584_v10 = vld [vmem:[%s6634_s15 + $0x240] sm:$0xff]  ;;  %v1086_v52 = vpop.permute.xlu0 %1085 }
 0x1e2   : > { %v4875_v2 = vpack.c.bf16 %v1207_v38, %v1206_v60  ;;  %v1528_v60 = vld [vmem:[%s6634_s15 + $0x80] sm:$0xff] }
 0x1e3   : > { %v1536_v38 = vld [vmem:[%s6634_s15 + $0xc0] sm:$0xff] }
 0x1e4   : > { %v1074_v55 = vpop.permute.xlu1 %1073  ;;  %4876 = vmatprep.subr.bf16.mxu1 %v4875_v2  ;;  %v1553_v2 = vld [vmem:[%s6634_s15 + $0x148] sm:$0xff] }
 0x1e5   : > { %v1127_v4 = vmul.f32 %v1074_v55, %v6832_v51  ;;  %v4909_v55 = vpack.c.bf16 %v1536_v38, %v1528_v60 }
 0x1e7   : > { %v4877_v58 = vpack.c.bf16 %v1127_v4, %v1126_v39 }
 0x1e9   : > { %v1038_v59 = vpop.permute.xlu1 %1037  ;;  %4878 = vmatpush1.bf16.msra.mxu1 %v4877_v58  ;;  %v4911_v58 = vpack.c.bf16 %v1553_v2, %v1545_v53  ;;  %v1592_v53 = vld [vmem:[%s6634_s15 + $0x280] sm:$0xff] }
 0x1ea   : > { %v1058_v5 = vmul.f32 %v1038_v59, %v6948_v57  ;;  %v1552_v59 = vld [vmem:[%s6634_s15 + $0x140] sm:$0xff] }
 0x1eb   : > { %v1600_v2 = vld [vmem:[%s6634_s15 + $0x2c0] sm:$0xff] }
 0x1ec   : > { %v4867_v62 = vpack.c.bf16 %v1059_v15, %v1058_v5  ;;  %v1544_v15 = vld [vmem:[%s6634_s15 + $0x100] sm:$0xff] }
 0x1ed   : > { %v4913_v6 = vpack.c.bf16 %v1552_v59, %v1544_v15  ;;  %v4925_v15 = vpack.c.bf16 %v1600_v2, %v1592_v53  ;;  %v1656_v53 = vld [vmem:[%s6634_s15 + $0x480] sm:$0xff] }
 0x1ee   : > { %v958_v3 = vpop.permute.xlu1 %957  ;;  %4868 = vmatprep.subr.bf16.mxu0 %v4867_v62  ;;  %v1561_v62 = vld [vmem:[%s6634_s15 + $0x188] sm:$0xff]  ;;  %v1664_v2 = vld [vmem:[%s6634_s15 + $0x4c0] sm:$0xff] }
 0x1ef   : > { %v978_v11 = vmul.f32 %v958_v3, %v6948_v57  ;;  %v1569_v3 = vld [vmem:[%s6634_s15 + $0x1c8] sm:$0xff] }
 0x1f0   : > { %v4915_v50 = vpack.c.bf16 %v1569_v3, %v1561_v62  ;;  %v1616_v62 = vld [vmem:[%s6634_s15 + $0x340] sm:$0xff] }
 0x1f1   : > { %v7137_v49 = vpop.f32.mrb[0].mxu0 }
 0x1f2   : > { %v962_v56 = vpop.permute.xlu1 %961  ;;  %v7139_v51 = vpop.f32.mrb[1].mxu0 }
 0x1f3   : > { %v979_v54 = vmul.f32 %v962_v56, %v6955_v61  ;;  %v1560_v56 = vld [vmem:[%s6634_s15 + $0x180] sm:$0xff] }
 0x1f5   : > { %v4869_v20 = vpack.c.bf16 %v979_v54, %v978_v11  ;;  %v1568_v11 = vld [vmem:[%s6634_s15 + $0x1c0] sm:$0xff] }
 0x1f6   : > { %v4917_v37 = vpack.c.bf16 %v1568_v11, %v1560_v56  ;;  %v1098_v11 = vpop.permute.xlu0 %1097 }
 0x1f7   : > { %v1162_v9 = vpop.permute.xlu1 %1161  ;;  %4870 = vmatpush1.bf16.msra.mxu0 %v4869_v20  ;;  %v1576_v20 = vld [vmem:[%s6634_s15 + $0x200] sm:$0xff] }
 0x1f8   : > { %v1209_v63 = vmul.f32 %v1162_v9, %v6859_v7  ;;  %4904 = vmatprep.subr.bf16.mxu0 %v4903_v12  ;;  %v1577_v12 = vld [vmem:[%s6634_s15 + $0x208] sm:$0xff] }
 0x1f9   : > { %v1601_v9 = vld [vmem:[%s6634_s15 + $0x2c8] sm:$0xff] }
 0x1fa   : > { %v4879_v39 = vpack.c.bf16 %v1209_v63, %v1208_v46  ;;  %1427 = vmatmul.mubr.f32.vlgmr.msra.gmra.mrb[2].mxu0 %v6973_v40  ;;  %v1593_v46 = vld [vmem:[%s6634_s15 + $0x288] sm:$0xff] }
 0x1fb   : > { %4906 = vmatpush1.bf16.msra.mxu0 %v4905_v42  ;;  %2600 = vmatprep.mubr.f32.mxu0 %v7139_v51  ;;  %v4923_v38 = vpack.c.bf16 %v1601_v9, %v1593_v46  ;;  %v1640_v9 = vld [vmem:[%s6634_s15 + $0x400] sm:$0xff] }
 0x1fc   : > { %v1078_v4 = vpop.permute.xlu1 %1077  ;;  %4880 = vmatprep.subr.bf16.mxu1 %v4879_v39  ;;  %4908 = vmatprep.subr.bf16.mxu0 %v4907_v19  ;;  %v4921_v19 = vpack.c.bf16 %v1584_v10, %v1576_v20  ;;  %v1130_v39 = vmul.f32 %v1086_v52, %v6871_v13  ;;  %v1657_v52 = vld [vmem:[%s6634_s15 + $0x488] sm:$0xff] }
 0x1fd   : > { %v1128_v5 = vmul.f32 %v1078_v4, %v6862_v8  ;;  %v4919_v8 = vpack.c.bf16 %v1585_v44, %v1577_v12  ;;  %v1624_v12 = vld [vmem:[%s6634_s15 + $0x380] sm:$0xff] }
 0x1fe   : > { %v1632_v44 = vld [vmem:[%s6634_s15 + $0x3c0] sm:$0xff] }
 0x1ff   : > { %v4881_v7 = vpack.c.bf16 %v1129_v48, %v1128_v5  ;;  %4910 = vmatpush1.bf16.msra.mxu0 %v4909_v55  ;;  %v1609_v48 = vld [vmem:[%s6634_s15 + $0x308] sm:$0xff]  ;;  %v1608_v5 = vld [vmem:[%s6634_s15 + $0x300] sm:$0xff]  ;;  %v4933_v10 = vpack.c.bf16 %v1632_v44, %v1624_v12 }
 0x200   : > { %4912 = vmatprep.subr.bf16.mxu0 %v4911_v58  ;;  %v1617_v55 = vld [vmem:[%s6634_s15 + $0x348] sm:$0xff] }
 0x201   : > { %v1166_v54 = vpop.permute.xlu1 %1165  ;;  %4882 = vmatpush1.bf16.msra.mxu1 %v4881_v7  ;;  %v4927_v59 = vpack.c.bf16 %v1617_v55, %v1609_v48  ;;  %v1625_v7 = vld [vmem:[%s6634_s15 + $0x388] sm:$0xff] }
 0x202   : > { %v1210_v42 = vmul.f32 %v1166_v54, %v6871_v13  ;;  %v1212_v13 = vmul.f32 %v7122_v17, %v6888_v47  ;;  %v1133_v17 = vmul.f32 %v1098_v11, %v6884_v45  ;;  %v1673_v48 = vld [vmem:[%s6634_s15 + $0x508] sm:$0xff]  ;;  %v1696_v11 = vld [vmem:[%s6634_s15 + $0x5c0] sm:$0xff] }
 0x203   : > { %4914 = vmatpush1.bf16.msra.mxu0 %v4913_v6  ;;  %v1633_v6 = vld [vmem:[%s6634_s15 + $0x3c8] sm:$0xff] }
 0x204   : > { %4916 = vmatprep.subr.bf16.mxu0 %v4915_v50  ;;  %v4931_v54 = vpack.c.bf16 %v1633_v6, %v1625_v7  ;;  %v1681_v55 = vld [vmem:[%s6634_s15 + $0x548] sm:$0xff] }
 0x205   : > { %v1170_v16 = vpop.permute.xlu1 %1169  ;;  %v1705_v12 = vld [vmem:[%s6634_s15 + $0x608] sm:$0xff] }
 0x206   : > { %v1211_v63 = vmul.f32 %v1170_v16, %v6874_v14  ;;  %v1713_v44 = vld [vmem:[%s6634_s15 + $0x648] sm:$0xff] }
 0x207   : > { %4918 = vmatpush1.bf16.msra.mxu0 %v4917_v37  ;;  %v1641_v37 = vld [vmem:[%s6634_s15 + $0x408] sm:$0xff] }
 0x208   : > { %v4883_v60 = vpack.c.bf16 %v1211_v63, %v1210_v42  ;;  %4920 = vmatprep.subr.bf16.mxu0 %v4919_v8  ;;  %v1649_v8 = vld [vmem:[%s6634_s15 + $0x448] sm:$0xff]  ;;  %v1648_v42 = vld [vmem:[%s6634_s15 + $0x440] sm:$0xff] }
 0x209   : > { %v4935_v46 = vpack.c.bf16 %v1649_v8, %v1641_v37 }
 0x20a   : > { %v1090_v4 = vpop.permute.xlu1 %1089  ;;  %4884 = vmatprep.subr.bf16.mxu1 %v4883_v60 }
 0x20b   : > { %v1131_v58 = vmul.f32 %v1090_v4, %v6874_v14  ;;  %4922 = vmatpush1.bf16.msra.mxu0 %v4921_v19  ;;  %v4929_v14 = vpack.c.bf16 %v1616_v62, %v1608_v5  ;;  %v1665_v19 = vld [vmem:[%s6634_s15 + $0x4c8] sm:$0xff]  ;;  %v4941_v4 = vpack.c.bf16 %v1664_v2, %v1656_v53 }
 0x20c   : > { %4924 = vmatprep.subr.bf16.mxu0 %v4923_v38  ;;  %v4939_v38 = vpack.c.bf16 %v1665_v19, %v1657_v52  ;;  %v1689_v5 = vld [vmem:[%s6634_s15 + $0x588] sm:$0xff] }
 0x20d   : > { %v4885_v3 = vpack.c.bf16 %v1131_v58, %v1130_v39  ;;  %v1672_v58 = vld [vmem:[%s6634_s15 + $0x500] sm:$0xff]  ;;  %v1697_v62 = vld [vmem:[%s6634_s15 + $0x5c8] sm:$0xff] }
 0x20e   : > { %v1745_v53 = vld [vmem:[%s6634_s15 + $0x748] sm:$0xff] }
 0x20f   : > { %v1178_v50 = vpop.permute.xlu1 %1177  ;;  %4886 = vmatpush1.bf16.msra.mxu1 %v4885_v3  ;;  %4926 = vmatpush1.bf16.msra.mxu0 %v4925_v15  ;;  %v1680_v15 = vld [vmem:[%s6634_s15 + $0x540] sm:$0xff] }
 0x210   : > { %v1213_v56 = vmul.f32 %v1178_v50, %v6884_v45  ;;  %4928 = vmatprep.subr.bf16.mxu0 %v4927_v59  ;;  %v4937_v45 = vpack.c.bf16 %v1648_v42, %v1640_v9  ;;  %v4945_v6 = vpack.c.bf16 %v1680_v15, %v1672_v58  ;;  %v1721_v9 = vld [vmem:[%s6634_s15 + $0x688] sm:$0xff] }
 0x211   : > { %v1729_v42 = vld [vmem:[%s6634_s15 + $0x6c8] sm:$0xff] }
 0x212   : > { %v4887_v20 = vpack.c.bf16 %v1213_v56, %v1212_v13  ;;  %v1102_v13 = vpop.permute.xlu0 %1101  ;;  %v1688_v56 = vld [vmem:[%s6634_s15 + $0x580] sm:$0xff]  ;;  %v4955_v19 = vpack.c.bf16 %v1729_v42, %v1721_v9 }
 0x213   : > { %4930 = vmatpush1.bf16.msra.mxu0 %v4929_v14  ;;  %v4947_v14 = vpack.c.bf16 %v1697_v62, %v1689_v5  ;;  %v1761_v5 = vld [vmem:[%s6634_s15 + $0x7c8] sm:$0xff]  ;;  %v1784_v42 = vld [vmem:[%s6634_s15 + $0x880] sm:$0xff] }
 0x214   : > { %v1094_v16 = vpop.permute.xlu1 %1093  ;;  %4888 = vmatprep.subr.bf16.mxu1 %v4887_v20  ;;  %4932 = vmatprep.subr.bf16.mxu0 %v4931_v54  ;;  %v1134_v54 = vmul.f32 %v1102_v13, %v6904_v0  ;;  %v4949_v20 = vpack.c.bf16 %v1696_v11, %v1688_v56  ;;  %v1760_v13 = vld [vmem:[%s6634_s15 + $0x7c0] sm:$0xff]  ;;  %v1777_v56 = vld [vmem:[%s6634_s15 + $0x848] sm:$0xff] }
 0x215   : > { %v1132_v63 = vmul.f32 %v1094_v16, %v6888_v47  ;;  %v4943_v47 = vpack.c.bf16 %v1681_v55, %v1673_v48  ;;  %v1712_v16 = vld [vmem:[%s6634_s15 + $0x640] sm:$0xff] }
 0x216   : > { %v1114_v48 = vpop.permute.xlu0 %1113  ;;  %v1768_v11 = vld [vmem:[%s6634_s15 + $0x800] sm:$0xff] }
 0x217   : > { %v4889_v60 = vpack.c.bf16 %v1133_v17, %v1132_v63  ;;  %4934 = vmatpush1.bf16.msra.mxu0 %v4933_v10  ;;  %v4951_v17 = vpack.c.bf16 %v1713_v44, %v1705_v12  ;;  %v1704_v10 = vld [vmem:[%s6634_s15 + $0x600] sm:$0xff]  ;;  %v1137_v58 = vmul.f32 %v1114_v48, %v6922_v1  ;;  %v1785_v44 = vld [vmem:[%s6634_s15 + $0x888] sm:$0xff]  ;;  %v1531_v48 = vld [vmem:[%s6634_s15 + $0x98] sm:$0xff] }
 0x218   : > { %4936 = vmatprep.subr.bf16.mxu0 %v4935_v46  ;;  %v4953_v63 = vpack.c.bf16 %v1712_v16, %v1704_v10 }
 0x219   : > { %v1182_v39 = vpop.permute.xlu1 %1181  ;;  %4890 = vmatpush1.bf16.msra.mxu1 %v4889_v60  ;;  %v1720_v60 = vld [vmem:[%s6634_s15 + $0x680] sm:$0xff] }
 0x21a   : > { %v1214_v3 = vmul.f32 %v1182_v39, %v6904_v0  ;;  %v1118_v10 = vpop.permute.xlu0 %1117 }
 0x21b   : > { %4938 = vmatpush1.bf16.msra.mxu0 %v4937_v45  ;;  %v1728_v45 = vld [vmem:[%s6634_s15 + $0x6c0] sm:$0xff] }
 0x21c   : > { %4940 = vmatprep.subr.bf16.mxu0 %v4939_v38  ;;  %v1737_v38 = vld [vmem:[%s6634_s15 + $0x708] sm:$0xff]  ;;  %v4957_v39 = vpack.c.bf16 %v1728_v45, %v1720_v60 }
 0x21d   : > { %v1186_v59 = vpop.permute.xlu1 %1185 }
 0x21e   : > { %v1215_v7 = vmul.f32 %v1186_v59, %v6911_v33  ;;  %v1753_v59 = vld [vmem:[%s6634_s15 + $0x788] sm:$0xff] }
 0x21f   : > { %4942 = vmatpush1.bf16.msra.mxu0 %v4941_v4  ;;  %v1736_v4 = vld [vmem:[%s6634_s15 + $0x700] sm:$0xff] }
 0x220   : > { %v4891_v50 = vpack.c.bf16 %v1215_v7, %v1214_v3  ;;  %4944 = vmatprep.subr.bf16.mxu0 %v4943_v47  ;;  %v1744_v47 = vld [vmem:[%s6634_s15 + $0x740] sm:$0xff]  ;;  %v4963_v7 = vpack.c.bf16 %v1761_v5, %v1753_v59  ;;  %v1530_v5 = vld [vmem:[%s6634_s15 + $0x90] sm:$0xff] }
 0x221   : > { %v4961_v3 = vpack.c.bf16 %v1744_v47, %v1736_v4  ;;  %v1808_v4 = vld [vmem:[%s6634_s15 + $0x940] sm:$0xff] }
 0x222   : > { %v1106_v37 = vpop.permute.xlu1 %1105  ;;  %4892 = vmatprep.subr.bf16.mxu1 %v4891_v50 }
 0x223   : > { %v1135_v8 = vmul.f32 %v1106_v37, %v6911_v33  ;;  %4946 = vmatpush1.bf16.msra.mxu0 %v4945_v6  ;;  %v1216_v33 = vmul.f32 %v7127_v43, %v6931_v41  ;;  %v4959_v43 = vpack.c.bf16 %v1745_v53, %v1737_v38  ;;  %v1752_v6 = vld [vmem:[%s6634_s15 + $0x780] sm:$0xff]  ;;  %v1793_v37 = vld [vmem:[%s6634_s15 + $0x8c8] sm:$0xff]  ;;  %v1514_v38 = vld [vmem:[%s6634_s15 + $0x10] sm:$0xff] }
 0x224   : > { %4948 = vmatprep.subr.bf16.mxu0 %v4947_v14  ;;  %v1769_v14 = vld [vmem:[%s6634_s15 + $0x808] sm:$0xff]  ;;  %v4971_v9 = vpack.c.bf16 %v1793_v37, %v1785_v44  ;;  %v1522_v53 = vld [vmem:[%s6634_s15 + $0x50] sm:$0xff] }
 0x225   : > { %v4893_v46 = vpack.c.bf16 %v1135_v8, %v1134_v54  ;;  %v1776_v54 = vld [vmem:[%s6634_s15 + $0x840] sm:$0xff]  ;;  %v5161_v59 = vpack.c.bf16 %v1522_v53, %v1514_v38  ;;  %v1554_v44 = vld [vmem:[%s6634_s15 + $0x150] sm:$0xff]  ;;  %v1587_v53 = vld [vmem:[%s6634_s15 + $0x258] sm:$0xff] }
 0x226   : > { %v1856_v38 = vld [vmem:[%s6634_s15 + $0xac0] sm:$0xff] }
 0x227   : > { %v1194_v0 = vpop.permute.xlu1 %1193  ;;  %4894 = vmatpush1.bf16.msra.mxu1 %v4893_v46  ;;  %4950 = vmatpush1.bf16.msra.mxu0 %v4949_v20  ;;  %v1515_v46 = vld [vmem:[%s6634_s15 + $0x18] sm:$0xff] }
 0x228   : > { %v1217_v52 = vmul.f32 %v1194_v0, %v6922_v1  ;;  %4952 = vmatprep.subr.bf16.mxu0 %v4951_v17  ;;  %v4965_v1 = vpack.c.bf16 %v1760_v13, %v1752_v6  ;;  %v4969_v17 = vpack.c.bf16 %v1776_v54, %v1768_v11  ;;  %v1792_v0 = vld [vmem:[%s6634_s15 + $0x8c0] sm:$0xff]  ;;  %v1547_v6 = vld [vmem:[%s6634_s15 + $0x118] sm:$0xff] }
 0x229   : > { %v6413_v11 = vld [vmem:[%s6629_s28] sm:$0xff] }
 0x22a   : > { %v4895_v2 = vpack.c.bf16 %v1217_v52, %v1216_v33  ;;  %v1801_v33 = vld [vmem:[%s6634_s15 + $0x908] sm:$0xff] }
 0x22b   : > { %4954 = vmatpush1.bf16.msra.mxu0 %v4953_v63  ;;  %v1523_v63 = vld [vmem:[%s6634_s15 + $0x58] sm:$0xff]  ;;  %v1809_v52 = vld [vmem:[%s6634_s15 + $0x948] sm:$0xff] }
 0x22c   : > { %v1110_v55 = vpop.permute.xlu1 %1109  ;;  %4896 = vmatprep.subr.bf16.mxu1 %v4895_v2  ;;  %4956 = vmatprep.subr.bf16.mxu0 %v4955_v19  ;;  %v6412_v19 = vld [vmem:[%s6644_s20 + $0x70] sm:$0xff]  ;;  %v4973_v2 = vpack.c.bf16 %v1792_v0, %v1784_v42  ;;  %v1857_v42 = vld [vmem:[%s6634_s15 + $0xac8] sm:$0xff] }
 0x22d   : > { %v1136_v15 = vmul.f32 %v1110_v55, %v6931_v41  ;;  %v4967_v41 = vpack.c.bf16 %v1777_v56, %v1769_v14  ;;  %v1138_v60 = vmul.f32 %v6412_v19, %v1118_v10  ;;  %v4975_v55 = vpack.c.bf16 %v1809_v52, %v1801_v33  ;;  %v1824_v14 = vld [vmem:[%s6634_s15 + $0x9c0] sm:$0xff]  ;;  %v1555_v56 = vld [vmem:[%s6634_s15 + $0x158] sm:$0xff]  ;;  %v1570_v33 = vld [vmem:[%s6634_s15 + $0x1d0] sm:$0xff] }
 0x22e   : > { %v1832_v10 = vld [vmem:[%s6634_s15 + $0xa00] sm:$0xff]  ;;  %v1579_v19 = vld [vmem:[%s6634_s15 + $0x218] sm:$0xff] }
 0x22f   : > { %v4897_v62 = vpack.c.bf16 %v1137_v58, %v1136_v15  ;;  %4958 = vmatpush1.bf16.msra.mxu0 %v4957_v39  ;;  %v5159_v39 = vpack.c.bf16 %v1523_v63, %v1515_v46  ;;  %v1539_v58 = vld [vmem:[%s6634_s15 + $0xd8] sm:$0xff]  ;;  %v1817_v15 = vld [vmem:[%s6634_s15 + $0x988] sm:$0xff]  ;;  %v1562_v63 = vld [vmem:[%s6634_s15 + $0x190] sm:$0xff] }
 0x230   : > { %4960 = vmatprep.subr.bf16.mxu0 %v4959_v43  ;;  %v1800_v43 = vld [vmem:[%s6634_s15 + $0x900] sm:$0xff]  ;;  %v1571_v46 = vld [vmem:[%s6634_s15 + $0x1d8] sm:$0xff] }
 0x231   : > { %v1198_v50 = vpop.permute.xlu1 %1197  ;;  %4898 = vmatpush1.bf16.msra.mxu1 %v4897_v62  ;;  %v1538_v62 = vld [vmem:[%s6634_s15 + $0xd0] sm:$0xff] }
 0x232   : > { %v1218_v8 = vmul.f32 %v1198_v50, %v6948_v57  ;;  %v1816_v50 = vld [vmem:[%s6634_s15 + $0x980] sm:$0xff]  ;;  %v5165_v54 = vpack.c.bf16 %v1538_v62, %v1530_v5  ;;  %v1603_v5 = vld [vmem:[%s6634_s15 + $0x2d8] sm:$0xff]  ;;  %v1881_v62 = vld [vmem:[%s6634_s15 + $0xb88] sm:$0xff] }
 0x233   : > { %4962 = vmatpush1.bf16.msra.mxu0 %v4961_v3  ;;  %v4977_v3 = vpack.c.bf16 %v1808_v4, %v1800_v43  ;;  %v4981_v37 = vpack.c.bf16 %v1824_v14, %v1816_v50  ;;  %v1586_v43 = vld [vmem:[%s6634_s15 + $0x250] sm:$0xff] }
 0x234   : > { %4964 = vmatprep.subr.bf16.mxu0 %v4963_v7  ;;  %v5163_v7 = vpack.c.bf16 %v1539_v58, %v1531_v48  ;;  %v5173_v48 = vpack.c.bf16 %v1570_v33, %v1562_v63  ;;  %v1595_v58 = vld [vmem:[%s6634_s15 + $0x298] sm:$0xff]  ;;  %v1904_v63 = vld [vmem:[%s6634_s15 + $0xc40] sm:$0xff] }
 0x235   : > { %v1202_v12 = vpop.permute.xlu1 %1201  ;;  %v5179_v14 = vpack.c.bf16 %v1603_v5, %v1595_v58  ;;  %v1635_v33 = vld [vmem:[%s6634_s15 + $0x3d8] sm:$0xff] }
 0x236   : > { %v1219_v20 = vmul.f32 %v1202_v12, %v6955_v61  ;;  %v1546_v12 = vld [vmem:[%s6634_s15 + $0x110] sm:$0xff] }
 0x237   : > { %4966 = vmatpush1.bf16.msra.mxu0 %v4965_v1  ;;  %v1833_v1 = vld [vmem:[%s6634_s15 + $0xa08] sm:$0xff]  ;;  %v5169_v0 = vpack.c.bf16 %v1554_v44, %v1546_v12 }
 0x238   : > { %v4899_v16 = vpack.c.bf16 %v1219_v20, %v1218_v8  ;;  %4968 = vmatprep.subr.bf16.mxu0 %v4967_v41  ;;  %v1841_v41 = vld [vmem:[%s6634_s15 + $0xa48] sm:$0xff]  ;;  %v5167_v8 = vpack.c.bf16 %v1555_v56, %v1547_v6  ;;  %v1563_v20 = vld [vmem:[%s6634_s15 + $0x198] sm:$0xff]  ;;  %v1594_v6 = vld [vmem:[%s6634_s15 + $0x290] sm:$0xff] }
 0x239   : > { %v1611_v56 = vld [vmem:[%s6634_s15 + $0x318] sm:$0xff]  ;;  %v1897_v12 = vld [vmem:[%s6634_s15 + $0xc08] sm:$0xff] }
 0x23a   : > { %v1122_v57 = vpop.permute.xlu1 %1121  ;;  %4900 = vmatprep.subr.bf16.mxu1 %v4899_v16  ;;  %2601 = vmatmul.mubr.f32.vlgmr.msra.gmra.mrb[4].mxu0 %v7137_v49  ;;  %v1840_v16 = vld [vmem:[%s6634_s15 + $0xa40] sm:$0xff]  ;;  %v1905_v44 = vld [vmem:[%s6634_s15 + $0xc48] sm:$0xff] }
 0x23b   : > { %v1139_v45 = vmul.f32 %v1122_v57, %v6955_v61  ;;  %4970 = vmatpush1.bf16.msra.mxu0 %v4969_v17  ;;  %v1825_v61 = vld [vmem:[%s6634_s15 + $0x9c8] sm:$0xff]  ;;  %v4983_v17 = vpack.c.bf16 %v1841_v41, %v1833_v1  ;;  %v4985_v52 = vpack.c.bf16 %v1840_v16, %v1832_v10  ;;  %v5171_v57 = vpack.c.bf16 %v1571_v46, %v1563_v20  ;;  %v1880_v41 = vld [vmem:[%s6634_s15 + $0xb80] sm:$0xff]  ;;  %v1618_v10 = vld [vmem:[%s6634_s15 + $0x350] sm:$0xff] }
 0x23c   : > { %4972 = vmatprep.subr.bf16.mxu0 %v4971_v9  ;;  %v4979_v13 = vpack.c.bf16 %v1825_v61, %v1817_v15  ;;  %v1849_v9 = vld [vmem:[%s6634_s15 + $0xa88] sm:$0xff]  ;;  %v1864_v61 = vld [vmem:[%s6634_s15 + $0xb00] sm:$0xff] }
 0x23d   : > { %v4901_v47 = vpack.c.bf16 %v1139_v45, %v1138_v60  ;;  %v4987_v60 = vpack.c.bf16 %v1857_v42, %v1849_v9  ;;  %v1848_v45 = vld [vmem:[%s6634_s15 + $0xa80] sm:$0xff]  ;;  %v1627_v9 = vld [vmem:[%s6634_s15 + $0x398] sm:$0xff]  ;;  %v4999_v42 = vpack.c.bf16 %v1905_v44, %v1897_v12 }
 0x23e   : > { %v4989_v4 = vpack.c.bf16 %v1856_v38, %v1848_v45  ;;  %v1634_v45 = vld [vmem:[%s6634_s15 + $0x3d0] sm:$0xff]  ;;  %v1675_v12 = vld [vmem:[%s6634_s15 + $0x518] sm:$0xff] }
 0x23f   : > { %4902 = vmatpush1.bf16.msra.mxu1 %v4901_v47  ;;  %4974 = vmatpush1.bf16.msra.mxu0 %v4973_v2  ;;  %v1865_v2 = vld [vmem:[%s6634_s15 + $0xb08] sm:$0xff]  ;;  %v5175_v47 = vpack.c.bf16 %v1587_v53, %v1579_v19  ;;  %v5187_v53 = vpack.c.bf16 %v1635_v33, %v1627_v9 }
 0x240   : > { %5160 = vmatprep.subr.bf16.mxu1 %v5159_v39  ;;  %4976 = vmatprep.subr.bf16.mxu0 %v4975_v55  ;;  %v1873_v39 = vld [vmem:[%s6634_s15 + $0xb48] sm:$0xff]  ;;  %v1578_v55 = vld [vmem:[%s6634_s15 + $0x210] sm:$0xff] }
 0x241   : > { %v4991_v15 = vpack.c.bf16 %v1873_v39, %v1865_v2  ;;  %v1643_v2 = vld [vmem:[%s6634_s15 + $0x418] sm:$0xff] }
 0x242   : > { %1498 = vmatmul.mubr.f32.vlgmr.msra.gmra.mrb[2].mxu1 %v6413_v11  ;;  %v1888_v11 = vld [vmem:[%s6634_s15 + $0xbc0] sm:$0xff] }
 0x243   : > { %5162 = vmatpush1.bf16.msra.mxu1 %v5161_v59  ;;  %4978 = vmatpush1.bf16.msra.mxu0 %v4977_v3  ;;  %v1872_v59 = vld [vmem:[%s6634_s15 + $0xb40] sm:$0xff]  ;;  %v1889_v3 = vld [vmem:[%s6634_s15 + $0xbc8] sm:$0xff]  ;;  %v4997_v16 = vpack.c.bf16 %v1888_v11, %v1880_v41  ;;  %v1666_v41 = vld [vmem:[%s6634_s15 + $0x4d0] sm:$0xff] }
 0x244   : > { %5164 = vmatprep.subr.bf16.mxu1 %v5163_v7  ;;  %4980 = vmatprep.subr.bf16.mxu0 %v4979_v13  ;;  %v5177_v7 = vpack.c.bf16 %v1586_v43, %v1578_v55  ;;  %v1602_v13 = vld [vmem:[%s6634_s15 + $0x2d0] sm:$0xff]  ;;  %v4993_v50 = vpack.c.bf16 %v1872_v59, %v1864_v61  ;;  %v4995_v1 = vpack.c.bf16 %v1889_v3, %v1881_v62  ;;  %v1920_v55 = vld [vmem:[%s6634_s15 + $0xcc0] sm:$0xff]  ;;  %v1651_v43 = vld [vmem:[%s6634_s15 + $0x458] sm:$0xff] }
 0x245   : > { %2884 = vmatprep.mubr.f32.mxu1 %v7139_v51  ;;  %v5181_v20 = vpack.c.bf16 %v1602_v13, %v1594_v6  ;;  %v1650_v61 = vld [vmem:[%s6634_s15 + $0x450] sm:$0xff]  ;;  %v5191_v5 = vpack.c.bf16 %v1651_v43, %v1643_v2  ;;  %v1659_v62 = vld [vmem:[%s6634_s15 + $0x498] sm:$0xff]  ;;  %v1936_v6 = vld [vmem:[%s6634_s15 + $0xd40] sm:$0xff] }
 0x246   : > { %v1667_v13 = vld [vmem:[%s6634_s15 + $0x4d8] sm:$0xff] }
 0x247   : > { %5166 = vmatpush1.bf16.msra.mxu1 %v5165_v54  ;;  %4982 = vmatpush1.bf16.msra.mxu0 %v4981_v37  ;;  %v1619_v54 = vld [vmem:[%s6634_s15 + $0x358] sm:$0xff] }
 0x248   : > { %5168 = vmatprep.subr.bf16.mxu1 %v5167_v8  ;;  %4984 = vmatprep.subr.bf16.mxu0 %v4983_v17  ;;  %v1610_v17 = vld [vmem:[%s6634_s15 + $0x310] sm:$0xff]  ;;  %v5183_v46 = vpack.c.bf16 %v1619_v54, %v1611_v56  ;;  %v5195_v54 = vpack.c.bf16 %v1667_v13, %v1659_v62 }
 0x249   : > { %v5185_v19 = vpack.c.bf16 %v1618_v10, %v1610_v17  ;;  %v1952_v17 = vld [vmem:[%s6634_s15 + $0xdc0] sm:$0xff]  ;;  %v1683_v10 = vld [vmem:[%s6634_s15 + $0x558] sm:$0xff] }
 0x24a   : > { %v5199_v33 = vpack.c.bf16 %v1683_v10, %v1675_v12 }
 0x24b   : > { %5170 = vmatpush1.bf16.msra.mxu1 %v5169_v0  ;;  %4986 = vmatpush1.bf16.msra.mxu0 %v4985_v52  ;;  %v1896_v0 = vld [vmem:[%s6634_s15 + $0xc00] sm:$0xff]  ;;  %v1913_v52 = vld [vmem:[%s6634_s15 + $0xc88] sm:$0xff] }
 0x24c   : > { %5172 = vmatprep.subr.bf16.mxu1 %v5171_v57  ;;  %4988 = vmatprep.subr.bf16.mxu0 %v4987_v60  ;;  %v1921_v57 = vld [vmem:[%s6634_s15 + $0xcc8] sm:$0xff]  ;;  %v1626_v60 = vld [vmem:[%s6634_s15 + $0x390] sm:$0xff]  ;;  %v5001_v38 = vpack.c.bf16 %v1904_v63, %v1896_v0 }
 0x24d   : > { %v5003_v39 = vpack.c.bf16 %v1921_v57, %v1913_v52  ;;  %v5189_v58 = vpack.c.bf16 %v1634_v45, %v1626_v60  ;;  %v1682_v0 = vld [vmem:[%s6634_s15 + $0x550] sm:$0xff]  ;;  %v1691_v52 = vld [vmem:[%s6634_s15 + $0x598] sm:$0xff]  ;;  %v1968_v60 = vld [vmem:[%s6634_s15 + $0xe40] sm:$0xff] }
 0x24e   : > { %v1699_v45 = vld [vmem:[%s6634_s15 + $0x5d8] sm:$0xff] }
 0x24f   : > { %5174 = vmatpush1.bf16.msra.mxu1 %v5173_v48  ;;  %4990 = vmatpush1.bf16.msra.mxu0 %v4989_v4  ;;  %v1912_v48 = vld [vmem:[%s6634_s15 + $0xc80] sm:$0xff]  ;;  %v1929_v4 = vld [vmem:[%s6634_s15 + $0xd08] sm:$0xff]  ;;  %v5203_v43 = vpack.c.bf16 %v1699_v45, %v1691_v52 }
 0x250   : > { %5176 = vmatprep.subr.bf16.mxu1 %v5175_v47  ;;  %4992 = vmatprep.subr.bf16.mxu0 %v4991_v15  ;;  %v1937_v47 = vld [vmem:[%s6634_s15 + $0xd48] sm:$0xff]  ;;  %v1642_v15 = vld [vmem:[%s6634_s15 + $0x410] sm:$0xff]  ;;  %v5005_v59 = vpack.c.bf16 %v1920_v55, %v1912_v48 }
 0x251   : > { %v7296_v37 = vpop.f32.mrb[0].mxu1  ;;  %v5007_v3 = vpack.c.bf16 %v1937_v47, %v1929_v4  ;;  %v5193_v56 = vpack.c.bf16 %v1650_v61, %v1642_v15  ;;  %v1698_v48 = vld [vmem:[%s6634_s15 + $0x5d0] sm:$0xff]  ;;  %v1707_v4 = vld [vmem:[%s6634_s15 + $0x618] sm:$0xff]  ;;  %v1984_v15 = vld [vmem:[%s6634_s15 + $0xec0] sm:$0xff] }
 0x252   : > { %v7298_v8 = vpop.f32.mrb[1].mxu1  ;;  %v1715_v61 = vld [vmem:[%s6634_s15 + $0x658] sm:$0xff] }
 0x253   : > { %5178 = vmatpush1.bf16.msra.mxu1 %v5177_v7  ;;  %4994 = vmatpush1.bf16.msra.mxu0 %v4993_v50  ;;  %v1928_v7 = vld [vmem:[%s6634_s15 + $0xd00] sm:$0xff]  ;;  %v1945_v50 = vld [vmem:[%s6634_s15 + $0xd88] sm:$0xff]  ;;  %v5207_v13 = vpack.c.bf16 %v1715_v61, %v1707_v4 }
 0x254   : > { %5180 = vmatprep.subr.bf16.mxu1 %v5179_v14  ;;  %4996 = vmatprep.subr.bf16.mxu0 %v4995_v1  ;;  %v1953_v14 = vld [vmem:[%s6634_s15 + $0xdc8] sm:$0xff]  ;;  %v1658_v1 = vld [vmem:[%s6634_s15 + $0x490] sm:$0xff]  ;;  %v5009_v11 = vpack.c.bf16 %v1936_v6, %v1928_v7 }
 0x255   : > { %2671 = vmatprep.mubr.f32.mxu0 %v7298_v8  ;;  %v5011_v44 = vpack.c.bf16 %v1953_v14, %v1945_v50  ;;  %v5197_v9 = vpack.c.bf16 %v1666_v41, %v1658_v1  ;;  %v1714_v7 = vld [vmem:[%s6634_s15 + $0x650] sm:$0xff]  ;;  %v1723_v50 = vld [vmem:[%s6634_s15 + $0x698] sm:$0xff]  ;;  %v2000_v1 = vld [vmem:[%s6634_s15 + $0xf40] sm:$0xff] }
 0x256   : > { %v1731_v41 = vld [vmem:[%s6634_s15 + $0x6d8] sm:$0xff] }
 0x257   : > { %5182 = vmatpush1.bf16.msra.mxu1 %v5181_v20  ;;  %4998 = vmatpush1.bf16.msra.mxu0 %v4997_v16  ;;  %v1944_v20 = vld [vmem:[%s6634_s15 + $0xd80] sm:$0xff]  ;;  %v1961_v16 = vld [vmem:[%s6634_s15 + $0xe08] sm:$0xff]  ;;  %v5211_v10 = vpack.c.bf16 %v1731_v41, %v1723_v50 }
 0x258   : > { %5184 = vmatprep.subr.bf16.mxu1 %v5183_v46  ;;  %5000 = vmatprep.subr.bf16.mxu0 %v4999_v42  ;;  %v1969_v46 = vld [vmem:[%s6634_s15 + $0xe48] sm:$0xff]  ;;  %v1674_v42 = vld [vmem:[%s6634_s15 + $0x510] sm:$0xff]  ;;  %v5013_v63 = vpack.c.bf16 %v1952_v17, %v1944_v20 }
 0x259   : > { %v5015_v57 = vpack.c.bf16 %v1969_v46, %v1961_v16  ;;  %v5201_v2 = vpack.c.bf16 %v1682_v0, %v1674_v42  ;;  %v1730_v20 = vld [vmem:[%s6634_s15 + $0x6d0] sm:$0xff]  ;;  %v1739_v16 = vld [vmem:[%s6634_s15 + $0x718] sm:$0xff]  ;;  %v2016_v42 = vld [vmem:[%s6634_s15 + $0xfc0] sm:$0xff] }
 0x25a   : > { %v1747_v0 = vld [vmem:[%s6634_s15 + $0x758] sm:$0xff] }
 0x25b   : > { %5186 = vmatpush1.bf16.msra.mxu1 %v5185_v19  ;;  %5002 = vmatpush1.bf16.msra.mxu0 %v5001_v38  ;;  %v1960_v19 = vld [vmem:[%s6634_s15 + $0xe00] sm:$0xff]  ;;  %v1977_v38 = vld [vmem:[%s6634_s15 + $0xe88] sm:$0xff]  ;;  %v5215_v45 = vpack.c.bf16 %v1747_v0, %v1739_v16 }
 0x25c   : > { %5188 = vmatprep.subr.bf16.mxu1 %v5187_v53  ;;  %5004 = vmatprep.subr.bf16.mxu0 %v5003_v39  ;;  %v1985_v53 = vld [vmem:[%s6634_s15 + $0xec8] sm:$0xff]  ;;  %v1690_v39 = vld [vmem:[%s6634_s15 + $0x590] sm:$0xff]  ;;  %v5017_v55 = vpack.c.bf16 %v1968_v60, %v1960_v19 }
 0x25d   : > { %v5019_v47 = vpack.c.bf16 %v1985_v53, %v1977_v38  ;;  %v5205_v62 = vpack.c.bf16 %v1698_v48, %v1690_v39  ;;  %v1746_v19 = vld [vmem:[%s6634_s15 + $0x750] sm:$0xff]  ;;  %v1755_v38 = vld [vmem:[%s6634_s15 + $0x798] sm:$0xff]  ;;  %v2032_v39 = vld [vmem:[%s6634_s15 + $0x1040] sm:$0xff] }
 0x25e   : > { %v1763_v48 = vld [vmem:[%s6634_s15 + $0x7d8] sm:$0xff] }
 0x25f   : > { %5190 = vmatpush1.bf16.msra.mxu1 %v5189_v58  ;;  %5006 = vmatpush1.bf16.msra.mxu0 %v5005_v59  ;;  %v1976_v58 = vld [vmem:[%s6634_s15 + $0xe80] sm:$0xff]  ;;  %v1993_v59 = vld [vmem:[%s6634_s15 + $0xf08] sm:$0xff]  ;;  %v5219_v61 = vpack.c.bf16 %v1763_v48, %v1755_v38 }
 0x260   : > { %5192 = vmatprep.subr.bf16.mxu1 %v5191_v5  ;;  %5008 = vmatprep.subr.bf16.mxu0 %v5007_v3  ;;  %v2001_v5 = vld [vmem:[%s6634_s15 + $0xf48] sm:$0xff]  ;;  %v1706_v3 = vld [vmem:[%s6634_s15 + $0x610] sm:$0xff]  ;;  %v5021_v6 = vpack.c.bf16 %v1984_v15, %v1976_v58 }
 0x261   : > { %v5023_v14 = vpack.c.bf16 %v2001_v5, %v1993_v59  ;;  %v5209_v12 = vpack.c.bf16 %v1714_v7, %v1706_v3  ;;  %v1762_v58 = vld [vmem:[%s6634_s15 + $0x7d0] sm:$0xff]  ;;  %v1771_v59 = vld [vmem:[%s6634_s15 + $0x818] sm:$0xff]  ;;  %v2048_v3 = vld [vmem:[%s6634_s15 + $0x10c0] sm:$0xff] }
 0x262   : > { %v1779_v7 = vld [vmem:[%s6634_s15 + $0x858] sm:$0xff] }
 0x263   : > { %5194 = vmatpush1.bf16.msra.mxu1 %v5193_v56  ;;  %5010 = vmatpush1.bf16.msra.mxu0 %v5009_v11  ;;  %v1992_v56 = vld [vmem:[%s6634_s15 + $0xf00] sm:$0xff]  ;;  %v2009_v11 = vld [vmem:[%s6634_s15 + $0xf88] sm:$0xff]  ;;  %v5223_v41 = vpack.c.bf16 %v1779_v7, %v1771_v59 }
 0x264   : > { %5196 = vmatprep.subr.bf16.mxu1 %v5195_v54  ;;  %5012 = vmatprep.subr.bf16.mxu0 %v5011_v44  ;;  %v2017_v54 = vld [vmem:[%s6634_s15 + $0xfc8] sm:$0xff]  ;;  %v1722_v44 = vld [vmem:[%s6634_s15 + $0x690] sm:$0xff]  ;;  %v5025_v17 = vpack.c.bf16 %v2000_v1, %v1992_v56 }
 0x265   : > { %v5027_v46 = vpack.c.bf16 %v2017_v54, %v2009_v11  ;;  %v5213_v52 = vpack.c.bf16 %v1730_v20, %v1722_v44  ;;  %v1778_v56 = vld [vmem:[%s6634_s15 + $0x850] sm:$0xff]  ;;  %v1787_v11 = vld [vmem:[%s6634_s15 + $0x898] sm:$0xff]  ;;  %v2064_v44 = vld [vmem:[%s6634_s15 + $0x1140] sm:$0xff] }
 0x266   : > { %v1795_v20 = vld [vmem:[%s6634_s15 + $0x8d8] sm:$0xff] }
 0x267   : > { %5198 = vmatpush1.bf16.msra.mxu1 %v5197_v9  ;;  %5014 = vmatpush1.bf16.msra.mxu0 %v5013_v63  ;;  %v2008_v9 = vld [vmem:[%s6634_s15 + $0xf80] sm:$0xff]  ;;  %v2025_v63 = vld [vmem:[%s6634_s15 + $0x1008] sm:$0xff]  ;;  %v5227_v0 = vpack.c.bf16 %v1795_v20, %v1787_v11 }
 0x268   : > { %5200 = vmatprep.subr.bf16.mxu1 %v5199_v33  ;;  %5016 = vmatprep.subr.bf16.mxu0 %v5015_v57  ;;  %v2033_v33 = vld [vmem:[%s6634_s15 + $0x1048] sm:$0xff]  ;;  %v1738_v57 = vld [vmem:[%s6634_s15 + $0x710] sm:$0xff]  ;;  %v5029_v60 = vpack.c.bf16 %v2016_v42, %v2008_v9 }
 0x269   : > { %v5031_v53 = vpack.c.bf16 %v2033_v33, %v2025_v63  ;;  %v5217_v4 = vpack.c.bf16 %v1746_v19, %v1738_v57  ;;  %v1794_v9 = vld [vmem:[%s6634_s15 + $0x8d0] sm:$0xff]  ;;  %v1803_v63 = vld [vmem:[%s6634_s15 + $0x918] sm:$0xff]  ;;  %v2080_v57 = vld [vmem:[%s6634_s15 + $0x11c0] sm:$0xff] }
 0x26a   : > { %v1811_v19 = vld [vmem:[%s6634_s15 + $0x958] sm:$0xff] }
 0x26b   : > { %5202 = vmatpush1.bf16.msra.mxu1 %v5201_v2  ;;  %5018 = vmatpush1.bf16.msra.mxu0 %v5017_v55  ;;  %v2024_v2 = vld [vmem:[%s6634_s15 + $0x1000] sm:$0xff]  ;;  %v2041_v55 = vld [vmem:[%s6634_s15 + $0x1088] sm:$0xff]  ;;  %v5231_v48 = vpack.c.bf16 %v1811_v19, %v1803_v63 }
 0x26c   : > { %5204 = vmatprep.subr.bf16.mxu1 %v5203_v43  ;;  %5020 = vmatprep.subr.bf16.mxu0 %v5019_v47  ;;  %v2049_v43 = vld [vmem:[%s6634_s15 + $0x10c8] sm:$0xff]  ;;  %v1754_v47 = vld [vmem:[%s6634_s15 + $0x790] sm:$0xff]  ;;  %v5033_v15 = vpack.c.bf16 %v2032_v39, %v2024_v2 }
 0x26d   : > { %v5035_v5 = vpack.c.bf16 %v2049_v43, %v2041_v55  ;;  %v5221_v50 = vpack.c.bf16 %v1762_v58, %v1754_v47  ;;  %v1810_v2 = vld [vmem:[%s6634_s15 + $0x950] sm:$0xff]  ;;  %v1819_v55 = vld [vmem:[%s6634_s15 + $0x998] sm:$0xff]  ;;  %v2096_v47 = vld [vmem:[%s6634_s15 + $0x1240] sm:$0xff] }
 0x26e   : > { %v1827_v58 = vld [vmem:[%s6634_s15 + $0x9d8] sm:$0xff] }
 0x26f   : > { %5206 = vmatpush1.bf16.msra.mxu1 %v5205_v62  ;;  %5022 = vmatpush1.bf16.msra.mxu0 %v5021_v6  ;;  %v2040_v62 = vld [vmem:[%s6634_s15 + $0x1080] sm:$0xff]  ;;  %v2057_v6 = vld [vmem:[%s6634_s15 + $0x1108] sm:$0xff]  ;;  %v5235_v7 = vpack.c.bf16 %v1827_v58, %v1819_v55 }
 0x270   : > { %5208 = vmatprep.subr.bf16.mxu1 %v5207_v13  ;;  %5024 = vmatprep.subr.bf16.mxu0 %v5023_v14  ;;  %v2065_v13 = vld [vmem:[%s6634_s15 + $0x1148] sm:$0xff]  ;;  %v1770_v14 = vld [vmem:[%s6634_s15 + $0x810] sm:$0xff]  ;;  %v5037_v1 = vpack.c.bf16 %v2048_v3, %v2040_v62 }
 0x271   : > { %v5039_v54 = vpack.c.bf16 %v2065_v13, %v2057_v6  ;;  %v5225_v16 = vpack.c.bf16 %v1778_v56, %v1770_v14  ;;  %v1826_v62 = vld [vmem:[%s6634_s15 + $0x9d0] sm:$0xff]  ;;  %v1835_v6 = vld [vmem:[%s6634_s15 + $0xa18] sm:$0xff]  ;;  %v2112_v14 = vld [vmem:[%s6634_s15 + $0x12c0] sm:$0xff] }
 0x272   : > { %v1843_v56 = vld [vmem:[%s6634_s15 + $0xa58] sm:$0xff] }
 0x273   : > { %5210 = vmatpush1.bf16.msra.mxu1 %v5209_v12  ;;  %5026 = vmatpush1.bf16.msra.mxu0 %v5025_v17  ;;  %v2056_v12 = vld [vmem:[%s6634_s15 + $0x1100] sm:$0xff]  ;;  %v2073_v17 = vld [vmem:[%s6634_s15 + $0x1188] sm:$0xff]  ;;  %v5239_v20 = vpack.c.bf16 %v1843_v56, %v1835_v6 }
 0x274   : > { %5212 = vmatprep.subr.bf16.mxu1 %v5211_v10  ;;  %5028 = vmatprep.subr.bf16.mxu0 %v5027_v46  ;;  %v2081_v10 = vld [vmem:[%s6634_s15 + $0x11c8] sm:$0xff]  ;;  %v1786_v46 = vld [vmem:[%s6634_s15 + $0x890] sm:$0xff]  ;;  %v5041_v42 = vpack.c.bf16 %v2064_v44, %v2056_v12 }
 0x275   : > { %v5043_v33 = vpack.c.bf16 %v2081_v10, %v2073_v17  ;;  %v5229_v38 = vpack.c.bf16 %v1794_v9, %v1786_v46  ;;  %v1842_v12 = vld [vmem:[%s6634_s15 + $0xa50] sm:$0xff]  ;;  %v1851_v17 = vld [vmem:[%s6634_s15 + $0xa98] sm:$0xff]  ;;  %v2128_v46 = vld [vmem:[%s6634_s15 + $0x1340] sm:$0xff] }
 0x276   : > { %v1859_v9 = vld [vmem:[%s6634_s15 + $0xad8] sm:$0xff] }
 0x277   : > { %5214 = vmatpush1.bf16.msra.mxu1 %v5213_v52  ;;  %5030 = vmatpush1.bf16.msra.mxu0 %v5029_v60  ;;  %v2072_v52 = vld [vmem:[%s6634_s15 + $0x1180] sm:$0xff]  ;;  %v2089_v60 = vld [vmem:[%s6634_s15 + $0x1208] sm:$0xff]  ;;  %v5243_v19 = vpack.c.bf16 %v1859_v9, %v1851_v17 }
 0x278   : > { %5216 = vmatprep.subr.bf16.mxu1 %v5215_v45  ;;  %5032 = vmatprep.subr.bf16.mxu0 %v5031_v53  ;;  %v2097_v45 = vld [vmem:[%s6634_s15 + $0x1248] sm:$0xff]  ;;  %v1802_v53 = vld [vmem:[%s6634_s15 + $0x910] sm:$0xff]  ;;  %v5045_v39 = vpack.c.bf16 %v2080_v57, %v2072_v52 }
 0x279   : > { %v5047_v43 = vpack.c.bf16 %v2097_v45, %v2089_v60  ;;  %v5233_v59 = vpack.c.bf16 %v1810_v2, %v1802_v53  ;;  %v1858_v52 = vld [vmem:[%s6634_s15 + $0xad0] sm:$0xff]  ;;  %v1867_v60 = vld [vmem:[%s6634_s15 + $0xb18] sm:$0xff]  ;;  %v2144_v53 = vld [vmem:[%s6634_s15 + $0x13c0] sm:$0xff] }
 0x27a   : > { %2672 = vmatmul.mubr.f32.vlgmr.msra.gmra.mrb[4].mxu0 %v7296_v37  ;;  %v1875_v2 = vld [vmem:[%s6634_s15 + $0xb58] sm:$0xff] }
 0x27b   : > { %5218 = vmatpush1.bf16.msra.mxu1 %v5217_v4  ;;  %5034 = vmatpush1.bf16.msra.mxu0 %v5033_v15  ;;  %v2088_v4 = vld [vmem:[%s6634_s15 + $0x1200] sm:$0xff]  ;;  %v2105_v15 = vld [vmem:[%s6634_s15 + $0x1288] sm:$0xff]  ;;  %v5247_v58 = vpack.c.bf16 %v1875_v2, %v1867_v60 }
 0x27c   : > { %5220 = vmatprep.subr.bf16.mxu1 %v5219_v61  ;;  %5036 = vmatprep.subr.bf16.mxu0 %v5035_v5  ;;  %v2113_v61 = vld [vmem:[%s6634_s15 + $0x12c8] sm:$0xff]  ;;  %v1818_v5 = vld [vmem:[%s6634_s15 + $0x990] sm:$0xff]  ;;  %v5049_v3 = vpack.c.bf16 %v2096_v47, %v2088_v4 }
 0x27d   : > { %v5051_v13 = vpack.c.bf16 %v2113_v61, %v2105_v15  ;;  %v5237_v11 = vpack.c.bf16 %v1826_v62, %v1818_v5  ;;  %v1874_v4 = vld [vmem:[%s6634_s15 + $0xb50] sm:$0xff]  ;;  %v1883_v15 = vld [vmem:[%s6634_s15 + $0xb98] sm:$0xff]  ;;  %v2160_v5 = vld [vmem:[%s6634_s15 + $0x1440] sm:$0xff] }
 0x27e   : > { %v1891_v62 = vld [vmem:[%s6634_s15 + $0xbd8] sm:$0xff] }
 0x27f   : > { %5222 = vmatpush1.bf16.msra.mxu1 %v5221_v50  ;;  %5038 = vmatpush1.bf16.msra.mxu0 %v5037_v1  ;;  %v2104_v50 = vld [vmem:[%s6634_s15 + $0x1280] sm:$0xff]  ;;  %v2121_v1 = vld [vmem:[%s6634_s15 + $0x1308] sm:$0xff]  ;;  %v5251_v56 = vpack.c.bf16 %v1891_v62, %v1883_v15 }
 0x280   : > { %5224 = vmatprep.subr.bf16.mxu1 %v5223_v41  ;;  %5040 = vmatprep.subr.bf16.mxu0 %v5039_v54  ;;  %v2129_v41 = vld [vmem:[%s6634_s15 + $0x1348] sm:$0xff]  ;;  %v1834_v54 = vld [vmem:[%s6634_s15 + $0xa10] sm:$0xff]  ;;  %v5053_v44 = vpack.c.bf16 %v2112_v14, %v2104_v50 }
 0x281   : > { %v5055_v10 = vpack.c.bf16 %v2129_v41, %v2121_v1  ;;  %v5241_v63 = vpack.c.bf16 %v1842_v12, %v1834_v54  ;;  %v1890_v50 = vld [vmem:[%s6634_s15 + $0xbd0] sm:$0xff]  ;;  %v1899_v1 = vld [vmem:[%s6634_s15 + $0xc18] sm:$0xff]  ;;  %v2176_v54 = vld [vmem:[%s6634_s15 + $0x14c0] sm:$0xff] }
 0x282   : > { %2885 = vmatmul.mubr.f32.vlgmr.msra.gmra.mrb[4].mxu1 %v7137_v49  ;;  %v1907_v12 = vld [vmem:[%s6634_s15 + $0xc58] sm:$0xff] }
 0x283   : > { %5226 = vmatpush1.bf16.msra.mxu1 %v5225_v16  ;;  %5042 = vmatpush1.bf16.msra.mxu0 %v5041_v42  ;;  %v2120_v16 = vld [vmem:[%s6634_s15 + $0x1300] sm:$0xff]  ;;  %v2137_v42 = vld [vmem:[%s6634_s15 + $0x1388] sm:$0xff]  ;;  %v5255_v9 = vpack.c.bf16 %v1907_v12, %v1899_v1 }
 0x284   : > { %5228 = vmatprep.subr.bf16.mxu1 %v5227_v0  ;;  %5044 = vmatprep.subr.bf16.mxu0 %v5043_v33  ;;  %v2145_v0 = vld [vmem:[%s6634_s15 + $0x13c8] sm:$0xff]  ;;  %v1850_v33 = vld [vmem:[%s6634_s15 + $0xa90] sm:$0xff]  ;;  %v5057_v57 = vpack.c.bf16 %v2128_v46, %v2120_v16 }
 0x285   : > { %2955 = vmatprep.mubr.f32.mxu1 %v7298_v8  ;;  %v5059_v45 = vpack.c.bf16 %v2145_v0, %v2137_v42  ;;  %v5245_v55 = vpack.c.bf16 %v1858_v52, %v1850_v33  ;;  %v1906_v16 = vld [vmem:[%s6634_s15 + $0xc50] sm:$0xff]  ;;  %v1915_v42 = vld [vmem:[%s6634_s15 + $0xc98] sm:$0xff]  ;;  %v2192_v33 = vld [vmem:[%s6634_s15 + $0x1540] sm:$0xff] }
 0x286   : > { %v1923_v52 = vld [vmem:[%s6634_s15 + $0xcd8] sm:$0xff] }
 0x287   : > { %5230 = vmatpush1.bf16.msra.mxu1 %v5229_v38  ;;  %5046 = vmatpush1.bf16.msra.mxu0 %v5045_v39  ;;  %v2136_v38 = vld [vmem:[%s6634_s15 + $0x1380] sm:$0xff]  ;;  %v2153_v39 = vld [vmem:[%s6634_s15 + $0x1408] sm:$0xff]  ;;  %v5259_v2 = vpack.c.bf16 %v1923_v52, %v1915_v42 }
 0x288   : > { %5232 = vmatprep.subr.bf16.mxu1 %v5231_v48  ;;  %5048 = vmatprep.subr.bf16.mxu0 %v5047_v43  ;;  %v2161_v48 = vld [vmem:[%s6634_s15 + $0x1448] sm:$0xff]  ;;  %v1866_v43 = vld [vmem:[%s6634_s15 + $0xb10] sm:$0xff]  ;;  %v5061_v47 = vpack.c.bf16 %v2144_v53, %v2136_v38 }
 0x289   : > { %v5063_v61 = vpack.c.bf16 %v2161_v48, %v2153_v39  ;;  %v5249_v6 = vpack.c.bf16 %v1874_v4, %v1866_v43  ;;  %v1922_v38 = vld [vmem:[%s6634_s15 + $0xcd0] sm:$0xff]  ;;  %v1931_v39 = vld [vmem:[%s6634_s15 + $0xd18] sm:$0xff]  ;;  %v2208_v43 = vld [vmem:[%s6634_s15 + $0x15c0] sm:$0xff] }
 0x28a   : > { %v1939_v4 = vld [vmem:[%s6634_s15 + $0xd58] sm:$0xff] }
 0x28b   : > { %5234 = vmatpush1.bf16.msra.mxu1 %v5233_v59  ;;  %5050 = vmatpush1.bf16.msra.mxu0 %v5049_v3  ;;  %v2152_v59 = vld [vmem:[%s6634_s15 + $0x1400] sm:$0xff]  ;;  %v2169_v3 = vld [vmem:[%s6634_s15 + $0x1488] sm:$0xff]  ;;  %v5263_v62 = vpack.c.bf16 %v1939_v4, %v1931_v39 }
 0x28c   : > { %5236 = vmatprep.subr.bf16.mxu1 %v5235_v7  ;;  %5052 = vmatprep.subr.bf16.mxu0 %v5051_v13  ;;  %v2177_v7 = vld [vmem:[%s6634_s15 + $0x14c8] sm:$0xff]  ;;  %v1882_v13 = vld [vmem:[%s6634_s15 + $0xb90] sm:$0xff]  ;;  %v5065_v14 = vpack.c.bf16 %v2160_v5, %v2152_v59 }
 0x28d   : > { %v5067_v41 = vpack.c.bf16 %v2177_v7, %v2169_v3  ;;  %v5253_v17 = vpack.c.bf16 %v1890_v50, %v1882_v13  ;;  %v1938_v59 = vld [vmem:[%s6634_s15 + $0xd50] sm:$0xff]  ;;  %v1947_v3 = vld [vmem:[%s6634_s15 + $0xd98] sm:$0xff]  ;;  %v2224_v13 = vld [vmem:[%s6634_s15 + $0x1640] sm:$0xff] }
 0x28e   : > { %v1955_v50 = vld [vmem:[%s6634_s15 + $0xdd8] sm:$0xff] }
 0x28f   : > { %5238 = vmatpush1.bf16.msra.mxu1 %v5237_v11  ;;  %5054 = vmatpush1.bf16.msra.mxu0 %v5053_v44  ;;  %v2168_v11 = vld [vmem:[%s6634_s15 + $0x1480] sm:$0xff]  ;;  %v2185_v44 = vld [vmem:[%s6634_s15 + $0x1508] sm:$0xff]  ;;  %v5267_v12 = vpack.c.bf16 %v1955_v50, %v1947_v3  ;;  %v2002_v50 = vld [vmem:[%s6634_s15 + $0xf50] sm:$0xff] }
 0x290   : > { %5240 = vmatprep.subr.bf16.mxu1 %v5239_v20  ;;  %5056 = vmatprep.subr.bf16.mxu0 %v5055_v10  ;;  %v2193_v20 = vld [vmem:[%s6634_s15 + $0x1548] sm:$0xff]  ;;  %v1898_v10 = vld [vmem:[%s6634_s15 + $0xc10] sm:$0xff]  ;;  %v5069_v46 = vpack.c.bf16 %v2176_v54, %v2168_v11 }
 0x291   : > { %v5071_v0 = vpack.c.bf16 %v2193_v20, %v2185_v44  ;;  %v5257_v60 = vpack.c.bf16 %v1906_v16, %v1898_v10  ;;  %v1954_v11 = vld [vmem:[%s6634_s15 + $0xdd0] sm:$0xff]  ;;  %v1963_v44 = vld [vmem:[%s6634_s15 + $0xe18] sm:$0xff]  ;;  %v2240_v10 = vld [vmem:[%s6634_s15 + $0x16c0] sm:$0xff] }
 0x292   : > { %v1971_v16 = vld [vmem:[%s6634_s15 + $0xe58] sm:$0xff] }
 0x293   : > { %5242 = vmatpush1.bf16.msra.mxu1 %v5241_v63  ;;  %5058 = vmatpush1.bf16.msra.mxu0 %v5057_v57  ;;  %v2184_v63 = vld [vmem:[%s6634_s15 + $0x1500] sm:$0xff]  ;;  %v2201_v57 = vld [vmem:[%s6634_s15 + $0x1588] sm:$0xff]  ;;  %v5271_v52 = vpack.c.bf16 %v1971_v16, %v1963_v44  ;;  %v2027_v44 = vld [vmem:[%s6634_s15 + $0x1018] sm:$0xff] }
 0x294   : > { %5244 = vmatprep.subr.bf16.mxu1 %v5243_v19  ;;  %5060 = vmatprep.subr.bf16.mxu0 %v5059_v45  ;;  %v2209_v19 = vld [vmem:[%s6634_s15 + $0x15c8] sm:$0xff]  ;;  %v1914_v45 = vld [vmem:[%s6634_s15 + $0xc90] sm:$0xff]  ;;  %v5073_v53 = vpack.c.bf16 %v2192_v33, %v2184_v63 }
 0x295   : > { %v5075_v48 = vpack.c.bf16 %v2209_v19, %v2201_v57  ;;  %v5261_v15 = vpack.c.bf16 %v1922_v38, %v1914_v45  ;;  %v1970_v63 = vld [vmem:[%s6634_s15 + $0xe50] sm:$0xff]  ;;  %v1979_v57 = vld [vmem:[%s6634_s15 + $0xe98] sm:$0xff]  ;;  %v2256_v45 = vld [vmem:[%s6634_s15 + $0x1740] sm:$0xff] }
 0x296   : > { %v1987_v38 = vld [vmem:[%s6634_s15 + $0xed8] sm:$0xff]  ;;  %v2026_v16 = vld [vmem:[%s6634_s15 + $0x1010] sm:$0xff] }
 0x297   : > { %5246 = vmatpush1.bf16.msra.mxu1 %v5245_v55  ;;  %5062 = vmatpush1.bf16.msra.mxu0 %v5061_v47  ;;  %v2200_v55 = vld [vmem:[%s6634_s15 + $0x1580] sm:$0xff]  ;;  %v2217_v47 = vld [vmem:[%s6634_s15 + $0x1608] sm:$0xff]  ;;  %v5275_v4 = vpack.c.bf16 %v1987_v38, %v1979_v57  ;;  %v2059_v57 = vld [vmem:[%s6634_s15 + $0x1118] sm:$0xff] }
 0x298   : > { %5248 = vmatprep.subr.bf16.mxu1 %v5247_v58  ;;  %5064 = vmatprep.subr.bf16.mxu0 %v5063_v61  ;;  %v2225_v58 = vld [vmem:[%s6634_s15 + $0x1648] sm:$0xff]  ;;  %v1930_v61 = vld [vmem:[%s6634_s15 + $0xd10] sm:$0xff]  ;;  %v5077_v5 = vpack.c.bf16 %v2208_v43, %v2200_v55 }
 0x299   : > { %v5079_v7 = vpack.c.bf16 %v2225_v58, %v2217_v47  ;;  %v5265_v1 = vpack.c.bf16 %v1938_v59, %v1930_v61  ;;  %v1986_v55 = vld [vmem:[%s6634_s15 + $0xed0] sm:$0xff]  ;;  %v1995_v47 = vld [vmem:[%s6634_s15 + $0xf18] sm:$0xff]  ;;  %v2272_v61 = vld [vmem:[%s6634_s15 + $0x17c0] sm:$0xff] }
 0x29a   : > { %v2003_v59 = vld [vmem:[%s6634_s15 + $0xf58] sm:$0xff]  ;;  %v2058_v38 = vld [vmem:[%s6634_s15 + $0x1110] sm:$0xff] }
 0x29b   : > { %5250 = vmatpush1.bf16.msra.mxu1 %v5249_v6  ;;  %5066 = vmatpush1.bf16.msra.mxu0 %v5065_v14  ;;  %v2216_v6 = vld [vmem:[%s6634_s15 + $0x1600] sm:$0xff]  ;;  %v2233_v14 = vld [vmem:[%s6634_s15 + $0x1688] sm:$0xff] }
 0x29c   : > { %5252 = vmatprep.subr.bf16.mxu1 %v5251_v56  ;;  %5068 = vmatprep.subr.bf16.mxu0 %v5067_v41  ;;  %v2241_v56 = vld [vmem:[%s6634_s15 + $0x16c8] sm:$0xff]  ;;  %v1946_v41 = vld [vmem:[%s6634_s15 + $0xd90] sm:$0xff]  ;;  %v5081_v54 = vpack.c.bf16 %v2224_v13, %v2216_v6  ;;  %v5279_v6 = vpack.c.bf16 %v2003_v59, %v1995_v47  ;;  %v2091_v47 = vld [vmem:[%s6634_s15 + $0x1218] sm:$0xff] }
 0x29d   : > { %v5083_v20 = vpack.c.bf16 %v2241_v56, %v2233_v14  ;;  %v5269_v42 = vpack.c.bf16 %v1954_v11, %v1946_v41  ;;  %v1994_v13 = vld [vmem:[%s6634_s15 + $0xf10] sm:$0xff]  ;;  %v2011_v56 = vld [vmem:[%s6634_s15 + $0xf98] sm:$0xff] }
 0x29e   : > { %v5281_v41 = vpack.c.bf16 %v2002_v50, %v1994_v13  ;;  %v2107_v50 = vld [vmem:[%s6634_s15 + $0x1298] sm:$0xff] }
 0x29f   : > { %5254 = vmatpush1.bf16.msra.mxu1 %v5253_v17  ;;  %5070 = vmatpush1.bf16.msra.mxu0 %v5069_v46  ;;  %v2232_v17 = vld [vmem:[%s6634_s15 + $0x1680] sm:$0xff]  ;;  %v2249_v46 = vld [vmem:[%s6634_s15 + $0x1708] sm:$0xff] }
 0x2a0   : > { %5256 = vmatprep.subr.bf16.mxu1 %v5255_v9  ;;  %5072 = vmatprep.subr.bf16.mxu0 %v5071_v0  ;;  %v2257_v9 = vld [vmem:[%s6634_s15 + $0x1748] sm:$0xff]  ;;  %v1962_v0 = vld [vmem:[%s6634_s15 + $0xe10] sm:$0xff]  ;;  %v5085_v33 = vpack.c.bf16 %v2240_v10, %v2232_v17 }
 0x2a1   : > { %v5087_v19 = vpack.c.bf16 %v2257_v9, %v2249_v46  ;;  %v5273_v39 = vpack.c.bf16 %v1970_v63, %v1962_v0  ;;  %v2034_v46 = vld [vmem:[%s6634_s15 + $0x1050] sm:$0xff]  ;;  %v2043_v9 = vld [vmem:[%s6634_s15 + $0x1098] sm:$0xff] }
 0x2a2   : > { %v5289_v0 = vpack.c.bf16 %v2034_v46, %v2026_v16  ;;  %v2114_v16 = vld [vmem:[%s6634_s15 + $0x12d0] sm:$0xff]  ;;  %v2123_v46 = vld [vmem:[%s6634_s15 + $0x1318] sm:$0xff] }
 0x2a3   : > { %5258 = vmatpush1.bf16.msra.mxu1 %v5257_v60  ;;  %5074 = vmatpush1.bf16.msra.mxu0 %v5073_v53  ;;  %v2248_v60 = vld [vmem:[%s6634_s15 + $0x1700] sm:$0xff]  ;;  %v2265_v53 = vld [vmem:[%s6634_s15 + $0x1788] sm:$0xff] }
 0x2a4   : > { %5260 = vmatprep.subr.bf16.mxu1 %v5259_v2  ;;  %5076 = vmatprep.subr.bf16.mxu0 %v5075_v48  ;;  %v2273_v2 = vld [vmem:[%s6634_s15 + $0x17c8] sm:$0xff]  ;;  %v1978_v48 = vld [vmem:[%s6634_s15 + $0xe90] sm:$0xff]  ;;  %v5089_v43 = vpack.c.bf16 %v2256_v45, %v2248_v60 }
 0x2a5   : > { %v5091_v58 = vpack.c.bf16 %v2273_v2, %v2265_v53  ;;  %v5277_v3 = vpack.c.bf16 %v1986_v55, %v1978_v48  ;;  %v2066_v53 = vld [vmem:[%s6634_s15 + $0x1150] sm:$0xff]  ;;  %v2075_v2 = vld [vmem:[%s6634_s15 + $0x1198] sm:$0xff] }
 0x2a6   : > { %v5297_v48 = vpack.c.bf16 %v2066_v53, %v2058_v38  ;;  %v2130_v38 = vld [vmem:[%s6634_s15 + $0x1350] sm:$0xff]  ;;  %v2139_v53 = vld [vmem:[%s6634_s15 + $0x1398] sm:$0xff] }
 0x2a7   : > { %5262 = vmatpush1.bf16.msra.mxu1 %v5261_v15  ;;  %5078 = vmatpush1.bf16.msra.mxu0 %v5077_v5  ;;  %v2264_v15 = vld [vmem:[%s6634_s15 + $0x1780] sm:$0xff]  ;;  %v2281_v5 = vld [vmem:[%s6634_s15 + $0x1808] sm:$0xff] }
 0x2a8   : > { %5264 = vmatprep.subr.bf16.mxu1 %v5263_v62  ;;  %5080 = vmatprep.subr.bf16.mxu0 %v5079_v7  ;;  %v2289_v62 = vld [vmem:[%s6634_s15 + $0x1848] sm:$0xff]  ;;  %v5093_v7 = vpack.c.bf16 %v2272_v61, %v2264_v15  ;;  %v2280_v15 = vld [vmem:[%s6634_s15 + $0x1800] sm:$0xff] }
 0x2a9   : > { %v5095_v14 = vpack.c.bf16 %v2289_v62, %v2281_v5  ;;  %v2288_v61 = vld [vmem:[%s6634_s15 + $0x1840] sm:$0xff]  ;;  %v2297_v5 = vld [vmem:[%s6634_s15 + $0x1888] sm:$0xff] }
 0x2aa   : > { %v2305_v62 = vld [vmem:[%s6634_s15 + $0x18c8] sm:$0xff] }
 0x2ab   : > { %5266 = vmatpush1.bf16.msra.mxu1 %v5265_v1  ;;  %5082 = vmatpush1.bf16.msra.mxu0 %v5081_v54  ;;  %v2019_v1 = vld [vmem:[%s6634_s15 + $0xfd8] sm:$0xff]  ;;  %v2010_v54 = vld [vmem:[%s6634_s15 + $0xf90] sm:$0xff] }
 0x2ac   : > { %5268 = vmatprep.subr.bf16.mxu1 %v5267_v12  ;;  %5084 = vmatprep.subr.bf16.mxu0 %v5083_v20  ;;  %v5283_v11 = vpack.c.bf16 %v2019_v1, %v2011_v56  ;;  %v2018_v12 = vld [vmem:[%s6634_s15 + $0xfd0] sm:$0xff]  ;;  %v2035_v20 = vld [vmem:[%s6634_s15 + $0x1058] sm:$0xff]  ;;  %v5097_v56 = vpack.c.bf16 %v2288_v61, %v2280_v15 }
 0x2ad   : > { %v5285_v17 = vpack.c.bf16 %v2018_v12, %v2010_v54  ;;  %v5287_v10 = vpack.c.bf16 %v2035_v20, %v2027_v44  ;;  %v2304_v54 = vld [vmem:[%s6634_s15 + $0x18c0] sm:$0xff]  ;;  %v2313_v44 = vld [vmem:[%s6634_s15 + $0x1908] sm:$0xff]  ;;  %v2138_v61 = vld [vmem:[%s6634_s15 + $0x1390] sm:$0xff] }
 0x2ae   : > { %v2321_v20 = vld [vmem:[%s6634_s15 + $0x1948] sm:$0xff] }
 0x2af   : > { %5270 = vmatpush1.bf16.msra.mxu1 %v5269_v42  ;;  %5086 = vmatpush1.bf16.msra.mxu0 %v5085_v33  ;;  %v2051_v42 = vld [vmem:[%s6634_s15 + $0x10d8] sm:$0xff]  ;;  %v2042_v33 = vld [vmem:[%s6634_s15 + $0x1090] sm:$0xff] }
 0x2b0   : > { %5272 = vmatprep.subr.bf16.mxu1 %v5271_v52  ;;  %5088 = vmatprep.subr.bf16.mxu0 %v5087_v19  ;;  %v5291_v63 = vpack.c.bf16 %v2051_v42, %v2043_v9  ;;  %v2050_v52 = vld [vmem:[%s6634_s15 + $0x10d0] sm:$0xff]  ;;  %v2067_v19 = vld [vmem:[%s6634_s15 + $0x1158] sm:$0xff] }
 0x2b1   : > { %v5293_v60 = vpack.c.bf16 %v2050_v52, %v2042_v33  ;;  %v5295_v45 = vpack.c.bf16 %v2067_v19, %v2059_v57  ;;  %v2131_v9 = vld [vmem:[%s6634_s15 + $0x1358] sm:$0xff]  ;;  %v2320_v33 = vld [vmem:[%s6634_s15 + $0x1940] sm:$0xff]  ;;  %v2329_v57 = vld [vmem:[%s6634_s15 + $0x1988] sm:$0xff] }
 0x2b2   : > { %v2337_v19 = vld [vmem:[%s6634_s15 + $0x19c8] sm:$0xff] }
 0x2b3   : > { %5274 = vmatpush1.bf16.msra.mxu1 %v5273_v39  ;;  %5090 = vmatpush1.bf16.msra.mxu0 %v5089_v43  ;;  %v2083_v39 = vld [vmem:[%s6634_s15 + $0x11d8] sm:$0xff]  ;;  %v2074_v43 = vld [vmem:[%s6634_s15 + $0x1190] sm:$0xff] }
 0x2b4   : > { %5276 = vmatprep.subr.bf16.mxu1 %v5275_v4  ;;  %5092 = vmatprep.subr.bf16.mxu0 %v5091_v58  ;;  %v5299_v55 = vpack.c.bf16 %v2083_v39, %v2075_v2  ;;  %v2082_v4 = vld [vmem:[%s6634_s15 + $0x11d0] sm:$0xff]  ;;  %v2099_v58 = vld [vmem:[%s6634_s15 + $0x1258] sm:$0xff] }
 0x2b5   : > { %v5301_v59 = vpack.c.bf16 %v2082_v4, %v2074_v43  ;;  %v2147_v2 = vld [vmem:[%s6634_s15 + $0x13d8] sm:$0xff]  ;;  %v2336_v43 = vld [vmem:[%s6634_s15 + $0x19c0] sm:$0xff] }
 0x2b6   : > { %v5315_v15 = vpack.c.bf16 %v2147_v2, %v2139_v53  ;;  %v2384_v53 = vld [vmem:[%s6634_s15 + $0x1b40] sm:$0xff] }
 0x2b7   : > { %5278 = vmatpush1.bf16.msra.mxu1 %v5277_v3  ;;  %5094 = vmatpush1.bf16.msra.mxu0 %v5093_v7  ;;  %v5303_v3 = vpack.c.bf16 %v2099_v58, %v2091_v47  ;;  %v2090_v7 = vld [vmem:[%s6634_s15 + $0x1210] sm:$0xff]  ;;  %v2345_v47 = vld [vmem:[%s6634_s15 + $0x1a08] sm:$0xff] }
 0x2b8   : > { %5280 = vmatprep.subr.bf16.mxu1 %v5279_v6  ;;  %5096 = vmatprep.subr.bf16.mxu0 %v5095_v14  ;;  %v2098_v6 = vld [vmem:[%s6634_s15 + $0x1250] sm:$0xff]  ;;  %v2115_v14 = vld [vmem:[%s6634_s15 + $0x12d8] sm:$0xff]  ;;  %v2353_v58 = vld [vmem:[%s6634_s15 + $0x1a48] sm:$0xff] }
 0x2b9   : > { %v5305_v12 = vpack.c.bf16 %v2098_v6, %v2090_v7  ;;  %v5111_v7 = vpack.c.bf16 %v2353_v58, %v2345_v47  ;;  %v2344_v6 = vld [vmem:[%s6634_s15 + $0x1a00] sm:$0xff]  ;;  %v2203_v47 = vld [vmem:[%s6634_s15 + $0x1598] sm:$0xff] }
 0x2ba   : > { %v2211_v58 = vld [vmem:[%s6634_s15 + $0x15d8] sm:$0xff] }
 0x2bb   : > { %5282 = vmatpush1.bf16.msra.mxu1 %v5281_v41  ;;  %v5099_v41 = vpack.c.bf16 %v2305_v62, %v2297_v5  ;;  %v2155_v5 = vld [vmem:[%s6634_s15 + $0x1418] sm:$0xff] }
 0x2bc   : > { %5284 = vmatprep.subr.bf16.mxu1 %v5283_v11  ;;  %v2296_v11 = vld [vmem:[%s6634_s15 + $0x1880] sm:$0xff]  ;;  %v2163_v62 = vld [vmem:[%s6634_s15 + $0x1458] sm:$0xff] }
 0x2bd   : > { %v5101_v42 = vpack.c.bf16 %v2304_v54, %v2296_v11  ;;  %v5319_v11 = vpack.c.bf16 %v2163_v62, %v2155_v5  ;;  %v2154_v54 = vld [vmem:[%s6634_s15 + $0x1410] sm:$0xff]  ;;  %v2400_v5 = vld [vmem:[%s6634_s15 + $0x1bc0] sm:$0xff] }
 0x2bf   : > { %5286 = vmatpush1.bf16.msra.mxu1 %v5285_v17  ;;  %v5307_v17 = vpack.c.bf16 %v2115_v14, %v2107_v50  ;;  %v2352_v50 = vld [vmem:[%s6634_s15 + $0x1a40] sm:$0xff] }
 0x2c0   : > { %5288 = vmatprep.subr.bf16.mxu1 %v5287_v10  ;;  %v2106_v10 = vld [vmem:[%s6634_s15 + $0x1290] sm:$0xff] }
 0x2c1   : > { %v5309_v52 = vpack.c.bf16 %v2114_v16, %v2106_v10  ;;  %v2360_v16 = vld [vmem:[%s6634_s15 + $0x1a80] sm:$0xff] }
 0x2c2   : > { %2956 = vmatmul.mubr.f32.vlgmr.msra.gmra.mrb[4].mxu1 %v7296_v37 }
 0x2c3   : > { %5290 = vmatpush1.bf16.msra.mxu1 %v5289_v0  ;;  %v5103_v0 = vpack.c.bf16 %v2321_v20, %v2313_v44  ;;  %v2171_v44 = vld [vmem:[%s6634_s15 + $0x1498] sm:$0xff] }
 0x2c4   : > { %5292 = vmatprep.subr.bf16.mxu1 %v5291_v63  ;;  %v2312_v63 = vld [vmem:[%s6634_s15 + $0x1900] sm:$0xff]  ;;  %v2179_v20 = vld [vmem:[%s6634_s15 + $0x14d8] sm:$0xff] }
 0x2c5   : > { %v5105_v39 = vpack.c.bf16 %v2320_v33, %v2312_v63  ;;  %v5323_v63 = vpack.c.bf16 %v2179_v20, %v2171_v44  ;;  %v2170_v33 = vld [vmem:[%s6634_s15 + $0x1490] sm:$0xff]  ;;  %v2416_v44 = vld [vmem:[%s6634_s15 + $0x1c40] sm:$0xff] }
 0x2c7   : > { %5294 = vmatpush1.bf16.msra.mxu1 %v5293_v60  ;;  %v5311_v60 = vpack.c.bf16 %v2131_v9, %v2123_v46  ;;  %v2368_v46 = vld [vmem:[%s6634_s15 + $0x1ac0] sm:$0xff] }
 0x2c8   : > { %5296 = vmatprep.subr.bf16.mxu1 %v5295_v45  ;;  %v2122_v45 = vld [vmem:[%s6634_s15 + $0x1310] sm:$0xff] }
 0x2c9   : > { %v5313_v4 = vpack.c.bf16 %v2130_v38, %v2122_v45  ;;  %v2376_v38 = vld [vmem:[%s6634_s15 + $0x1b00] sm:$0xff] }
 0x2cb   : > { %5298 = vmatpush1.bf16.msra.mxu1 %v5297_v48  ;;  %v5107_v48 = vpack.c.bf16 %v2337_v19, %v2329_v57  ;;  %v2187_v57 = vld [vmem:[%s6634_s15 + $0x1518] sm:$0xff] }
 0x2cc   : > { %5300 = vmatprep.subr.bf16.mxu1 %v5299_v55  ;;  %v2328_v55 = vld [vmem:[%s6634_s15 + $0x1980] sm:$0xff]  ;;  %v2195_v19 = vld [vmem:[%s6634_s15 + $0x1558] sm:$0xff] }
 0x2cd   : > { %v7527_v13 = vpop.f32.mrb[2].mxu0 }
 0x2ce   : > { %v7531_v1 = vpop.f32.mrb[3].mxu0 }
 0x2cf   : > { %5302 = vmatpush1.bf16.msra.mxu1 %v5301_v59  ;;  %2742 = vmatprep.mubr.f32.mxu0 %v7531_v1  ;;  %v2146_v59 = vld [vmem:[%s6634_s15 + $0x13d0] sm:$0xff] }
 0x2d0   : > { %5304 = vmatprep.subr.bf16.mxu1 %v5303_v3  ;;  %2743 = vmatmul.mubr.f32.vlgmr.msra.gmra.mrb[4].mxu0 %v7527_v13  ;;  %v5109_v3 = vpack.c.bf16 %v2336_v43, %v2328_v55  ;;  %v5317_v14 = vpack.c.bf16 %v2146_v59, %v2138_v61  ;;  %v5327_v55 = vpack.c.bf16 %v2195_v19, %v2187_v57  ;;  %v2186_v43 = vld [vmem:[%s6634_s15 + $0x1510] sm:$0xff]  ;;  %v2392_v59 = vld [vmem:[%s6634_s15 + $0x1b80] sm:$0xff] }
 0x2d1   : > { %5098 = vmatpush1.bf16.msra.mxu0 %v5097_v56  ;;  %3026 = vmatprep.mubr.f32.mxu1 %v7531_v1  ;;  %v2361_v56 = vld [vmem:[%s6634_s15 + $0x1a88] sm:$0xff]  ;;  %v2432_v57 = vld [vmem:[%s6634_s15 + $0x1cc0] sm:$0xff] }
 0x2d2   : > { %5100 = vmatprep.subr.bf16.mxu0 %v5099_v41  ;;  %v2369_v41 = vld [vmem:[%s6634_s15 + $0x1ac8] sm:$0xff] }
 0x2d3   : > { %5306 = vmatpush1.bf16.msra.mxu1 %v5305_v12  ;;  %v2162_v12 = vld [vmem:[%s6634_s15 + $0x1450] sm:$0xff]  ;;  %v5115_v10 = vpack.c.bf16 %v2369_v41, %v2361_v56  ;;  %v2219_v56 = vld [vmem:[%s6634_s15 + $0x1618] sm:$0xff] }
 0x2d4   : > { %5308 = vmatprep.subr.bf16.mxu1 %v5307_v17  ;;  %v5113_v17 = vpack.c.bf16 %v2352_v50, %v2344_v6  ;;  %v5321_v9 = vpack.c.bf16 %v2162_v12, %v2154_v54  ;;  %v5331_v6 = vpack.c.bf16 %v2211_v58, %v2203_v47  ;;  %v2202_v50 = vld [vmem:[%s6634_s15 + $0x1590] sm:$0xff]  ;;  %v2227_v41 = vld [vmem:[%s6634_s15 + $0x1658] sm:$0xff]  ;;  %v2408_v12 = vld [vmem:[%s6634_s15 + $0x1c00] sm:$0xff] }
 0x2d5   : > { %5102 = vmatpush1.bf16.msra.mxu0 %v5101_v42  ;;  %v2377_v42 = vld [vmem:[%s6634_s15 + $0x1b08] sm:$0xff]  ;;  %v2448_v47 = vld [vmem:[%s6634_s15 + $0x1d40] sm:$0xff] }
 0x2d6   : > { %5104 = vmatprep.subr.bf16.mxu0 %v5103_v0  ;;  %v2385_v0 = vld [vmem:[%s6634_s15 + $0x1b48] sm:$0xff] }
 0x2d7   : > { %5310 = vmatpush1.bf16.msra.mxu1 %v5309_v52  ;;  %v2178_v52 = vld [vmem:[%s6634_s15 + $0x14d0] sm:$0xff]  ;;  %v5119_v45 = vpack.c.bf16 %v2385_v0, %v2377_v42  ;;  %v2235_v42 = vld [vmem:[%s6634_s15 + $0x1698] sm:$0xff] }
 0x2d8   : > { %5312 = vmatprep.subr.bf16.mxu1 %v5311_v60  ;;  %v5117_v60 = vpack.c.bf16 %v2368_v46, %v2360_v16  ;;  %v5325_v2 = vpack.c.bf16 %v2178_v52, %v2170_v33  ;;  %v5335_v16 = vpack.c.bf16 %v2227_v41, %v2219_v56  ;;  %v2218_v46 = vld [vmem:[%s6634_s15 + $0x1610] sm:$0xff]  ;;  %v2243_v0 = vld [vmem:[%s6634_s15 + $0x16d8] sm:$0xff]  ;;  %v2424_v52 = vld [vmem:[%s6634_s15 + $0x1c80] sm:$0xff] }
 0x2d9   : > { %5106 = vmatpush1.bf16.msra.mxu0 %v5105_v39  ;;  %v2393_v39 = vld [vmem:[%s6634_s15 + $0x1b88] sm:$0xff]  ;;  %v2464_v56 = vld [vmem:[%s6634_s15 + $0x1dc0] sm:$0xff] }
 0x2da   : > { %5108 = vmatprep.subr.bf16.mxu0 %v5107_v48  ;;  %v2401_v48 = vld [vmem:[%s6634_s15 + $0x1bc8] sm:$0xff] }
 0x2db   : > { %5314 = vmatpush1.bf16.msra.mxu1 %v5313_v4  ;;  %v2194_v4 = vld [vmem:[%s6634_s15 + $0x1550] sm:$0xff]  ;;  %v5123_v61 = vpack.c.bf16 %v2401_v48, %v2393_v39  ;;  %v2251_v39 = vld [vmem:[%s6634_s15 + $0x1718] sm:$0xff] }
 0x2dc   : > { %5316 = vmatprep.subr.bf16.mxu1 %v5315_v15  ;;  %v5121_v15 = vpack.c.bf16 %v2384_v53, %v2376_v38  ;;  %v5329_v62 = vpack.c.bf16 %v2194_v4, %v2186_v43  ;;  %v5339_v38 = vpack.c.bf16 %v2243_v0, %v2235_v42  ;;  %v2234_v53 = vld [vmem:[%s6634_s15 + $0x1690] sm:$0xff]  ;;  %v2259_v48 = vld [vmem:[%s6634_s15 + $0x1758] sm:$0xff]  ;;  %v2440_v4 = vld [vmem:[%s6634_s15 + $0x1d00] sm:$0xff] }
 0x2dd   : > { %5110 = vmatpush1.bf16.msra.mxu0 %v5109_v3  ;;  %v2409_v3 = vld [vmem:[%s6634_s15 + $0x1c08] sm:$0xff]  ;;  %v2480_v42 = vld [vmem:[%s6634_s15 + $0x1e40] sm:$0xff] }
 0x2de   : > { %5112 = vmatprep.subr.bf16.mxu0 %v5111_v7  ;;  %v2417_v7 = vld [vmem:[%s6634_s15 + $0x1c48] sm:$0xff] }
 0x2df   : > { %5318 = vmatpush1.bf16.msra.mxu1 %v5317_v14  ;;  %v2210_v14 = vld [vmem:[%s6634_s15 + $0x15d0] sm:$0xff]  ;;  %v5127_v54 = vpack.c.bf16 %v2417_v7, %v2409_v3  ;;  %v2267_v3 = vld [vmem:[%s6634_s15 + $0x1798] sm:$0xff] }
 0x2e0   : > { %5320 = vmatprep.subr.bf16.mxu1 %v5319_v11  ;;  %v5125_v11 = vpack.c.bf16 %v2400_v5, %v2392_v59  ;;  %v5333_v20 = vpack.c.bf16 %v2210_v14, %v2202_v50  ;;  %v5343_v59 = vpack.c.bf16 %v2259_v48, %v2251_v39  ;;  %v2250_v5 = vld [vmem:[%s6634_s15 + $0x1710] sm:$0xff]  ;;  %v2275_v7 = vld [vmem:[%s6634_s15 + $0x17d8] sm:$0xff]  ;;  %v2456_v14 = vld [vmem:[%s6634_s15 + $0x1d80] sm:$0xff] }
 0x2e1   : > { %5114 = vmatpush1.bf16.msra.mxu0 %v5113_v17  ;;  %v2425_v17 = vld [vmem:[%s6634_s15 + $0x1c88] sm:$0xff]  ;;  %v2496_v39 = vld [vmem:[%s6634_s15 + $0x1ec0] sm:$0xff] }
 0x2e2   : > { %5116 = vmatprep.subr.bf16.mxu0 %v5115_v10  ;;  %v2433_v10 = vld [vmem:[%s6634_s15 + $0x1cc8] sm:$0xff] }
 0x2e3   : > { %5322 = vmatpush1.bf16.msra.mxu1 %v5321_v9  ;;  %v2226_v9 = vld [vmem:[%s6634_s15 + $0x1650] sm:$0xff]  ;;  %v5131_v33 = vpack.c.bf16 %v2433_v10, %v2425_v17  ;;  %v2283_v17 = vld [vmem:[%s6634_s15 + $0x1818] sm:$0xff] }
 0x2e4   : > { %5324 = vmatprep.subr.bf16.mxu1 %v5323_v63  ;;  %v5129_v63 = vpack.c.bf16 %v2416_v44, %v2408_v12  ;;  %v5337_v19 = vpack.c.bf16 %v2226_v9, %v2218_v46  ;;  %v5347_v12 = vpack.c.bf16 %v2275_v7, %v2267_v3  ;;  %v2266_v44 = vld [vmem:[%s6634_s15 + $0x1790] sm:$0xff]  ;;  %v2291_v10 = vld [vmem:[%s6634_s15 + $0x1858] sm:$0xff]  ;;  %v2472_v9 = vld [vmem:[%s6634_s15 + $0x1e00] sm:$0xff] }
 0x2e5   : > { %5118 = vmatpush1.bf16.msra.mxu0 %v5117_v60  ;;  %v2441_v60 = vld [vmem:[%s6634_s15 + $0x1d08] sm:$0xff]  ;;  %v2512_v3 = vld [vmem:[%s6634_s15 + $0x1f40] sm:$0xff] }
 0x2e6   : > { %5120 = vmatprep.subr.bf16.mxu0 %v5119_v45  ;;  %v2449_v45 = vld [vmem:[%s6634_s15 + $0x1d48] sm:$0xff] }
 0x2e7   : > { %5326 = vmatpush1.bf16.msra.mxu1 %v5325_v2  ;;  %v2242_v2 = vld [vmem:[%s6634_s15 + $0x16d0] sm:$0xff]  ;;  %v5135_v43 = vpack.c.bf16 %v2449_v45, %v2441_v60  ;;  %v2299_v60 = vld [vmem:[%s6634_s15 + $0x1898] sm:$0xff] }
 0x2e8   : > { %5328 = vmatprep.subr.bf16.mxu1 %v5327_v55  ;;  %v5133_v55 = vpack.c.bf16 %v2432_v57, %v2424_v52  ;;  %v5341_v58 = vpack.c.bf16 %v2242_v2, %v2234_v53  ;;  %v5351_v52 = vpack.c.bf16 %v2291_v10, %v2283_v17  ;;  %v2282_v57 = vld [vmem:[%s6634_s15 + $0x1810] sm:$0xff]  ;;  %v2307_v45 = vld [vmem:[%s6634_s15 + $0x18d8] sm:$0xff]  ;;  %v2488_v2 = vld [vmem:[%s6634_s15 + $0x1e80] sm:$0xff] }
 0x2e9   : > { %5122 = vmatpush1.bf16.msra.mxu0 %v5121_v15  ;;  %v2457_v15 = vld [vmem:[%s6634_s15 + $0x1d88] sm:$0xff]  ;;  %v2528_v17 = vld [vmem:[%s6634_s15 + $0x1fc0] sm:$0xff] }
 0x2ea   : > { %5124 = vmatprep.subr.bf16.mxu0 %v5123_v61  ;;  %v2465_v61 = vld [vmem:[%s6634_s15 + $0x1dc8] sm:$0xff] }
 0x2eb   : > { %5330 = vmatpush1.bf16.msra.mxu1 %v5329_v62  ;;  %v2258_v62 = vld [vmem:[%s6634_s15 + $0x1750] sm:$0xff]  ;;  %v5139_v50 = vpack.c.bf16 %v2465_v61, %v2457_v15  ;;  %v2315_v15 = vld [vmem:[%s6634_s15 + $0x1918] sm:$0xff] }
 0x2ec   : > { %5332 = vmatprep.subr.bf16.mxu1 %v5331_v6  ;;  %v5137_v6 = vpack.c.bf16 %v2448_v47, %v2440_v4  ;;  %v5345_v41 = vpack.c.bf16 %v2258_v62, %v2250_v5  ;;  %v5355_v4 = vpack.c.bf16 %v2307_v45, %v2299_v60  ;;  %v2298_v47 = vld [vmem:[%s6634_s15 + $0x1890] sm:$0xff]  ;;  %v2323_v61 = vld [vmem:[%s6634_s15 + $0x1958] sm:$0xff]  ;;  %v2504_v62 = vld [vmem:[%s6634_s15 + $0x1f00] sm:$0xff] }
 0x2ed   : > { %5126 = vmatpush1.bf16.msra.mxu0 %v5125_v11  ;;  %v2473_v11 = vld [vmem:[%s6634_s15 + $0x1e08] sm:$0xff]  ;;  %v2346_v45 = vld [vmem:[%s6634_s15 + $0x1a10] sm:$0xff] }
 0x2ee   : > { %5128 = vmatprep.subr.bf16.mxu0 %v5127_v54  ;;  %v2481_v54 = vld [vmem:[%s6634_s15 + $0x1e48] sm:$0xff] }
 0x2ef   : > { %5334 = vmatpush1.bf16.msra.mxu1 %v5333_v20  ;;  %v2274_v20 = vld [vmem:[%s6634_s15 + $0x17d0] sm:$0xff]  ;;  %v5143_v46 = vpack.c.bf16 %v2481_v54, %v2473_v11  ;;  %v2331_v11 = vld [vmem:[%s6634_s15 + $0x1998] sm:$0xff] }
 0x2f0   : > { %5336 = vmatprep.subr.bf16.mxu1 %v5335_v16  ;;  %v5141_v16 = vpack.c.bf16 %v2464_v56, %v2456_v14  ;;  %v5349_v0 = vpack.c.bf16 %v2274_v20, %v2266_v44  ;;  %v5359_v14 = vpack.c.bf16 %v2323_v61, %v2315_v15  ;;  %v2314_v56 = vld [vmem:[%s6634_s15 + $0x1910] sm:$0xff]  ;;  %v2339_v54 = vld [vmem:[%s6634_s15 + $0x19d8] sm:$0xff]  ;;  %v2520_v20 = vld [vmem:[%s6634_s15 + $0x1f80] sm:$0xff] }
 0x2f1   : > { %5130 = vmatpush1.bf16.msra.mxu0 %v5129_v63  ;;  %v2489_v63 = vld [vmem:[%s6634_s15 + $0x1e88] sm:$0xff]  ;;  %v2387_v61 = vld [vmem:[%s6634_s15 + $0x1b58] sm:$0xff] }
 0x2f2   : > { %5132 = vmatprep.subr.bf16.mxu0 %v5131_v33  ;;  %v2497_v33 = vld [vmem:[%s6634_s15 + $0x1ec8] sm:$0xff] }
 0x2f3   : > { %5338 = vmatpush1.bf16.msra.mxu1 %v5337_v19  ;;  %v2290_v19 = vld [vmem:[%s6634_s15 + $0x1850] sm:$0xff]  ;;  %v5147_v53 = vpack.c.bf16 %v2497_v33, %v2489_v63  ;;  %v2347_v63 = vld [vmem:[%s6634_s15 + $0x1a18] sm:$0xff] }
 0x2f4   : > { %5340 = vmatprep.subr.bf16.mxu1 %v5339_v38  ;;  %v5145_v38 = vpack.c.bf16 %v2480_v42, %v2472_v9  ;;  %v5353_v48 = vpack.c.bf16 %v2290_v19, %v2282_v57  ;;  %v5363_v9 = vpack.c.bf16 %v2339_v54, %v2331_v11  ;;  %v2330_v42 = vld [vmem:[%s6634_s15 + $0x1990] sm:$0xff]  ;;  %v2355_v33 = vld [vmem:[%s6634_s15 + $0x1a58] sm:$0xff]  ;;  %v1532_v54 = vld [vmem:[%s6634_s15 + $0xa0] sm:$0xff] }
 0x2f5   : > { %5134 = vmatpush1.bf16.msra.mxu0 %v5133_v55  ;;  %v2505_v55 = vld [vmem:[%s6634_s15 + $0x1f08] sm:$0xff]  ;;  %v5367_v60 = vpack.c.bf16 %v2355_v33, %v2347_v63  ;;  %v1548_v33 = vld [vmem:[%s6634_s15 + $0x120] sm:$0xff] }
 0x2f6   : > { %5136 = vmatprep.subr.bf16.mxu0 %v5135_v43  ;;  %v2513_v43 = vld [vmem:[%s6634_s15 + $0x1f48] sm:$0xff] }
 0x2f7   : > { %5342 = vmatpush1.bf16.msra.mxu1 %v5341_v58  ;;  %v2306_v58 = vld [vmem:[%s6634_s15 + $0x18d0] sm:$0xff]  ;;  %v5151_v5 = vpack.c.bf16 %v2513_v43, %v2505_v55 }
 0x2f8   : > { %5344 = vmatprep.subr.bf16.mxu1 %v5343_v59  ;;  %v5149_v59 = vpack.c.bf16 %v2496_v39, %v2488_v2  ;;  %v5357_v7 = vpack.c.bf16 %v2306_v58, %v2298_v47  ;;  %v2371_v2 = vld [vmem:[%s6634_s15 + $0x1ad8] sm:$0xff]  ;;  %v2362_v55 = vld [vmem:[%s6634_s15 + $0x1a90] sm:$0xff]  ;;  %v1524_v47 = vld [vmem:[%s6634_s15 + $0x60] sm:$0xff] }
 0x2f9   : > { %5138 = vmatpush1.bf16.msra.mxu0 %v5137_v6  ;;  %v2521_v6 = vld [vmem:[%s6634_s15 + $0x1f88] sm:$0xff]  ;;  %v2370_v43 = vld [vmem:[%s6634_s15 + $0x1ad0] sm:$0xff]  ;;  %v2379_v58 = vld [vmem:[%s6634_s15 + $0x1b18] sm:$0xff] }
 0x2fa   : > { %5140 = vmatprep.subr.bf16.mxu0 %v5139_v50  ;;  %v2529_v50 = vld [vmem:[%s6634_s15 + $0x1fc8] sm:$0xff]  ;;  %v5373_v15 = vpack.c.bf16 %v2370_v43, %v2362_v55  ;;  %v1564_v43 = vld [vmem:[%s6634_s15 + $0x1a0] sm:$0xff] }
 0x2fb   : > { %5346 = vmatpush1.bf16.msra.mxu1 %v5345_v41  ;;  %v2322_v41 = vld [vmem:[%s6634_s15 + $0x1950] sm:$0xff]  ;;  %v5155_v44 = vpack.c.bf16 %v2529_v50, %v2521_v6  ;;  %v2395_v50 = vld [vmem:[%s6634_s15 + $0x1b98] sm:$0xff] }
 0x2fc   : > { %5348 = vmatprep.subr.bf16.mxu1 %v5347_v12  ;;  %v5153_v12 = vpack.c.bf16 %v2512_v3, %v2504_v62  ;;  %v5361_v10 = vpack.c.bf16 %v2322_v41, %v2314_v56  ;;  %v2378_v62 = vld [vmem:[%s6634_s15 + $0x1b10] sm:$0xff]  ;;  %v5375_v41 = vpack.c.bf16 %v2387_v61, %v2379_v58  ;;  %v1581_v58 = vld [vmem:[%s6634_s15 + $0x228] sm:$0xff] }
 0x2fd   : > { %5142 = vmatpush1.bf16.msra.mxu0 %v5141_v16  ;;  %v1517_v16 = vld [vmem:[%s6634_s15 + $0x28] sm:$0xff]  ;;  %v2386_v3 = vld [vmem:[%s6634_s15 + $0x1b50] sm:$0xff] }
 0x2fe   : > { %5144 = vmatprep.subr.bf16.mxu0 %v5143_v46  ;;  %v1525_v46 = vld [vmem:[%s6634_s15 + $0x68] sm:$0xff] }
 0x2ff   : > { %5350 = vmatpush1.bf16.msra.mxu1 %v5349_v0  ;;  %v2338_v0 = vld [vmem:[%s6634_s15 + $0x19d0] sm:$0xff]  ;;  %v5415_v57 = vpack.c.bf16 %v1525_v46, %v1517_v16 }
 0x300   : > { %5352 = vmatprep.subr.bf16.mxu1 %v5351_v52  ;;  %v5157_v52 = vpack.c.bf16 %v2528_v17, %v2520_v20  ;;  %v5365_v19 = vpack.c.bf16 %v2338_v0, %v2330_v42  ;;  %v1549_v20 = vld [vmem:[%s6634_s15 + $0x128] sm:$0xff]  ;;  %v2394_v16 = vld [vmem:[%s6634_s15 + $0x1b90] sm:$0xff]  ;;  %v2411_v42 = vld [vmem:[%s6634_s15 + $0x1c18] sm:$0xff] }
 0x301   : > { %5146 = vmatpush1.bf16.msra.mxu0 %v5145_v38  ;;  %v2354_v38 = vld [vmem:[%s6634_s15 + $0x1a50] sm:$0xff]  ;;  %v1557_v17 = vld [vmem:[%s6634_s15 + $0x168] sm:$0xff]  ;;  %v2419_v0 = vld [vmem:[%s6634_s15 + $0x1c58] sm:$0xff] }
 0x302   : > { %3027 = vmatmul.mubr.f32.vlgmr.msra.gmra.mrb[4].mxu1 %v7527_v13  ;;  %5148 = vmatprep.subr.bf16.mxu0 %v5147_v53  ;;  %v2363_v53 = vld [vmem:[%s6634_s15 + $0x1a98] sm:$0xff]  ;;  %v5369_v39 = vpack.c.bf16 %v2354_v38, %v2346_v45  ;;  %v2402_v46 = vld [vmem:[%s6634_s15 + $0x1bd0] sm:$0xff]  ;;  %v5423_v63 = vpack.c.bf16 %v1557_v17, %v1549_v20  ;;  %v5383_v45 = vpack.c.bf16 %v2419_v0, %v2411_v42  ;;  %v1596_v42 = vld [vmem:[%s6634_s15 + $0x2a0] sm:$0xff] }
 0x303   : > { %5354 = vmatpush1.bf16.msra.mxu1 %v5353_v48  ;;  %v5371_v48 = vpack.c.bf16 %v2371_v2, %v2363_v53  ;;  %v2410_v38 = vld [vmem:[%s6634_s15 + $0x1c10] sm:$0xff]  ;;  %v1604_v0 = vld [vmem:[%s6634_s15 + $0x2e0] sm:$0xff] }
 0x304   : > { %5356 = vmatprep.subr.bf16.mxu1 %v5355_v4  ;;  %v1516_v4 = vld [vmem:[%s6634_s15 + $0x20] sm:$0xff]  ;;  %v2418_v53 = vld [vmem:[%s6634_s15 + $0x1c50] sm:$0xff] }
 0x305   : > { %5150 = vmatpush1.bf16.msra.mxu0 %v5149_v59  ;;  %v1533_v59 = vld [vmem:[%s6634_s15 + $0xa8] sm:$0xff]  ;;  %v5417_v6 = vpack.c.bf16 %v1524_v47, %v1516_v4  ;;  %v1572_v4 = vld [vmem:[%s6634_s15 + $0x1e0] sm:$0xff]  ;;  %v5385_v47 = vpack.c.bf16 %v2418_v53, %v2410_v38  ;;  %v2442_v20 = vld [vmem:[%s6634_s15 + $0x1d10] sm:$0xff] }
 0x306   : > { %5152 = vmatprep.subr.bf16.mxu0 %v5151_v5  ;;  %v1541_v5 = vld [vmem:[%s6634_s15 + $0xe8] sm:$0xff]  ;;  %v2450_v17 = vld [vmem:[%s6634_s15 + $0x1d50] sm:$0xff]  ;;  %v2475_v38 = vld [vmem:[%s6634_s15 + $0x1e18] sm:$0xff] }
 0x307   : > { %5358 = vmatpush1.bf16.msra.mxu1 %v5357_v7  ;;  %v5419_v11 = vpack.c.bf16 %v1541_v5, %v1533_v59  ;;  %v2426_v59 = vld [vmem:[%s6634_s15 + $0x1c90] sm:$0xff]  ;;  %v2483_v53 = vld [vmem:[%s6634_s15 + $0x1e58] sm:$0xff] }
 0x308   : > { %5360 = vmatprep.subr.bf16.mxu1 %v5359_v14  ;;  %v2403_v14 = vld [vmem:[%s6634_s15 + $0x1bd8] sm:$0xff]  ;;  %v2434_v5 = vld [vmem:[%s6634_s15 + $0x1cd0] sm:$0xff] }
 0x309   : > { %5154 = vmatpush1.bf16.msra.mxu0 %v5153_v12  ;;  %v1540_v12 = vld [vmem:[%s6634_s15 + $0xe0] sm:$0xff] }
 0x30a   : > { %5156 = vmatprep.subr.bf16.mxu0 %v5155_v44  ;;  %v5377_v44 = vpack.c.bf16 %v2386_v3, %v2378_v62  ;;  %v5429_v62 = vpack.c.bf16 %v1572_v4, %v1564_v43  ;;  %v2443_v3 = vld [vmem:[%s6634_s15 + $0x1d18] sm:$0xff]  ;;  %v1629_v43 = vld [vmem:[%s6634_s15 + $0x3a8] sm:$0xff] }
 0x30b   : > { %5362 = vmatpush1.bf16.msra.mxu1 %v5361_v10  ;;  %v5379_v10 = vpack.c.bf16 %v2403_v14, %v2395_v50  ;;  %v1580_v14 = vld [vmem:[%s6634_s15 + $0x220] sm:$0xff]  ;;  %v1637_v4 = vld [vmem:[%s6634_s15 + $0x3e8] sm:$0xff] }
 0x30c   : > { %5364 = vmatprep.subr.bf16.mxu1 %v5363_v9  ;;  %v5421_v9 = vpack.c.bf16 %v1540_v12, %v1532_v54  ;;  %v1597_v54 = vld [vmem:[%s6634_s15 + $0x2a8] sm:$0xff] }
 0x30d   : > { %5158 = vmatpush1.bf16.msra.mxu0 %v5157_v52  ;;  %v1556_v52 = vld [vmem:[%s6634_s15 + $0x160] sm:$0xff]  ;;  %v1605_v12 = vld [vmem:[%s6634_s15 + $0x2e8] sm:$0xff] }
 0x30e   : > { %5416 = vmatprep.subr.bf16.mxu0 %v5415_v57  ;;  %v5381_v57 = vpack.c.bf16 %v2402_v46, %v2394_v16  ;;  %v5425_v2 = vpack.c.bf16 %v1556_v52, %v1548_v33  ;;  %v2459_v16 = vld [vmem:[%s6634_s15 + $0x1d98] sm:$0xff]  ;;  %v1613_v33 = vld [vmem:[%s6634_s15 + $0x328] sm:$0xff] }
 0x30f   : > { %5366 = vmatpush1.bf16.msra.mxu1 %v5365_v19  ;;  %v1565_v19 = vld [vmem:[%s6634_s15 + $0x1a8] sm:$0xff]  ;;  %v2467_v46 = vld [vmem:[%s6634_s15 + $0x1dd8] sm:$0xff] }
 0x310   : > { %5368 = vmatprep.subr.bf16.mxu1 %v5367_v60  ;;  %v1573_v60 = vld [vmem:[%s6634_s15 + $0x1e8] sm:$0xff] }
 0x311   : > { %v5427_v55 = vpack.c.bf16 %v1573_v60, %v1565_v19  ;;  %v1621_v52 = vld [vmem:[%s6634_s15 + $0x368] sm:$0xff]  ;;  %v2458_v19 = vld [vmem:[%s6634_s15 + $0x1d90] sm:$0xff] }
 0x312   : > { %v2466_v60 = vld [vmem:[%s6634_s15 + $0x1dd0] sm:$0xff] }
 0x313   : > { %5370 = vmatpush1.bf16.msra.mxu1 %v5369_v39  ;;  %v2427_v39 = vld [vmem:[%s6634_s15 + $0x1c98] sm:$0xff] }
 0x314   : > { %5372 = vmatprep.subr.bf16.mxu1 %v5371_v48  ;;  %v2435_v48 = vld [vmem:[%s6634_s15 + $0x1cd8] sm:$0xff] }
 0x315   : > { %v7671_v7 = vpop.f32.mrb[2].mxu1  ;;  %v5387_v61 = vpack.c.bf16 %v2435_v48, %v2427_v39  ;;  %v1612_v39 = vld [vmem:[%s6634_s15 + $0x320] sm:$0xff] }
 0x316   : > { %v7675_v56 = vpop.f32.mrb[3].mxu1  ;;  %v1620_v48 = vld [vmem:[%s6634_s15 + $0x360] sm:$0xff] }
 0x317   : > { %2813 = vmatprep.mubr.f32.mxu0 %v7675_v56  ;;  %5374 = vmatpush1.bf16.msra.mxu1 %v5373_v15  ;;  %v1589_v15 = vld [vmem:[%s6634_s15 + $0x268] sm:$0xff] }
 0x318   : > { %3097 = vmatprep.mubr.f32.mxu1 %v7675_v56  ;;  %2814 = vmatmul.mubr.f32.vlgmr.msra.gmra.mrb[4].mxu0 %v7671_v7  ;;  %v5431_v50 = vpack.c.bf16 %v1589_v15, %v1581_v58  ;;  %v2474_v58 = vld [vmem:[%s6634_s15 + $0x1e10] sm:$0xff] }
 0x319   : > { %5418 = vmatpush1.bf16.msra.mxu0 %v5417_v6  ;;  %3168 = vmatprep.mubr.f32.mxu0 %v7139_v51  ;;  %v2451_v6 = vld [vmem:[%s6634_s15 + $0x1d58] sm:$0xff]  ;;  %v2482_v15 = vld [vmem:[%s6634_s15 + $0x1e50] sm:$0xff] }
 0x31a   : > { %5376 = vmatprep.subr.bf16.mxu1 %v5375_v41  ;;  %5420 = vmatprep.subr.bf16.mxu0 %v5419_v11  ;;  %v1588_v41 = vld [vmem:[%s6634_s15 + $0x260] sm:$0xff]  ;;  %v5389_v11 = vpack.c.bf16 %v2434_v5, %v2426_v59  ;;  %v2491_v59 = vld [vmem:[%s6634_s15 + $0x1e98] sm:$0xff] }
 0x31b   : > { %5378 = vmatpush1.bf16.msra.mxu1 %v5377_v44  ;;  %v5391_v44 = vpack.c.bf16 %v2451_v6, %v2443_v3  ;;  %v2499_v5 = vld [vmem:[%s6634_s15 + $0x1ed8] sm:$0xff]  ;;  %v1628_v3 = vld [vmem:[%s6634_s15 + $0x3a0] sm:$0xff] }
 0x31c   : > { %5380 = vmatprep.subr.bf16.mxu1 %v5379_v10  ;;  %v5433_v10 = vpack.c.bf16 %v1588_v41, %v1580_v14  ;;  %v1636_v6 = vld [vmem:[%s6634_s15 + $0x3e0] sm:$0xff]  ;;  %v1645_v14 = vld [vmem:[%s6634_s15 + $0x428] sm:$0xff] }
 0x31d   : > { %5422 = vmatpush1.bf16.msra.mxu0 %v5421_v9  ;;  %v5435_v9 = vpack.c.bf16 %v1605_v12, %v1597_v54  ;;  %v1653_v41 = vld [vmem:[%s6634_s15 + $0x468] sm:$0xff]  ;;  %v2490_v54 = vld [vmem:[%s6634_s15 + $0x1e90] sm:$0xff] }
 0x31e   : > { %5424 = vmatprep.subr.bf16.mxu0 %v5423_v63  ;;  %v5393_v63 = vpack.c.bf16 %v2450_v17, %v2442_v20  ;;  %v2498_v12 = vld [vmem:[%s6634_s15 + $0x1ed0] sm:$0xff]  ;;  %v2507_v20 = vld [vmem:[%s6634_s15 + $0x1f18] sm:$0xff] }
 0x31f   : > { %5382 = vmatpush1.bf16.msra.mxu1 %v5381_v57  ;;  %v5395_v57 = vpack.c.bf16 %v2467_v46, %v2459_v16  ;;  %v2515_v17 = vld [vmem:[%s6634_s15 + $0x1f58] sm:$0xff]  ;;  %v1644_v16 = vld [vmem:[%s6634_s15 + $0x420] sm:$0xff] }
 0x320   : > { %5384 = vmatprep.subr.bf16.mxu1 %v5383_v45  ;;  %v5437_v45 = vpack.c.bf16 %v1604_v0, %v1596_v42  ;;  %v1652_v46 = vld [vmem:[%s6634_s15 + $0x460] sm:$0xff]  ;;  %v1661_v42 = vld [vmem:[%s6634_s15 + $0x4a8] sm:$0xff] }
 0x321   : > { %5426 = vmatpush1.bf16.msra.mxu0 %v5425_v2  ;;  %v5439_v2 = vpack.c.bf16 %v1621_v52, %v1613_v33  ;;  %v1669_v0 = vld [vmem:[%s6634_s15 + $0x4e8] sm:$0xff]  ;;  %v2506_v33 = vld [vmem:[%s6634_s15 + $0x1f10] sm:$0xff] }
 0x322   : > { %5428 = vmatprep.subr.bf16.mxu0 %v5427_v55  ;;  %v5397_v55 = vpack.c.bf16 %v2466_v60, %v2458_v19  ;;  %v2514_v52 = vld [vmem:[%s6634_s15 + $0x1f50] sm:$0xff]  ;;  %v2523_v19 = vld [vmem:[%s6634_s15 + $0x1f98] sm:$0xff] }
 0x323   : > { %5386 = vmatpush1.bf16.msra.mxu1 %v5385_v47  ;;  %v5399_v47 = vpack.c.bf16 %v2483_v53, %v2475_v38  ;;  %v2531_v60 = vld [vmem:[%s6634_s15 + $0x1fd8] sm:$0xff]  ;;  %v1660_v38 = vld [vmem:[%s6634_s15 + $0x4a0] sm:$0xff] }
 0x324   : > { %5388 = vmatprep.subr.bf16.mxu1 %v5387_v61  ;;  %v5441_v61 = vpack.c.bf16 %v1620_v48, %v1612_v39  ;;  %v1668_v53 = vld [vmem:[%s6634_s15 + $0x4e0] sm:$0xff]  ;;  %v1677_v39 = vld [vmem:[%s6634_s15 + $0x528] sm:$0xff] }
 0x325   : > { %5430 = vmatpush1.bf16.msra.mxu0 %v5429_v62  ;;  %v5443_v62 = vpack.c.bf16 %v1637_v4, %v1629_v43  ;;  %v1685_v48 = vld [vmem:[%s6634_s15 + $0x568] sm:$0xff]  ;;  %v2522_v43 = vld [vmem:[%s6634_s15 + $0x1f90] sm:$0xff] }
 0x326   : > { %5432 = vmatprep.subr.bf16.mxu0 %v5431_v50  ;;  %v5401_v50 = vpack.c.bf16 %v2482_v15, %v2474_v58  ;;  %v2530_v4 = vld [vmem:[%s6634_s15 + $0x1fd0] sm:$0xff]  ;;  %v1519_v58 = vld [vmem:[%s6634_s15 + $0x38] sm:$0xff] }
 0x327   : > { %5390 = vmatpush1.bf16.msra.mxu1 %v5389_v11  ;;  %v5403_v11 = vpack.c.bf16 %v2499_v5, %v2491_v59  ;;  %v1527_v15 = vld [vmem:[%s6634_s15 + $0x78] sm:$0xff]  ;;  %v1676_v59 = vld [vmem:[%s6634_s15 + $0x520] sm:$0xff] }
 0x328   : > { %5392 = vmatprep.subr.bf16.mxu1 %v5391_v44  ;;  %v5445_v44 = vpack.c.bf16 %v1636_v6, %v1628_v3  ;;  %v1684_v5 = vld [vmem:[%s6634_s15 + $0x560] sm:$0xff]  ;;  %v1693_v3 = vld [vmem:[%s6634_s15 + $0x5a8] sm:$0xff] }
 0x329   : > { %5434 = vmatpush1.bf16.msra.mxu0 %v5433_v10  ;;  %v5447_v10 = vpack.c.bf16 %v1653_v41, %v1645_v14  ;;  %v1701_v6 = vld [vmem:[%s6634_s15 + $0x5e8] sm:$0xff]  ;;  %v1518_v14 = vld [vmem:[%s6634_s15 + $0x30] sm:$0xff] }
 0x32a   : > { %5436 = vmatprep.subr.bf16.mxu0 %v5435_v9  ;;  %v5405_v9 = vpack.c.bf16 %v2498_v12, %v2490_v54  ;;  %v1526_v41 = vld [vmem:[%s6634_s15 + $0x70] sm:$0xff]  ;;  %v1535_v54 = vld [vmem:[%s6634_s15 + $0xb8] sm:$0xff] }
 0x32b   : > { %5394 = vmatpush1.bf16.msra.mxu1 %v5393_v63  ;;  %v5407_v63 = vpack.c.bf16 %v2515_v17, %v2507_v20  ;;  %v1543_v12 = vld [vmem:[%s6634_s15 + $0xf8] sm:$0xff]  ;;  %v1692_v20 = vld [vmem:[%s6634_s15 + $0x5a0] sm:$0xff] }
 0x32c   : > { %5396 = vmatprep.subr.bf16.mxu1 %v5395_v57  ;;  %v5449_v57 = vpack.c.bf16 %v1652_v46, %v1644_v16  ;;  %v1700_v17 = vld [vmem:[%s6634_s15 + $0x5e0] sm:$0xff]  ;;  %v1709_v16 = vld [vmem:[%s6634_s15 + $0x628] sm:$0xff] }
 0x32d   : > { %5438 = vmatpush1.bf16.msra.mxu0 %v5437_v45  ;;  %v5451_v45 = vpack.c.bf16 %v1669_v0, %v1661_v42  ;;  %v1717_v46 = vld [vmem:[%s6634_s15 + $0x668] sm:$0xff]  ;;  %v1534_v42 = vld [vmem:[%s6634_s15 + $0xb0] sm:$0xff] }
 0x32e   : > { %5440 = vmatprep.subr.bf16.mxu0 %v5439_v2  ;;  %v5409_v2 = vpack.c.bf16 %v2514_v52, %v2506_v33  ;;  %v1542_v0 = vld [vmem:[%s6634_s15 + $0xf0] sm:$0xff]  ;;  %v1551_v33 = vld [vmem:[%s6634_s15 + $0x138] sm:$0xff] }
 0x32f   : > { %5398 = vmatpush1.bf16.msra.mxu1 %v5397_v55  ;;  %v5411_v55 = vpack.c.bf16 %v2531_v60, %v2523_v19  ;;  %v1559_v52 = vld [vmem:[%s6634_s15 + $0x178] sm:$0xff]  ;;  %v1708_v19 = vld [vmem:[%s6634_s15 + $0x620] sm:$0xff] }
 0x330   : > { %5400 = vmatprep.subr.bf16.mxu1 %v5399_v47  ;;  %v5453_v47 = vpack.c.bf16 %v1668_v53, %v1660_v38  ;;  %v1716_v60 = vld [vmem:[%s6634_s15 + $0x660] sm:$0xff]  ;;  %v1725_v38 = vld [vmem:[%s6634_s15 + $0x6a8] sm:$0xff] }
 0x331   : > { %5442 = vmatpush1.bf16.msra.mxu0 %v5441_v61  ;;  %v5455_v61 = vpack.c.bf16 %v1685_v48, %v1677_v39  ;;  %v1733_v53 = vld [vmem:[%s6634_s15 + $0x6e8] sm:$0xff]  ;;  %v1550_v39 = vld [vmem:[%s6634_s15 + $0x130] sm:$0xff] }
 0x332   : > { %5444 = vmatprep.subr.bf16.mxu0 %v5443_v62  ;;  %v5413_v62 = vpack.c.bf16 %v2530_v4, %v2522_v43  ;;  %v1558_v48 = vld [vmem:[%s6634_s15 + $0x170] sm:$0xff]  ;;  %v1567_v43 = vld [vmem:[%s6634_s15 + $0x1b8] sm:$0xff] }
 0x333   : > { %5402 = vmatpush1.bf16.msra.mxu1 %v5401_v50  ;;  %v5671_v50 = vpack.c.bf16 %v1527_v15, %v1519_v58  ;;  %v1575_v4 = vld [vmem:[%s6634_s15 + $0x1f8] sm:$0xff]  ;;  %v1732_v58 = vld [vmem:[%s6634_s15 + $0x6e0] sm:$0xff]  ;;  %v5681_v15 = vpack.c.bf16 %v1558_v48, %v1550_v39 }
 0x334   : > { %5404 = vmatprep.subr.bf16.mxu1 %v5403_v11  ;;  %v5457_v11 = vpack.c.bf16 %v1684_v5, %v1676_v59  ;;  %v1749_v59 = vld [vmem:[%s6634_s15 + $0x768] sm:$0xff]  ;;  %v5683_v5 = vpack.c.bf16 %v1575_v4, %v1567_v43  ;;  %v1623_v39 = vld [vmem:[%s6634_s15 + $0x378] sm:$0xff]  ;;  %v1780_v43 = vld [vmem:[%s6634_s15 + $0x860] sm:$0xff] }
 0x335   : > { %5446 = vmatpush1.bf16.msra.mxu0 %v5445_v44  ;;  %v5459_v44 = vpack.c.bf16 %v1701_v6, %v1693_v3  ;;  %v1574_v3 = vld [vmem:[%s6634_s15 + $0x1f0] sm:$0xff] }
 0x336   : > { %5448 = vmatprep.subr.bf16.mxu0 %v5447_v10  ;;  %v5673_v10 = vpack.c.bf16 %v1526_v41, %v1518_v14  ;;  %v1591_v14 = vld [vmem:[%s6634_s15 + $0x278] sm:$0xff] }
 0x337   : > { %5406 = vmatpush1.bf16.msra.mxu1 %v5405_v9  ;;  %v5675_v9 = vpack.c.bf16 %v1543_v12, %v1535_v54  ;;  %v1748_v54 = vld [vmem:[%s6634_s15 + $0x760] sm:$0xff] }
 0x338   : > { %5408 = vmatprep.subr.bf16.mxu1 %v5407_v63  ;;  %v5461_v63 = vpack.c.bf16 %v1700_v17, %v1692_v20  ;;  %v1765_v20 = vld [vmem:[%s6634_s15 + $0x7e8] sm:$0xff] }
 0x339   : > { %5450 = vmatpush1.bf16.msra.mxu0 %v5449_v57  ;;  %v5463_v57 = vpack.c.bf16 %v1717_v46, %v1709_v16  ;;  %v1590_v16 = vld [vmem:[%s6634_s15 + $0x270] sm:$0xff] }
 0x33a   : > { %5452 = vmatprep.subr.bf16.mxu0 %v5451_v45  ;;  %v5677_v45 = vpack.c.bf16 %v1542_v0, %v1534_v42  ;;  %v1607_v42 = vld [vmem:[%s6634_s15 + $0x2f8] sm:$0xff] }
 0x33b   : > { %5410 = vmatpush1.bf16.msra.mxu1 %v5409_v2  ;;  %v5679_v2 = vpack.c.bf16 %v1559_v52, %v1551_v33  ;;  %v1764_v33 = vld [vmem:[%s6634_s15 + $0x7e0] sm:$0xff] }
 0x33c   : > { %5412 = vmatprep.subr.bf16.mxu1 %v5411_v55  ;;  %v5465_v55 = vpack.c.bf16 %v1716_v60, %v1708_v19  ;;  %v1781_v19 = vld [vmem:[%s6634_s15 + $0x868] sm:$0xff] }
 0x33d   : > { %5454 = vmatpush1.bf16.msra.mxu0 %v5453_v47  ;;  %v5467_v47 = vpack.c.bf16 %v1733_v53, %v1725_v38  ;;  %v1606_v38 = vld [vmem:[%s6634_s15 + $0x2f0] sm:$0xff] }
 0x33e   : > { %5456 = vmatprep.subr.bf16.mxu0 %v5455_v61  ;;  %v1741_v61 = vld [vmem:[%s6634_s15 + $0x728] sm:$0xff] }
 0x33f   : > { %5414 = vmatpush1.bf16.msra.mxu1 %v5413_v62  ;;  %v1566_v62 = vld [vmem:[%s6634_s15 + $0x1b0] sm:$0xff]  ;;  %v5471_v41 = vpack.c.bf16 %v1749_v59, %v1741_v61 }
 0x340   : > { %5672 = vmatprep.subr.bf16.mxu1 %v5671_v50  ;;  %v1583_v50 = vld [vmem:[%s6634_s15 + $0x238] sm:$0xff]  ;;  %v5685_v12 = vpack.c.bf16 %v1574_v3, %v1566_v62  ;;  %v1622_v61 = vld [vmem:[%s6634_s15 + $0x370] sm:$0xff] }
 0x341   : > { %5458 = vmatpush1.bf16.msra.mxu0 %v5457_v11  ;;  %v1740_v11 = vld [vmem:[%s6634_s15 + $0x720] sm:$0xff]  ;;  %v5687_v17 = vpack.c.bf16 %v1591_v14, %v1583_v50  ;;  %v1639_v62 = vld [vmem:[%s6634_s15 + $0x3f8] sm:$0xff] }
 0x342   : > { %3098 = vmatmul.mubr.f32.vlgmr.msra.gmra.mrb[4].mxu1 %v7671_v7  ;;  %5460 = vmatprep.subr.bf16.mxu0 %v5459_v44  ;;  %v1757_v44 = vld [vmem:[%s6634_s15 + $0x7a8] sm:$0xff]  ;;  %v5473_v46 = vpack.c.bf16 %v1748_v54, %v1740_v11  ;;  %v1796_v50 = vld [vmem:[%s6634_s15 + $0x8e0] sm:$0xff] }
 0x343   : > { %5674 = vmatpush1.bf16.msra.mxu1 %v5673_v10  ;;  %3452 = vmatprep.mubr.f32.mxu1 %v7139_v51  ;;  %v1724_v51 = vld [vmem:[%s6634_s15 + $0x6a0] sm:$0xff]  ;;  %v1582_v10 = vld [vmem:[%s6634_s15 + $0x230] sm:$0xff]  ;;  %v5475_v0 = vpack.c.bf16 %v1765_v20, %v1757_v44  ;;  %v1813_v11 = vld [vmem:[%s6634_s15 + $0x968] sm:$0xff] }
 0x344   : > { %5676 = vmatprep.subr.bf16.mxu1 %v5675_v9  ;;  %v5469_v6 = vpack.c.bf16 %v1732_v58, %v1724_v51  ;;  %v1599_v9 = vld [vmem:[%s6634_s15 + $0x2b8] sm:$0xff]  ;;  %v5689_v52 = vpack.c.bf16 %v1590_v16, %v1582_v10  ;;  %v1797_v51 = vld [vmem:[%s6634_s15 + $0x8e8] sm:$0xff]  ;;  %v1638_v44 = vld [vmem:[%s6634_s15 + $0x3f0] sm:$0xff] }
 0x345   : > { %5462 = vmatpush1.bf16.msra.mxu0 %v5461_v63  ;;  %v1756_v63 = vld [vmem:[%s6634_s15 + $0x7a0] sm:$0xff]  ;;  %v5691_v60 = vpack.c.bf16 %v1607_v42, %v1599_v9  ;;  %v1655_v10 = vld [vmem:[%s6634_s15 + $0x478] sm:$0xff] }
 0x346   : > { %5464 = vmatprep.subr.bf16.mxu0 %v5463_v57  ;;  %v1773_v57 = vld [vmem:[%s6634_s15 + $0x828] sm:$0xff]  ;;  %v5477_v53 = vpack.c.bf16 %v1764_v33, %v1756_v63  ;;  %v1812_v9 = vld [vmem:[%s6634_s15 + $0x960] sm:$0xff] }
 0x347   : > { %5678 = vmatpush1.bf16.msra.mxu1 %v5677_v45  ;;  %v1598_v45 = vld [vmem:[%s6634_s15 + $0x2b0] sm:$0xff]  ;;  %v5479_v48 = vpack.c.bf16 %v1781_v19, %v1773_v57  ;;  %v1829_v63 = vld [vmem:[%s6634_s15 + $0x9e8] sm:$0xff] }
 0x348   : > { %5680 = vmatprep.subr.bf16.mxu1 %v5679_v2  ;;  %v1615_v2 = vld [vmem:[%s6634_s15 + $0x338] sm:$0xff]  ;;  %v5693_v4 = vpack.c.bf16 %v1606_v38, %v1598_v45  ;;  %v1654_v57 = vld [vmem:[%s6634_s15 + $0x470] sm:$0xff] }
 0x349   : > { %5466 = vmatpush1.bf16.msra.mxu0 %v5465_v55  ;;  %v1772_v55 = vld [vmem:[%s6634_s15 + $0x820] sm:$0xff]  ;;  %v5695_v58 = vpack.c.bf16 %v1623_v39, %v1615_v2  ;;  %v1671_v45 = vld [vmem:[%s6634_s15 + $0x4f8] sm:$0xff] }
 0x34a   : > { %5468 = vmatprep.subr.bf16.mxu0 %v5467_v47  ;;  %v1789_v47 = vld [vmem:[%s6634_s15 + $0x8a8] sm:$0xff]  ;;  %v5481_v59 = vpack.c.bf16 %v1780_v43, %v1772_v55  ;;  %v1828_v2 = vld [vmem:[%s6634_s15 + $0x9e0] sm:$0xff] }
 0x34b   : > { %5682 = vmatpush1.bf16.msra.mxu1 %v5681_v15  ;;  %v1614_v15 = vld [vmem:[%s6634_s15 + $0x330] sm:$0xff]  ;;  %v5483_v3 = vpack.c.bf16 %v1797_v51, %v1789_v47  ;;  %v1845_v55 = vld [vmem:[%s6634_s15 + $0xa68] sm:$0xff] }
 0x34c   : > { %5684 = vmatprep.subr.bf16.mxu1 %v5683_v5  ;;  %v1631_v5 = vld [vmem:[%s6634_s15 + $0x3b8] sm:$0xff]  ;;  %v5697_v14 = vpack.c.bf16 %v1622_v61, %v1614_v15  ;;  %v1670_v47 = vld [vmem:[%s6634_s15 + $0x4f0] sm:$0xff] }
 0x34d   : > { %5470 = vmatpush1.bf16.msra.mxu0 %v5469_v6  ;;  %v1788_v6 = vld [vmem:[%s6634_s15 + $0x8a0] sm:$0xff]  ;;  %v5699_v54 = vpack.c.bf16 %v1639_v62, %v1631_v5  ;;  %v1687_v15 = vld [vmem:[%s6634_s15 + $0x578] sm:$0xff] }
 0x34e   : > { %5472 = vmatprep.subr.bf16.mxu0 %v5471_v41  ;;  %v1805_v41 = vld [vmem:[%s6634_s15 + $0x928] sm:$0xff]  ;;  %v5485_v20 = vpack.c.bf16 %v1796_v50, %v1788_v6  ;;  %v1844_v5 = vld [vmem:[%s6634_s15 + $0xa60] sm:$0xff] }
 0x34f   : > { %5686 = vmatpush1.bf16.msra.mxu1 %v5685_v12  ;;  %v1630_v12 = vld [vmem:[%s6634_s15 + $0x3b0] sm:$0xff]  ;;  %v5487_v16 = vpack.c.bf16 %v1813_v11, %v1805_v41  ;;  %v1861_v6 = vld [vmem:[%s6634_s15 + $0xae8] sm:$0xff] }
 0x350   : > { %5688 = vmatprep.subr.bf16.mxu1 %v5687_v17  ;;  %v1647_v17 = vld [vmem:[%s6634_s15 + $0x438] sm:$0xff]  ;;  %v5701_v42 = vpack.c.bf16 %v1638_v44, %v1630_v12  ;;  %v1686_v41 = vld [vmem:[%s6634_s15 + $0x570] sm:$0xff] }
 0x351   : > { %5474 = vmatpush1.bf16.msra.mxu0 %v5473_v46  ;;  %v1804_v46 = vld [vmem:[%s6634_s15 + $0x920] sm:$0xff]  ;;  %v5703_v33 = vpack.c.bf16 %v1655_v10, %v1647_v17  ;;  %v1703_v12 = vld [vmem:[%s6634_s15 + $0x5f8] sm:$0xff] }
 0x352   : > { %5476 = vmatprep.subr.bf16.mxu0 %v5475_v0  ;;  %v1821_v0 = vld [vmem:[%s6634_s15 + $0x9a8] sm:$0xff]  ;;  %v5489_v19 = vpack.c.bf16 %v1812_v9, %v1804_v46  ;;  %v1860_v17 = vld [vmem:[%s6634_s15 + $0xae0] sm:$0xff] }
 0x353   : > { %5690 = vmatpush1.bf16.msra.mxu1 %v5689_v52  ;;  %v1646_v52 = vld [vmem:[%s6634_s15 + $0x430] sm:$0xff]  ;;  %v5491_v38 = vpack.c.bf16 %v1829_v63, %v1821_v0  ;;  %v1877_v46 = vld [vmem:[%s6634_s15 + $0xb68] sm:$0xff] }
 0x354   : > { %5692 = vmatprep.subr.bf16.mxu1 %v5691_v60  ;;  %v1663_v60 = vld [vmem:[%s6634_s15 + $0x4b8] sm:$0xff]  ;;  %v5705_v39 = vpack.c.bf16 %v1654_v57, %v1646_v52  ;;  %v1702_v0 = vld [vmem:[%s6634_s15 + $0x5f0] sm:$0xff] }
 0x355   : > { %5478 = vmatpush1.bf16.msra.mxu0 %v5477_v53  ;;  %v1820_v53 = vld [vmem:[%s6634_s15 + $0x9a0] sm:$0xff]  ;;  %v5707_v43 = vpack.c.bf16 %v1671_v45, %v1663_v60  ;;  %v1719_v52 = vld [vmem:[%s6634_s15 + $0x678] sm:$0xff] }
 0x356   : > { %5480 = vmatprep.subr.bf16.mxu0 %v5479_v48  ;;  %v1837_v48 = vld [vmem:[%s6634_s15 + $0xa28] sm:$0xff]  ;;  %v5493_v51 = vpack.c.bf16 %v1828_v2, %v1820_v53  ;;  %v1876_v60 = vld [vmem:[%s6634_s15 + $0xb60] sm:$0xff] }
 0x357   : > { %5694 = vmatpush1.bf16.msra.mxu1 %v5693_v4  ;;  %v1662_v4 = vld [vmem:[%s6634_s15 + $0x4b0] sm:$0xff]  ;;  %v5495_v61 = vpack.c.bf16 %v1845_v55, %v1837_v48  ;;  %v1893_v53 = vld [vmem:[%s6634_s15 + $0xbe8] sm:$0xff] }
 0x358   : > { %3169 = vmatmul.mubr.f32.vlgmr.msra.gmra.mrb[6].mxu0 %v7137_v49  ;;  %5696 = vmatprep.subr.bf16.mxu1 %v5695_v58  ;;  %v1679_v58 = vld [vmem:[%s6634_s15 + $0x538] sm:$0xff]  ;;  %v5709_v62 = vpack.c.bf16 %v1670_v47, %v1662_v4  ;;  %v1718_v48 = vld [vmem:[%s6634_s15 + $0x670] sm:$0xff] }
 0x359   : > { %5482 = vmatpush1.bf16.msra.mxu0 %v5481_v59  ;;  %3239 = vmatprep.mubr.f32.mxu0 %v7298_v8  ;;  %v1836_v59 = vld [vmem:[%s6634_s15 + $0xa20] sm:$0xff]  ;;  %v5711_v50 = vpack.c.bf16 %v1687_v15, %v1679_v58  ;;  %v1735_v4 = vld [vmem:[%s6634_s15 + $0x6f8] sm:$0xff] }
 0x35a   : > { %5484 = vmatprep.subr.bf16.mxu0 %v5483_v3  ;;  %v1853_v3 = vld [vmem:[%s6634_s15 + $0xaa8] sm:$0xff]  ;;  %v5497_v11 = vpack.c.bf16 %v1844_v5, %v1836_v59  ;;  %v1892_v58 = vld [vmem:[%s6634_s15 + $0xbe0] sm:$0xff] }
 0x35b   : > { %5698 = vmatpush1.bf16.msra.mxu1 %v5697_v14  ;;  %v1678_v14 = vld [vmem:[%s6634_s15 + $0x530] sm:$0xff]  ;;  %v5499_v44 = vpack.c.bf16 %v1861_v6, %v1853_v3  ;;  %v1909_v59 = vld [vmem:[%s6634_s15 + $0xc68] sm:$0xff] }
 0x35c   : > { %5700 = vmatprep.subr.bf16.mxu1 %v5699_v54  ;;  %v1695_v54 = vld [vmem:[%s6634_s15 + $0x5b8] sm:$0xff]  ;;  %v5713_v10 = vpack.c.bf16 %v1686_v41, %v1678_v14  ;;  %v1734_v3 = vld [vmem:[%s6634_s15 + $0x6f0] sm:$0xff] }
 0x35d   : > { %5486 = vmatpush1.bf16.msra.mxu0 %v5485_v20  ;;  %v1852_v20 = vld [vmem:[%s6634_s15 + $0xaa0] sm:$0xff]  ;;  %v5715_v9 = vpack.c.bf16 %v1703_v12, %v1695_v54  ;;  %v1751_v14 = vld [vmem:[%s6634_s15 + $0x778] sm:$0xff] }
 0x35e   : > { %5488 = vmatprep.subr.bf16.mxu0 %v5487_v16  ;;  %v1869_v16 = vld [vmem:[%s6634_s15 + $0xb28] sm:$0xff]  ;;  %v5501_v63 = vpack.c.bf16 %v1860_v17, %v1852_v20  ;;  %v1908_v54 = vld [vmem:[%s6634_s15 + $0xc60] sm:$0xff] }
 0x35f   : > { %5702 = vmatpush1.bf16.msra.mxu1 %v5701_v42  ;;  %v1694_v42 = vld [vmem:[%s6634_s15 + $0x5b0] sm:$0xff]  ;;  %v5503_v57 = vpack.c.bf16 %v1877_v46, %v1869_v16  ;;  %v1925_v20 = vld [vmem:[%s6634_s15 + $0xce8] sm:$0xff] }
 0x360   : > { %5704 = vmatprep.subr.bf16.mxu1 %v5703_v33  ;;  %v1711_v33 = vld [vmem:[%s6634_s15 + $0x638] sm:$0xff]  ;;  %v5717_v45 = vpack.c.bf16 %v1702_v0, %v1694_v42  ;;  %v1750_v16 = vld [vmem:[%s6634_s15 + $0x770] sm:$0xff] }
 0x361   : > { %5490 = vmatpush1.bf16.msra.mxu0 %v5489_v19  ;;  %v1868_v19 = vld [vmem:[%s6634_s15 + $0xb20] sm:$0xff]  ;;  %v5719_v2 = vpack.c.bf16 %v1719_v52, %v1711_v33  ;;  %v1767_v42 = vld [vmem:[%s6634_s15 + $0x7f8] sm:$0xff] }
 0x362   : > { %5492 = vmatprep.subr.bf16.mxu0 %v5491_v38  ;;  %v1885_v38 = vld [vmem:[%s6634_s15 + $0xba8] sm:$0xff]  ;;  %v5505_v55 = vpack.c.bf16 %v1876_v60, %v1868_v19  ;;  %v1924_v33 = vld [vmem:[%s6634_s15 + $0xce0] sm:$0xff] }
 0x363   : > { %5706 = vmatpush1.bf16.msra.mxu1 %v5705_v39  ;;  %v1710_v39 = vld [vmem:[%s6634_s15 + $0x630] sm:$0xff]  ;;  %v5507_v47 = vpack.c.bf16 %v1893_v53, %v1885_v38  ;;  %v1941_v19 = vld [vmem:[%s6634_s15 + $0xd68] sm:$0xff] }
 0x364   : > { %5708 = vmatprep.subr.bf16.mxu1 %v5707_v43  ;;  %v1727_v43 = vld [vmem:[%s6634_s15 + $0x6b8] sm:$0xff]  ;;  %v5721_v15 = vpack.c.bf16 %v1718_v48, %v1710_v39  ;;  %v1766_v38 = vld [vmem:[%s6634_s15 + $0x7f0] sm:$0xff] }
 0x365   : > { %5494 = vmatpush1.bf16.msra.mxu0 %v5493_v51  ;;  %v1884_v51 = vld [vmem:[%s6634_s15 + $0xba0] sm:$0xff]  ;;  %v5723_v5 = vpack.c.bf16 %v1735_v4, %v1727_v43  ;;  %v1783_v39 = vld [vmem:[%s6634_s15 + $0x878] sm:$0xff] }
 0x366   : > { %5496 = vmatprep.subr.bf16.mxu0 %v5495_v61  ;;  %v1901_v61 = vld [vmem:[%s6634_s15 + $0xc28] sm:$0xff]  ;;  %v5509_v6 = vpack.c.bf16 %v1892_v58, %v1884_v51  ;;  %v1940_v43 = vld [vmem:[%s6634_s15 + $0xd60] sm:$0xff] }
 0x367   : > { %5710 = vmatpush1.bf16.msra.mxu1 %v5709_v62  ;;  %v1726_v62 = vld [vmem:[%s6634_s15 + $0x6b0] sm:$0xff]  ;;  %v5511_v41 = vpack.c.bf16 %v1909_v59, %v1901_v61  ;;  %v1957_v51 = vld [vmem:[%s6634_s15 + $0xde8] sm:$0xff] }
 0x368   : > { %5712 = vmatprep.subr.bf16.mxu1 %v5711_v50  ;;  %v1743_v50 = vld [vmem:[%s6634_s15 + $0x738] sm:$0xff]  ;;  %v5725_v12 = vpack.c.bf16 %v1734_v3, %v1726_v62  ;;  %v1782_v61 = vld [vmem:[%s6634_s15 + $0x870] sm:$0xff] }
 0x369   : > { %5498 = vmatpush1.bf16.msra.mxu0 %v5497_v11  ;;  %v1900_v11 = vld [vmem:[%s6634_s15 + $0xc20] sm:$0xff]  ;;  %v5727_v17 = vpack.c.bf16 %v1751_v14, %v1743_v50  ;;  %v1799_v62 = vld [vmem:[%s6634_s15 + $0x8f8] sm:$0xff] }
 0x36a   : > { %5500 = vmatprep.subr.bf16.mxu0 %v5499_v44  ;;  %v1917_v44 = vld [vmem:[%s6634_s15 + $0xca8] sm:$0xff]  ;;  %v5513_v46 = vpack.c.bf16 %v1908_v54, %v1900_v11  ;;  %v1956_v50 = vld [vmem:[%s6634_s15 + $0xde0] sm:$0xff] }
 0x36b   : > { %5714 = vmatpush1.bf16.msra.mxu1 %v5713_v10  ;;  %v1742_v10 = vld [vmem:[%s6634_s15 + $0x730] sm:$0xff]  ;;  %v5515_v0 = vpack.c.bf16 %v1925_v20, %v1917_v44  ;;  %v1973_v11 = vld [vmem:[%s6634_s15 + $0xe68] sm:$0xff] }
 0x36c   : > { %5716 = vmatprep.subr.bf16.mxu1 %v5715_v9  ;;  %v1759_v9 = vld [vmem:[%s6634_s15 + $0x7b8] sm:$0xff]  ;;  %v5729_v52 = vpack.c.bf16 %v1750_v16, %v1742_v10  ;;  %v1798_v44 = vld [vmem:[%s6634_s15 + $0x8f0] sm:$0xff] }
 0x36d   : > { %5502 = vmatpush1.bf16.msra.mxu0 %v5501_v63  ;;  %v1916_v63 = vld [vmem:[%s6634_s15 + $0xca0] sm:$0xff]  ;;  %v5731_v60 = vpack.c.bf16 %v1767_v42, %v1759_v9  ;;  %v1815_v10 = vld [vmem:[%s6634_s15 + $0x978] sm:$0xff] }
 0x36e   : > { %5504 = vmatprep.subr.bf16.mxu0 %v5503_v57  ;;  %v1933_v57 = vld [vmem:[%s6634_s15 + $0xd28] sm:$0xff]  ;;  %v5517_v53 = vpack.c.bf16 %v1924_v33, %v1916_v63  ;;  %v1972_v9 = vld [vmem:[%s6634_s15 + $0xe60] sm:$0xff] }
 0x36f   : > { %5718 = vmatpush1.bf16.msra.mxu1 %v5717_v45  ;;  %v1758_v45 = vld [vmem:[%s6634_s15 + $0x7b0] sm:$0xff]  ;;  %v5519_v48 = vpack.c.bf16 %v1941_v19, %v1933_v57  ;;  %v1989_v63 = vld [vmem:[%s6634_s15 + $0xee8] sm:$0xff]  ;;  %v1823_v19 = vld [vmem:[%s6634_s15 + $0x9b8] sm:$0xff] }
 0x370   : > { %5720 = vmatprep.subr.bf16.mxu1 %v5719_v2  ;;  %v1775_v2 = vld [vmem:[%s6634_s15 + $0x838] sm:$0xff]  ;;  %v5733_v4 = vpack.c.bf16 %v1766_v38, %v1758_v45  ;;  %v1988_v38 = vld [vmem:[%s6634_s15 + $0xee0] sm:$0xff] }
 0x371   : > { %5506 = vmatpush1.bf16.msra.mxu0 %v5505_v55  ;;  %v1932_v55 = vld [vmem:[%s6634_s15 + $0xd20] sm:$0xff]  ;;  %v5735_v58 = vpack.c.bf16 %v1783_v39, %v1775_v2  ;;  %v1997_v2 = vld [vmem:[%s6634_s15 + $0xf28] sm:$0xff] }
 0x372   : > { %5508 = vmatprep.subr.bf16.mxu0 %v5507_v47  ;;  %v1949_v47 = vld [vmem:[%s6634_s15 + $0xda8] sm:$0xff]  ;;  %v5521_v59 = vpack.c.bf16 %v1940_v43, %v1932_v55  ;;  %v1822_v55 = vld [vmem:[%s6634_s15 + $0x9b0] sm:$0xff] }
 0x373   : > { %5722 = vmatpush1.bf16.msra.mxu1 %v5721_v15  ;;  %v1774_v15 = vld [vmem:[%s6634_s15 + $0x830] sm:$0xff]  ;;  %v5523_v3 = vpack.c.bf16 %v1957_v51, %v1949_v47  ;;  %v2005_v39 = vld [vmem:[%s6634_s15 + $0xf68] sm:$0xff]  ;;  %v1839_v47 = vld [vmem:[%s6634_s15 + $0xa38] sm:$0xff] }
 0x374   : > { %5724 = vmatprep.subr.bf16.mxu1 %v5723_v5  ;;  %v1791_v5 = vld [vmem:[%s6634_s15 + $0x8b8] sm:$0xff]  ;;  %v5737_v14 = vpack.c.bf16 %v1782_v61, %v1774_v15  ;;  %v1830_v43 = vld [vmem:[%s6634_s15 + $0x9f0] sm:$0xff]  ;;  %v1996_v15 = vld [vmem:[%s6634_s15 + $0xf20] sm:$0xff] }
 0x375   : > { %5510 = vmatpush1.bf16.msra.mxu0 %v5509_v6  ;;  %v1948_v6 = vld [vmem:[%s6634_s15 + $0xda0] sm:$0xff]  ;;  %v5739_v54 = vpack.c.bf16 %v1799_v62, %v1791_v5  ;;  %v1847_v51 = vld [vmem:[%s6634_s15 + $0xa78] sm:$0xff]  ;;  %v2013_v5 = vld [vmem:[%s6634_s15 + $0xfa8] sm:$0xff] }
 0x376   : > { %5512 = vmatprep.subr.bf16.mxu0 %v5511_v41  ;;  %v1965_v41 = vld [vmem:[%s6634_s15 + $0xe28] sm:$0xff]  ;;  %v5525_v20 = vpack.c.bf16 %v1956_v50, %v1948_v6  ;;  %v2004_v61 = vld [vmem:[%s6634_s15 + $0xf60] sm:$0xff]  ;;  %v1838_v6 = vld [vmem:[%s6634_s15 + $0xa30] sm:$0xff] }
 0x377   : > { %5726 = vmatpush1.bf16.msra.mxu1 %v5725_v12  ;;  %v1790_v12 = vld [vmem:[%s6634_s15 + $0x8b0] sm:$0xff]  ;;  %v5527_v16 = vpack.c.bf16 %v1973_v11, %v1965_v41  ;;  %v2021_v62 = vld [vmem:[%s6634_s15 + $0xfe8] sm:$0xff]  ;;  %v1855_v41 = vld [vmem:[%s6634_s15 + $0xab8] sm:$0xff] }
 0x378   : > { %5728 = vmatprep.subr.bf16.mxu1 %v5727_v17  ;;  %v1807_v17 = vld [vmem:[%s6634_s15 + $0x938] sm:$0xff]  ;;  %v5741_v42 = vpack.c.bf16 %v1798_v44, %v1790_v12  ;;  %v1846_v50 = vld [vmem:[%s6634_s15 + $0xa70] sm:$0xff]  ;;  %v2012_v12 = vld [vmem:[%s6634_s15 + $0xfa0] sm:$0xff] }
 0x379   : > { %5514 = vmatpush1.bf16.msra.mxu0 %v5513_v46  ;;  %v1964_v46 = vld [vmem:[%s6634_s15 + $0xe20] sm:$0xff]  ;;  %v5743_v33 = vpack.c.bf16 %v1815_v10, %v1807_v17  ;;  %v1863_v11 = vld [vmem:[%s6634_s15 + $0xaf8] sm:$0xff]  ;;  %v2029_v17 = vld [vmem:[%s6634_s15 + $0x1028] sm:$0xff] }
 0x37a   : > { %5516 = vmatprep.subr.bf16.mxu0 %v5515_v0  ;;  %v1981_v0 = vld [vmem:[%s6634_s15 + $0xea8] sm:$0xff]  ;;  %v5529_v57 = vpack.c.bf16 %v1972_v9, %v1964_v46  ;;  %v2020_v44 = vld [vmem:[%s6634_s15 + $0xfe0] sm:$0xff]  ;;  %v1854_v46 = vld [vmem:[%s6634_s15 + $0xab0] sm:$0xff] }
 0x37b   : > { %5730 = vmatpush1.bf16.msra.mxu1 %v5729_v52  ;;  %v1806_v52 = vld [vmem:[%s6634_s15 + $0x930] sm:$0xff]  ;;  %v5531_v45 = vpack.c.bf16 %v1989_v63, %v1981_v0  ;;  %v2037_v10 = vld [vmem:[%s6634_s15 + $0x1068] sm:$0xff]  ;;  %v1871_v0 = vld [vmem:[%s6634_s15 + $0xb38] sm:$0xff] }
 0x37c   : > { %5732 = vmatprep.subr.bf16.mxu1 %v5731_v60  ;;  %v1831_v60 = vld [vmem:[%s6634_s15 + $0x9f8] sm:$0xff]  ;;  %v1862_v9 = vld [vmem:[%s6634_s15 + $0xaf0] sm:$0xff] }
 0x37d   : > { %5518 = vmatpush1.bf16.msra.mxu0 %v5517_v53  ;;  %v1879_v63 = vld [vmem:[%s6634_s15 + $0xb78] sm:$0xff] }
 0x37e   : > { %5520 = vmatprep.subr.bf16.mxu0 %v5519_v48  ;;  %v5747_v48 = vpack.c.bf16 %v1831_v60, %v1823_v19  ;;  %v2045_v19 = vld [vmem:[%s6634_s15 + $0x10a8] sm:$0xff] }
 0x37f   : > { %5734 = vmatpush1.bf16.msra.mxu1 %v5733_v4  ;;  %v2053_v60 = vld [vmem:[%s6634_s15 + $0x10e8] sm:$0xff] }
 0x380   : > { %5736 = vmatprep.subr.bf16.mxu1 %v5735_v58  ;;  %v5535_v58 = vpack.c.bf16 %v2005_v39, %v1997_v2  ;;  %v1887_v2 = vld [vmem:[%s6634_s15 + $0xbb8] sm:$0xff] }
 0x381   : > { %5522 = vmatpush1.bf16.msra.mxu0 %v5521_v59  ;;  %v5749_v59 = vpack.c.bf16 %v1830_v43, %v1822_v55  ;;  %v1895_v39 = vld [vmem:[%s6634_s15 + $0xbf8] sm:$0xff]  ;;  %v2044_v55 = vld [vmem:[%s6634_s15 + $0x10a0] sm:$0xff] }
 0x382   : > { %3453 = vmatmul.mubr.f32.vlgmr.msra.gmra.mrb[6].mxu1 %v7137_v49  ;;  %5524 = vmatprep.subr.bf16.mxu0 %v5523_v3  ;;  %v1814_v49 = vld [vmem:[%s6634_s15 + $0x970] sm:$0xff]  ;;  %v5751_v3 = vpack.c.bf16 %v1847_v51, %v1839_v47  ;;  %v2052_v43 = vld [vmem:[%s6634_s15 + $0x10e0] sm:$0xff]  ;;  %v2061_v47 = vld [vmem:[%s6634_s15 + $0x1128] sm:$0xff] }
 0x383   : > { %5738 = vmatpush1.bf16.msra.mxu1 %v5737_v14  ;;  %3523 = vmatprep.mubr.f32.mxu1 %v7298_v8  ;;  %v1980_v8 = vld [vmem:[%s6634_s15 + $0xea0] sm:$0xff]  ;;  %v5745_v53 = vpack.c.bf16 %v1814_v49, %v1806_v52  ;;  %v5537_v14 = vpack.c.bf16 %v2004_v61, %v1996_v15  ;;  %v2069_v51 = vld [vmem:[%s6634_s15 + $0x1168] sm:$0xff]  ;;  %v1886_v15 = vld [vmem:[%s6634_s15 + $0xbb0] sm:$0xff] }
 0x384   : > { %5740 = vmatprep.subr.bf16.mxu1 %v5739_v54  ;;  %v5533_v4 = vpack.c.bf16 %v1988_v38, %v1980_v8  ;;  %v5539_v54 = vpack.c.bf16 %v2021_v62, %v2013_v5  ;;  %v2028_v52 = vld [vmem:[%s6634_s15 + $0x1020] sm:$0xff]  ;;  %v1870_v8 = vld [vmem:[%s6634_s15 + $0xb30] sm:$0xff]  ;;  %v1903_v5 = vld [vmem:[%s6634_s15 + $0xc38] sm:$0xff] }
 0x385   : > { %5526 = vmatpush1.bf16.msra.mxu0 %v5525_v20  ;;  %v5753_v20 = vpack.c.bf16 %v1846_v50, %v1838_v6  ;;  %v2036_v49 = vld [vmem:[%s6634_s15 + $0x1060] sm:$0xff]  ;;  %v1878_v38 = vld [vmem:[%s6634_s15 + $0xb70] sm:$0xff]  ;;  %v1911_v62 = vld [vmem:[%s6634_s15 + $0xc78] sm:$0xff] }
 0x386   : > { %5528 = vmatprep.subr.bf16.mxu0 %v5527_v16  ;;  %v5755_v16 = vpack.c.bf16 %v1863_v11, %v1855_v41  ;;  %v1894_v61 = vld [vmem:[%s6634_s15 + $0xbf0] sm:$0xff]  ;;  %v2060_v6 = vld [vmem:[%s6634_s15 + $0x1120] sm:$0xff]  ;;  %v2077_v41 = vld [vmem:[%s6634_s15 + $0x11a8] sm:$0xff] }
 0x387   : > { %5742 = vmatpush1.bf16.msra.mxu1 %v5741_v42  ;;  %v5541_v42 = vpack.c.bf16 %v2020_v44, %v2012_v12  ;;  %v2068_v50 = vld [vmem:[%s6634_s15 + $0x1160] sm:$0xff]  ;;  %v2085_v11 = vld [vmem:[%s6634_s15 + $0x11e8] sm:$0xff]  ;;  %v1902_v12 = vld [vmem:[%s6634_s15 + $0xc30] sm:$0xff] }
 0x388   : > { %5744 = vmatprep.subr.bf16.mxu1 %v5743_v33  ;;  %v5543_v33 = vpack.c.bf16 %v2037_v10, %v2029_v17  ;;  %v1910_v44 = vld [vmem:[%s6634_s15 + $0xc70] sm:$0xff]  ;;  %v1919_v17 = vld [vmem:[%s6634_s15 + $0xcb8] sm:$0xff] }
 0x389   : > { %5530 = vmatpush1.bf16.msra.mxu0 %v5529_v57  ;;  %v5757_v57 = vpack.c.bf16 %v1862_v9, %v1854_v46  ;;  %v1927_v10 = vld [vmem:[%s6634_s15 + $0xcf8] sm:$0xff]  ;;  %v2076_v46 = vld [vmem:[%s6634_s15 + $0x11a0] sm:$0xff] }
 0x38a   : > { %5532 = vmatprep.subr.bf16.mxu0 %v5531_v45  ;;  %v5759_v45 = vpack.c.bf16 %v1879_v63, %v1871_v0  ;;  %v2084_v9 = vld [vmem:[%s6634_s15 + $0x11e0] sm:$0xff]  ;;  %v2093_v0 = vld [vmem:[%s6634_s15 + $0x1228] sm:$0xff] }
 0x38b   : > { %5746 = vmatpush1.bf16.msra.mxu1 %v5745_v53  ;;  %v5545_v53 = vpack.c.bf16 %v2036_v49, %v2028_v52  ;;  %v2101_v63 = vld [vmem:[%s6634_s15 + $0x1268] sm:$0xff]  ;;  %v1918_v52 = vld [vmem:[%s6634_s15 + $0xcb0] sm:$0xff] }
 0x38c   : > { %5748 = vmatprep.subr.bf16.mxu1 %v5747_v48  ;;  %v5547_v48 = vpack.c.bf16 %v2053_v60, %v2045_v19  ;;  %v1926_v49 = vld [vmem:[%s6634_s15 + $0xcf0] sm:$0xff]  ;;  %v1935_v19 = vld [vmem:[%s6634_s15 + $0xd38] sm:$0xff] }
 0x38d   : > { %5534 = vmatpush1.bf16.msra.mxu0 %v5533_v4  ;;  %v5761_v4 = vpack.c.bf16 %v1878_v38, %v1870_v8  ;;  %v1943_v60 = vld [vmem:[%s6634_s15 + $0xd78] sm:$0xff]  ;;  %v2092_v8 = vld [vmem:[%s6634_s15 + $0x1220] sm:$0xff] }
 0x38e   : > { %5536 = vmatprep.subr.bf16.mxu0 %v5535_v58  ;;  %v5763_v58 = vpack.c.bf16 %v1895_v39, %v1887_v2  ;;  %v2100_v38 = vld [vmem:[%s6634_s15 + $0x1260] sm:$0xff]  ;;  %v2109_v2 = vld [vmem:[%s6634_s15 + $0x12a8] sm:$0xff] }
 0x38f   : > { %5750 = vmatpush1.bf16.msra.mxu1 %v5749_v59  ;;  %v5549_v59 = vpack.c.bf16 %v2052_v43, %v2044_v55  ;;  %v2117_v39 = vld [vmem:[%s6634_s15 + $0x12e8] sm:$0xff]  ;;  %v1934_v55 = vld [vmem:[%s6634_s15 + $0xd30] sm:$0xff] }
 0x390   : > { %5752 = vmatprep.subr.bf16.mxu1 %v5751_v3  ;;  %v5551_v3 = vpack.c.bf16 %v2069_v51, %v2061_v47  ;;  %v1942_v43 = vld [vmem:[%s6634_s15 + $0xd70] sm:$0xff]  ;;  %v1951_v47 = vld [vmem:[%s6634_s15 + $0xdb8] sm:$0xff] }
 0x391   : > { %5538 = vmatpush1.bf16.msra.mxu0 %v5537_v14  ;;  %v5765_v14 = vpack.c.bf16 %v1894_v61, %v1886_v15  ;;  %v1959_v51 = vld [vmem:[%s6634_s15 + $0xdf8] sm:$0xff]  ;;  %v2108_v15 = vld [vmem:[%s6634_s15 + $0x12a0] sm:$0xff] }
 0x392   : > { %5540 = vmatprep.subr.bf16.mxu0 %v5539_v54  ;;  %v5767_v54 = vpack.c.bf16 %v1911_v62, %v1903_v5  ;;  %v2116_v61 = vld [vmem:[%s6634_s15 + $0x12e0] sm:$0xff]  ;;  %v2125_v5 = vld [vmem:[%s6634_s15 + $0x1328] sm:$0xff] }
 0x393   : > { %5754 = vmatpush1.bf16.msra.mxu1 %v5753_v20  ;;  %v5553_v20 = vpack.c.bf16 %v2068_v50, %v2060_v6  ;;  %v2133_v62 = vld [vmem:[%s6634_s15 + $0x1368] sm:$0xff]  ;;  %v1950_v6 = vld [vmem:[%s6634_s15 + $0xdb0] sm:$0xff] }
 0x394   : > { %5756 = vmatprep.subr.bf16.mxu1 %v5755_v16  ;;  %v5555_v16 = vpack.c.bf16 %v2085_v11, %v2077_v41  ;;  %v1958_v50 = vld [vmem:[%s6634_s15 + $0xdf0] sm:$0xff]  ;;  %v1967_v41 = vld [vmem:[%s6634_s15 + $0xe38] sm:$0xff] }
 0x395   : > { %5542 = vmatpush1.bf16.msra.mxu0 %v5541_v42  ;;  %v5769_v42 = vpack.c.bf16 %v1910_v44, %v1902_v12  ;;  %v1975_v11 = vld [vmem:[%s6634_s15 + $0xe78] sm:$0xff]  ;;  %v2124_v12 = vld [vmem:[%s6634_s15 + $0x1320] sm:$0xff] }
 0x396   : > { %5544 = vmatprep.subr.bf16.mxu0 %v5543_v33  ;;  %v5771_v33 = vpack.c.bf16 %v1927_v10, %v1919_v17  ;;  %v2132_v44 = vld [vmem:[%s6634_s15 + $0x1360] sm:$0xff]  ;;  %v2141_v17 = vld [vmem:[%s6634_s15 + $0x13a8] sm:$0xff] }
 0x397   : > { %5758 = vmatpush1.bf16.msra.mxu1 %v5757_v57  ;;  %v5557_v57 = vpack.c.bf16 %v2084_v9, %v2076_v46  ;;  %v2149_v10 = vld [vmem:[%s6634_s15 + $0x13e8] sm:$0xff]  ;;  %v1966_v46 = vld [vmem:[%s6634_s15 + $0xe30] sm:$0xff] }
 0x398   : > { %3240 = vmatmul.mubr.f32.vlgmr.msra.gmra.mrb[6].mxu0 %v7296_v37  ;;  %5760 = vmatprep.subr.bf16.mxu1 %v5759_v45  ;;  %v5559_v45 = vpack.c.bf16 %v2101_v63, %v2093_v0  ;;  %v1974_v9 = vld [vmem:[%s6634_s15 + $0xe70] sm:$0xff]  ;;  %v1983_v0 = vld [vmem:[%s6634_s15 + $0xeb8] sm:$0xff] }
 0x399   : > { %5546 = vmatpush1.bf16.msra.mxu0 %v5545_v53  ;;  %3310 = vmatprep.mubr.f32.mxu0 %v7531_v1  ;;  %v5773_v53 = vpack.c.bf16 %v1926_v49, %v1918_v52  ;;  %v1991_v63 = vld [vmem:[%s6634_s15 + $0xef8] sm:$0xff]  ;;  %v2140_v52 = vld [vmem:[%s6634_s15 + $0x13a0] sm:$0xff] }
 0x39a   : > { %5548 = vmatprep.subr.bf16.mxu0 %v5547_v48  ;;  %v5775_v48 = vpack.c.bf16 %v1943_v60, %v1935_v19  ;;  %v2148_v49 = vld [vmem:[%s6634_s15 + $0x13e0] sm:$0xff]  ;;  %v2157_v19 = vld [vmem:[%s6634_s15 + $0x1428] sm:$0xff] }
 0x39b   : > { %5762 = vmatpush1.bf16.msra.mxu1 %v5761_v4  ;;  %v5561_v4 = vpack.c.bf16 %v2100_v38, %v2092_v8  ;;  %v2165_v60 = vld [vmem:[%s6634_s15 + $0x1468] sm:$0xff]  ;;  %v1982_v8 = vld [vmem:[%s6634_s15 + $0xeb0] sm:$0xff] }
 0x39c   : > { %5764 = vmatprep.subr.bf16.mxu1 %v5763_v58  ;;  %v5563_v58 = vpack.c.bf16 %v2117_v39, %v2109_v2  ;;  %v1990_v38 = vld [vmem:[%s6634_s15 + $0xef0] sm:$0xff]  ;;  %v1999_v2 = vld [vmem:[%s6634_s15 + $0xf38] sm:$0xff] }
 0x39d   : > { %5550 = vmatpush1.bf16.msra.mxu0 %v5549_v59  ;;  %v5777_v59 = vpack.c.bf16 %v1942_v43, %v1934_v55  ;;  %v2007_v39 = vld [vmem:[%s6634_s15 + $0xf78] sm:$0xff]  ;;  %v2156_v55 = vld [vmem:[%s6634_s15 + $0x1420] sm:$0xff] }
 0x39e   : > { %5552 = vmatprep.subr.bf16.mxu0 %v5551_v3  ;;  %v5779_v3 = vpack.c.bf16 %v1959_v51, %v1951_v47  ;;  %v2164_v43 = vld [vmem:[%s6634_s15 + $0x1460] sm:$0xff]  ;;  %v2173_v47 = vld [vmem:[%s6634_s15 + $0x14a8] sm:$0xff] }
 0x39f   : > { %5766 = vmatpush1.bf16.msra.mxu1 %v5765_v14  ;;  %v5565_v14 = vpack.c.bf16 %v2116_v61, %v2108_v15  ;;  %v2181_v51 = vld [vmem:[%s6634_s15 + $0x14e8] sm:$0xff]  ;;  %v1998_v15 = vld [vmem:[%s6634_s15 + $0xf30] sm:$0xff] }
 0x3a0   : > { %5768 = vmatprep.subr.bf16.mxu1 %v5767_v54  ;;  %v5567_v54 = vpack.c.bf16 %v2133_v62, %v2125_v5  ;;  %v2006_v61 = vld [vmem:[%s6634_s15 + $0xf70] sm:$0xff]  ;;  %v2015_v5 = vld [vmem:[%s6634_s15 + $0xfb8] sm:$0xff] }
 0x3a1   : > { %5554 = vmatpush1.bf16.msra.mxu0 %v5553_v20  ;;  %v5781_v20 = vpack.c.bf16 %v1958_v50, %v1950_v6  ;;  %v2023_v62 = vld [vmem:[%s6634_s15 + $0xff8] sm:$0xff]  ;;  %v2172_v6 = vld [vmem:[%s6634_s15 + $0x14a0] sm:$0xff] }
 0x3a2   : > { %5556 = vmatprep.subr.bf16.mxu0 %v5555_v16  ;;  %v5783_v16 = vpack.c.bf16 %v1975_v11, %v1967_v41  ;;  %v2180_v50 = vld [vmem:[%s6634_s15 + $0x14e0] sm:$0xff]  ;;  %v2189_v41 = vld [vmem:[%s6634_s15 + $0x1528] sm:$0xff] }
 0x3a3   : > { %5770 = vmatpush1.bf16.msra.mxu1 %v5769_v42  ;;  %v5569_v42 = vpack.c.bf16 %v2132_v44, %v2124_v12  ;;  %v2197_v11 = vld [vmem:[%s6634_s15 + $0x1568] sm:$0xff]  ;;  %v2014_v12 = vld [vmem:[%s6634_s15 + $0xfb0] sm:$0xff] }
 0x3a4   : > { %5772 = vmatprep.subr.bf16.mxu1 %v5771_v33  ;;  %v5571_v33 = vpack.c.bf16 %v2149_v10, %v2141_v17  ;;  %v2022_v44 = vld [vmem:[%s6634_s15 + $0xff0] sm:$0xff]  ;;  %v2031_v17 = vld [vmem:[%s6634_s15 + $0x1038] sm:$0xff] }
 0x3a5   : > { %5558 = vmatpush1.bf16.msra.mxu0 %v5557_v57  ;;  %v5785_v57 = vpack.c.bf16 %v1974_v9, %v1966_v46  ;;  %v2039_v10 = vld [vmem:[%s6634_s15 + $0x1078] sm:$0xff]  ;;  %v2188_v46 = vld [vmem:[%s6634_s15 + $0x1520] sm:$0xff] }
 0x3a6   : > { %5560 = vmatprep.subr.bf16.mxu0 %v5559_v45  ;;  %v5787_v45 = vpack.c.bf16 %v1991_v63, %v1983_v0  ;;  %v2196_v9 = vld [vmem:[%s6634_s15 + $0x1560] sm:$0xff]  ;;  %v2205_v0 = vld [vmem:[%s6634_s15 + $0x15a8] sm:$0xff] }
 0x3a7   : > { %5774 = vmatpush1.bf16.msra.mxu1 %v5773_v53  ;;  %v5573_v53 = vpack.c.bf16 %v2148_v49, %v2140_v52  ;;  %v2213_v63 = vld [vmem:[%s6634_s15 + $0x15e8] sm:$0xff]  ;;  %v2030_v52 = vld [vmem:[%s6634_s15 + $0x1030] sm:$0xff] }
 0x3a8   : > { %5776 = vmatprep.subr.bf16.mxu1 %v5775_v48  ;;  %v5575_v48 = vpack.c.bf16 %v2165_v60, %v2157_v19  ;;  %v2038_v49 = vld [vmem:[%s6634_s15 + $0x1070] sm:$0xff]  ;;  %v2047_v19 = vld [vmem:[%s6634_s15 + $0x10b8] sm:$0xff] }
 0x3a9   : > { %5562 = vmatpush1.bf16.msra.mxu0 %v5561_v4  ;;  %v5789_v4 = vpack.c.bf16 %v1990_v38, %v1982_v8  ;;  %v2055_v60 = vld [vmem:[%s6634_s15 + $0x10f8] sm:$0xff]  ;;  %v2204_v8 = vld [vmem:[%s6634_s15 + $0x15a0] sm:$0xff] }
 0x3aa   : > { %5564 = vmatprep.subr.bf16.mxu0 %v5563_v58  ;;  %v5791_v58 = vpack.c.bf16 %v2007_v39, %v1999_v2  ;;  %v2212_v38 = vld [vmem:[%s6634_s15 + $0x15e0] sm:$0xff]  ;;  %v2221_v2 = vld [vmem:[%s6634_s15 + $0x1628] sm:$0xff] }
 0x3ab   : > { %5778 = vmatpush1.bf16.msra.mxu1 %v5777_v59  ;;  %v5577_v59 = vpack.c.bf16 %v2164_v43, %v2156_v55  ;;  %v2229_v39 = vld [vmem:[%s6634_s15 + $0x1668] sm:$0xff]  ;;  %v2046_v55 = vld [vmem:[%s6634_s15 + $0x10b0] sm:$0xff] }
 0x3ac   : > { %5780 = vmatprep.subr.bf16.mxu1 %v5779_v3  ;;  %v5579_v3 = vpack.c.bf16 %v2181_v51, %v2173_v47  ;;  %v2054_v43 = vld [vmem:[%s6634_s15 + $0x10f0] sm:$0xff]  ;;  %v2063_v47 = vld [vmem:[%s6634_s15 + $0x1138] sm:$0xff] }
 0x3ad   : > { %5566 = vmatpush1.bf16.msra.mxu0 %v5565_v14  ;;  %v5793_v14 = vpack.c.bf16 %v2006_v61, %v1998_v15  ;;  %v2071_v51 = vld [vmem:[%s6634_s15 + $0x1178] sm:$0xff]  ;;  %v2220_v15 = vld [vmem:[%s6634_s15 + $0x1620] sm:$0xff] }
 0x3ae   : > { %5568 = vmatprep.subr.bf16.mxu0 %v5567_v54  ;;  %v5795_v54 = vpack.c.bf16 %v2023_v62, %v2015_v5  ;;  %v2228_v61 = vld [vmem:[%s6634_s15 + $0x1660] sm:$0xff]  ;;  %v2237_v5 = vld [vmem:[%s6634_s15 + $0x16a8] sm:$0xff] }
 0x3af   : > { %5782 = vmatpush1.bf16.msra.mxu1 %v5781_v20  ;;  %v5581_v20 = vpack.c.bf16 %v2180_v50, %v2172_v6  ;;  %v2245_v62 = vld [vmem:[%s6634_s15 + $0x16e8] sm:$0xff]  ;;  %v2062_v6 = vld [vmem:[%s6634_s15 + $0x1130] sm:$0xff]  ;;  %v5593_v50 = vpack.c.bf16 %v2228_v61, %v2220_v15  ;;  %v2127_v61 = vld [vmem:[%s6634_s15 + $0x1338] sm:$0xff] }
 0x3b0   : > { %5784 = vmatprep.subr.bf16.mxu1 %v5783_v16  ;;  %v5583_v16 = vpack.c.bf16 %v2197_v11, %v2189_v41  ;;  %v2087_v41 = vld [vmem:[%s6634_s15 + $0x11f8] sm:$0xff]  ;;  %v5595_v11 = vpack.c.bf16 %v2245_v62, %v2237_v5  ;;  %v2284_v62 = vld [vmem:[%s6634_s15 + $0x1820] sm:$0xff] }
 0x3b1   : > { %5570 = vmatpush1.bf16.msra.mxu0 %v5569_v42  ;;  %v5797_v42 = vpack.c.bf16 %v2022_v44, %v2014_v12  ;;  %v2253_v44 = vld [vmem:[%s6634_s15 + $0x1728] sm:$0xff] }
 0x3b2   : > { %5572 = vmatprep.subr.bf16.mxu0 %v5571_v33  ;;  %v5799_v33 = vpack.c.bf16 %v2039_v10, %v2031_v17  ;;  %v2078_v10 = vld [vmem:[%s6634_s15 + $0x11b0] sm:$0xff] }
 0x3b3   : > { %5786 = vmatpush1.bf16.msra.mxu1 %v5785_v57  ;;  %v5585_v57 = vpack.c.bf16 %v2196_v9, %v2188_v46  ;;  %v2095_v9 = vld [vmem:[%s6634_s15 + $0x1238] sm:$0xff] }
 0x3b4   : > { %5788 = vmatprep.subr.bf16.mxu1 %v5787_v45  ;;  %v5587_v45 = vpack.c.bf16 %v2213_v63, %v2205_v0  ;;  %v2252_v63 = vld [vmem:[%s6634_s15 + $0x1720] sm:$0xff] }
 0x3b5   : > { %5574 = vmatpush1.bf16.msra.mxu0 %v5573_v53  ;;  %v5801_v53 = vpack.c.bf16 %v2038_v49, %v2030_v52  ;;  %v2269_v49 = vld [vmem:[%s6634_s15 + $0x17a8] sm:$0xff] }
 0x3b6   : > { %5576 = vmatprep.subr.bf16.mxu0 %v5575_v48  ;;  %v5803_v48 = vpack.c.bf16 %v2055_v60, %v2047_v19  ;;  %v2094_v60 = vld [vmem:[%s6634_s15 + $0x1230] sm:$0xff] }
 0x3b7   : > { %5790 = vmatpush1.bf16.msra.mxu1 %v5789_v4  ;;  %v5589_v4 = vpack.c.bf16 %v2212_v38, %v2204_v8  ;;  %v2111_v38 = vld [vmem:[%s6634_s15 + $0x12b8] sm:$0xff] }
 0x3b8   : > { %5792 = vmatprep.subr.bf16.mxu1 %v5791_v58  ;;  %v5591_v58 = vpack.c.bf16 %v2229_v39, %v2221_v2  ;;  %v2268_v39 = vld [vmem:[%s6634_s15 + $0x17a0] sm:$0xff] }
 0x3b9   : > { %5578 = vmatpush1.bf16.msra.mxu0 %v5577_v59  ;;  %v5805_v59 = vpack.c.bf16 %v2054_v43, %v2046_v55  ;;  %v2285_v43 = vld [vmem:[%s6634_s15 + $0x1828] sm:$0xff] }
 0x3ba   : > { %5580 = vmatprep.subr.bf16.mxu0 %v5579_v3  ;;  %v5807_v3 = vpack.c.bf16 %v2071_v51, %v2063_v47  ;;  %v2110_v51 = vld [vmem:[%s6634_s15 + $0x12b0] sm:$0xff] }
 0x3bb   : > { %5794 = vmatpush1.bf16.msra.mxu1 %v5793_v14  ;;  %v2079_v14 = vld [vmem:[%s6634_s15 + $0x11b8] sm:$0xff] }
 0x3bc   : > { %5796 = vmatprep.subr.bf16.mxu1 %v5795_v54  ;;  %v2244_v54 = vld [vmem:[%s6634_s15 + $0x16e0] sm:$0xff]  ;;  %v5811_v17 = vpack.c.bf16 %v2087_v41, %v2079_v14  ;;  %v2126_v41 = vld [vmem:[%s6634_s15 + $0x1330] sm:$0xff] }
 0x3bd   : > { %5582 = vmatpush1.bf16.msra.mxu0 %v5581_v20  ;;  %v2261_v20 = vld [vmem:[%s6634_s15 + $0x1768] sm:$0xff] }
 0x3be   : > { %5584 = vmatprep.subr.bf16.mxu0 %v5583_v16  ;;  %v2086_v16 = vld [vmem:[%s6634_s15 + $0x11f0] sm:$0xff]  ;;  %v5599_v0 = vpack.c.bf16 %v2261_v20, %v2253_v44  ;;  %v2300_v20 = vld [vmem:[%s6634_s15 + $0x18a0] sm:$0xff] }
 0x3bf   : > { %5798 = vmatpush1.bf16.msra.mxu1 %v5797_v42  ;;  %v2103_v42 = vld [vmem:[%s6634_s15 + $0x1278] sm:$0xff]  ;;  %v5813_v52 = vpack.c.bf16 %v2086_v16, %v2078_v10  ;;  %v2317_v16 = vld [vmem:[%s6634_s15 + $0x1928] sm:$0xff] }
 0x3c0   : > { %5800 = vmatprep.subr.bf16.mxu1 %v5799_v33  ;;  %v2260_v33 = vld [vmem:[%s6634_s15 + $0x1760] sm:$0xff]  ;;  %v5815_v19 = vpack.c.bf16 %v2103_v42, %v2095_v9  ;;  %v2142_v42 = vld [vmem:[%s6634_s15 + $0x13b0] sm:$0xff] }
 0x3c1   : > { %5586 = vmatpush1.bf16.msra.mxu0 %v5585_v57  ;;  %v2277_v57 = vld [vmem:[%s6634_s15 + $0x17e8] sm:$0xff]  ;;  %v5601_v8 = vpack.c.bf16 %v2260_v33, %v2252_v63  ;;  %v2159_v33 = vld [vmem:[%s6634_s15 + $0x1438] sm:$0xff] }
 0x3c2   : > { %3524 = vmatmul.mubr.f32.vlgmr.msra.gmra.mrb[6].mxu1 %v7296_v37  ;;  %5588 = vmatprep.subr.bf16.mxu0 %v5587_v45  ;;  %v2070_v37 = vld [vmem:[%s6634_s15 + $0x1170] sm:$0xff]  ;;  %v5603_v2 = vpack.c.bf16 %v2277_v57, %v2269_v49  ;;  %v2316_v57 = vld [vmem:[%s6634_s15 + $0x1920] sm:$0xff] }
 0x3c3   : > { %5802 = vmatpush1.bf16.msra.mxu1 %v5801_v53  ;;  %3594 = vmatprep.mubr.f32.mxu1 %v7531_v1  ;;  %v2236_v1 = vld [vmem:[%s6634_s15 + $0x16a0] sm:$0xff]  ;;  %v5809_v12 = vpack.c.bf16 %v2070_v37, %v2062_v6  ;;  %v2102_v45 = vld [vmem:[%s6634_s15 + $0x1270] sm:$0xff]  ;;  %v2119_v53 = vld [vmem:[%s6634_s15 + $0x12f8] sm:$0xff] }
 0x3c4   : > { %5804 = vmatprep.subr.bf16.mxu1 %v5803_v48  ;;  %v5597_v46 = vpack.c.bf16 %v2244_v54, %v2236_v1  ;;  %v2276_v48 = vld [vmem:[%s6634_s15 + $0x17e0] sm:$0xff]  ;;  %v5817_v55 = vpack.c.bf16 %v2102_v45, %v2094_v60  ;;  %v5819_v47 = vpack.c.bf16 %v2119_v53, %v2111_v38  ;;  %v2301_v37 = vld [vmem:[%s6634_s15 + $0x18a8] sm:$0xff]  ;;  %v2143_v54 = vld [vmem:[%s6634_s15 + $0x13b8] sm:$0xff] }
 0x3c5   : > { %5590 = vmatpush1.bf16.msra.mxu0 %v5589_v4  ;;  %v2293_v4 = vld [vmem:[%s6634_s15 + $0x1868] sm:$0xff]  ;;  %v5605_v15 = vpack.c.bf16 %v2276_v48, %v2268_v39  ;;  %v2158_v53 = vld [vmem:[%s6634_s15 + $0x1430] sm:$0xff]  ;;  %v2175_v48 = vld [vmem:[%s6634_s15 + $0x14b8] sm:$0xff] }
 0x3c6   : > { %5592 = vmatprep.subr.bf16.mxu0 %v5591_v58  ;;  %v2118_v58 = vld [vmem:[%s6634_s15 + $0x12f0] sm:$0xff]  ;;  %v5607_v5 = vpack.c.bf16 %v2293_v4, %v2285_v43  ;;  %v2333_v45 = vld [vmem:[%s6634_s15 + $0x19a8] sm:$0xff]  ;;  %v2332_v4 = vld [vmem:[%s6634_s15 + $0x19a0] sm:$0xff] }
 0x3c7   : > { %5806 = vmatpush1.bf16.msra.mxu1 %v5805_v59  ;;  %v2135_v59 = vld [vmem:[%s6634_s15 + $0x1378] sm:$0xff]  ;;  %v5821_v6 = vpack.c.bf16 %v2118_v58, %v2110_v51  ;;  %v2349_v58 = vld [vmem:[%s6634_s15 + $0x1a28] sm:$0xff] }
 0x3c8   : > { %5808 = vmatprep.subr.bf16.mxu1 %v5807_v3  ;;  %v2292_v3 = vld [vmem:[%s6634_s15 + $0x1860] sm:$0xff]  ;;  %v5823_v14 = vpack.c.bf16 %v2135_v59, %v2127_v61  ;;  %v2174_v59 = vld [vmem:[%s6634_s15 + $0x14b0] sm:$0xff] }
 0x3c9   : > { %5594 = vmatpush1.bf16.msra.mxu0 %v5593_v50  ;;  %v2309_v50 = vld [vmem:[%s6634_s15 + $0x18e8] sm:$0xff]  ;;  %v5609_v1 = vpack.c.bf16 %v2292_v3, %v2284_v62  ;;  %v2191_v3 = vld [vmem:[%s6634_s15 + $0x1538] sm:$0xff] }
 0x3ca   : > { %5596 = vmatprep.subr.bf16.mxu0 %v5595_v11  ;;  %v2134_v11 = vld [vmem:[%s6634_s15 + $0x1370] sm:$0xff]  ;;  %v5611_v44 = vpack.c.bf16 %v2309_v50, %v2301_v37  ;;  %v2348_v50 = vld [vmem:[%s6634_s15 + $0x1a20] sm:$0xff] }
 0x3cb   : > { %5810 = vmatpush1.bf16.msra.mxu1 %v5809_v12  ;;  %v2151_v12 = vld [vmem:[%s6634_s15 + $0x13f8] sm:$0xff]  ;;  %v5825_v10 = vpack.c.bf16 %v2134_v11, %v2126_v41  ;;  %v2365_v11 = vld [vmem:[%s6634_s15 + $0x1aa8] sm:$0xff] }
 0x3cc   : > { %5812 = vmatprep.subr.bf16.mxu1 %v5811_v17  ;;  %v2308_v17 = vld [vmem:[%s6634_s15 + $0x18e0] sm:$0xff]  ;;  %v5827_v9 = vpack.c.bf16 %v2151_v12, %v2143_v54  ;;  %v2190_v12 = vld [vmem:[%s6634_s15 + $0x1530] sm:$0xff] }
 0x3cd   : > { %5598 = vmatpush1.bf16.msra.mxu0 %v5597_v46  ;;  %v2325_v46 = vld [vmem:[%s6634_s15 + $0x1968] sm:$0xff]  ;;  %v5613_v63 = vpack.c.bf16 %v2308_v17, %v2300_v20  ;;  %v2207_v17 = vld [vmem:[%s6634_s15 + $0x15b8] sm:$0xff] }
 0x3ce   : > { %5600 = vmatprep.subr.bf16.mxu0 %v5599_v0  ;;  %v2150_v0 = vld [vmem:[%s6634_s15 + $0x13f0] sm:$0xff]  ;;  %v5615_v49 = vpack.c.bf16 %v2325_v46, %v2317_v16  ;;  %v2364_v46 = vld [vmem:[%s6634_s15 + $0x1aa0] sm:$0xff] }
 0x3cf   : > { %5814 = vmatpush1.bf16.msra.mxu1 %v5813_v52  ;;  %v2167_v52 = vld [vmem:[%s6634_s15 + $0x1478] sm:$0xff]  ;;  %v5829_v60 = vpack.c.bf16 %v2150_v0, %v2142_v42  ;;  %v2381_v0 = vld [vmem:[%s6634_s15 + $0x1b28] sm:$0xff] }
 0x3d0   : > { %5816 = vmatprep.subr.bf16.mxu1 %v5815_v19  ;;  %v2324_v19 = vld [vmem:[%s6634_s15 + $0x1960] sm:$0xff]  ;;  %v5831_v38 = vpack.c.bf16 %v2167_v52, %v2159_v33  ;;  %v2206_v52 = vld [vmem:[%s6634_s15 + $0x15b0] sm:$0xff] }
 0x3d1   : > { %5602 = vmatpush1.bf16.msra.mxu0 %v5601_v8  ;;  %v2341_v8 = vld [vmem:[%s6634_s15 + $0x19e8] sm:$0xff]  ;;  %v5617_v39 = vpack.c.bf16 %v2324_v19, %v2316_v57  ;;  %v1504_v57 = vld [vmem:[#allocation2] sm:$0xff] }
 0x3d2   : > { %5604 = vmatprep.subr.bf16.mxu0 %v5603_v2  ;;  %v2166_v2 = vld [vmem:[%s6634_s15 + $0x1470] sm:$0xff]  ;;  %v5619_v43 = vpack.c.bf16 %v2341_v8, %v2333_v45  ;;  %v2231_v45 = vld [vmem:[%s6634_s15 + $0x1678] sm:$0xff]  ;;  %v1505_v8 = vld [vmem:[#allocation2 + $0x8] sm:$0xff] }
 0x3d3   : > { %5818 = vmatpush1.bf16.msra.mxu1 %v5817_v55  ;;  %v2183_v55 = vld [vmem:[%s6634_s15 + $0x14f8] sm:$0xff]  ;;  %v5833_v51 = vpack.c.bf16 %v2166_v2, %v2158_v53  ;;  %v2380_v53 = vld [vmem:[%s6634_s15 + $0x1b20] sm:$0xff] }
 0x3d4   : > { %5820 = vmatprep.subr.bf16.mxu1 %v5819_v47  ;;  %v2340_v47 = vld [vmem:[%s6634_s15 + $0x19e0] sm:$0xff]  ;;  %v5835_v61 = vpack.c.bf16 %v2183_v55, %v2175_v48  ;;  %v2397_v55 = vld [vmem:[%s6634_s15 + $0x1ba8] sm:$0xff] }
 0x3d5   : > { %5606 = vmatpush1.bf16.msra.mxu0 %v5605_v15  ;;  %v2357_v15 = vld [vmem:[%s6634_s15 + $0x1a68] sm:$0xff]  ;;  %v5621_v62 = vpack.c.bf16 %v2340_v47, %v2332_v4  ;;  %v2388_v2 = vld [vmem:[%s6634_s15 + $0x1b60] sm:$0xff] }
 0x3d6   : > { %5608 = vmatprep.subr.bf16.mxu0 %v5607_v5  ;;  %v2182_v5 = vld [vmem:[%s6634_s15 + $0x14f0] sm:$0xff]  ;;  %v5623_v37 = vpack.c.bf16 %v2357_v15, %v2349_v58 }
 0x3d7   : > { %5822 = vmatpush1.bf16.msra.mxu1 %v5821_v6  ;;  %v2199_v6 = vld [vmem:[%s6634_s15 + $0x1578] sm:$0xff]  ;;  %v5837_v41 = vpack.c.bf16 %v2182_v5, %v2174_v59  ;;  %v2222_v58 = vld [vmem:[%s6634_s15 + $0x1630] sm:$0xff]  ;;  %v5633_v59 = vpack.c.bf16 %v2388_v2, %v2380_v53  ;;  %v2453_v53 = vld [vmem:[%s6634_s15 + $0x1d68] sm:$0xff] }
 0x3d8   : > { %3311 = vmatmul.mubr.f32.vlgmr.msra.gmra.mrb[6].mxu0 %v7527_v13  ;;  %5824 = vmatprep.subr.bf16.mxu1 %v5823_v14  ;;  %v2356_v14 = vld [vmem:[%s6634_s15 + $0x1a60] sm:$0xff]  ;;  %v5839_v54 = vpack.c.bf16 %v2199_v6, %v2191_v3  ;;  %v2230_v15 = vld [vmem:[%s6634_s15 + $0x1670] sm:$0xff]  ;;  %v2239_v5 = vld [vmem:[%s6634_s15 + $0x16b8] sm:$0xff] }
 0x3d9   : > { %5610 = vmatpush1.bf16.msra.mxu0 %v5609_v1  ;;  %3381 = vmatprep.mubr.f32.mxu0 %v7675_v56  ;;  %v2373_v1 = vld [vmem:[%s6634_s15 + $0x1ae8] sm:$0xff]  ;;  %v5625_v20 = vpack.c.bf16 %v2356_v14, %v2348_v50  ;;  %v2396_v6 = vld [vmem:[%s6634_s15 + $0x1ba0] sm:$0xff]  ;;  %v5849_v50 = vpack.c.bf16 %v2230_v15, %v2222_v58 }
 0x3da   : > { %5612 = vmatprep.subr.bf16.mxu0 %v5611_v44  ;;  %v2198_v44 = vld [vmem:[%s6634_s15 + $0x1570] sm:$0xff]  ;;  %v5627_v16 = vpack.c.bf16 %v2373_v1, %v2365_v11  ;;  %v2413_v14 = vld [vmem:[%s6634_s15 + $0x1c28] sm:$0xff]  ;;  %v2452_v58 = vld [vmem:[%s6634_s15 + $0x1d60] sm:$0xff] }
 0x3db   : > { %5826 = vmatpush1.bf16.msra.mxu1 %v5825_v10  ;;  %v2215_v10 = vld [vmem:[%s6634_s15 + $0x15f8] sm:$0xff]  ;;  %v5841_v42 = vpack.c.bf16 %v2198_v44, %v2190_v12  ;;  %v2238_v1 = vld [vmem:[%s6634_s15 + $0x16b0] sm:$0xff] }
 0x3dc   : > { %5828 = vmatprep.subr.bf16.mxu1 %v5827_v9  ;;  %v2372_v9 = vld [vmem:[%s6634_s15 + $0x1ae0] sm:$0xff]  ;;  %v5843_v33 = vpack.c.bf16 %v2215_v10, %v2207_v17  ;;  %v2255_v44 = vld [vmem:[%s6634_s15 + $0x1738] sm:$0xff] }
 0x3dd   : > { %5614 = vmatpush1.bf16.msra.mxu0 %v5613_v63  ;;  %v2389_v63 = vld [vmem:[%s6634_s15 + $0x1b68] sm:$0xff]  ;;  %v5629_v19 = vpack.c.bf16 %v2372_v9, %v2364_v46  ;;  %v2412_v10 = vld [vmem:[%s6634_s15 + $0x1c20] sm:$0xff] }
 0x3de   : > { %5616 = vmatprep.subr.bf16.mxu0 %v5615_v49  ;;  %v2214_v49 = vld [vmem:[%s6634_s15 + $0x15f0] sm:$0xff]  ;;  %v2429_v9 = vld [vmem:[%s6634_s15 + $0x1ca8] sm:$0xff] }
 0x3df   : > { %5830 = vmatpush1.bf16.msra.mxu1 %v5829_v60  ;;  %v2223_v60 = vld [vmem:[%s6634_s15 + $0x1638] sm:$0xff]  ;;  %v5845_v48 = vpack.c.bf16 %v2214_v49, %v2206_v52 }
 0x3e0   : > { %5832 = vmatprep.subr.bf16.mxu1 %v5831_v38  ;;  %v5631_v38 = vpack.c.bf16 %v2389_v63, %v2381_v0  ;;  %v2254_v63 = vld [vmem:[%s6634_s15 + $0x1730] sm:$0xff]  ;;  %v2271_v49 = vld [vmem:[%s6634_s15 + $0x17b8] sm:$0xff] }
 0x3e1   : > { %5618 = vmatpush1.bf16.msra.mxu0 %v5617_v39 }
 0x3e2   : > { %5620 = vmatprep.subr.bf16.mxu0 %v5619_v43  ;;  %v2405_v43 = vld [vmem:[%s6634_s15 + $0x1be8] sm:$0xff] }
 0x3e3   : > { %5834 = vmatpush1.bf16.msra.mxu1 %v5833_v51  ;;  %v5847_v51 = vpack.c.bf16 %v2231_v45, %v2223_v60  ;;  %v5635_v3 = vpack.c.bf16 %v2405_v43, %v2397_v55  ;;  %v2428_v60 = vld [vmem:[%s6634_s15 + $0x1ca0] sm:$0xff]  ;;  %v2287_v43 = vld [vmem:[%s6634_s15 + $0x1838] sm:$0xff] }
 0x3e4   : > { %5836 = vmatprep.subr.bf16.mxu1 %v5835_v61  ;;  %v2436_v45 = vld [vmem:[%s6634_s15 + $0x1ce0] sm:$0xff] }
 0x3e5   : > { %5622 = vmatpush1.bf16.msra.mxu0 %v5621_v62  ;;  %v2247_v62 = vld [vmem:[%s6634_s15 + $0x16f8] sm:$0xff]  ;;  %v5645_v55 = vpack.c.bf16 %v2436_v45, %v2428_v60 }
 0x3e6   : > { %5624 = vmatprep.subr.bf16.mxu0 %v5623_v37  ;;  %v2404_v37 = vld [vmem:[%s6634_s15 + $0x1be0] sm:$0xff]  ;;  %v5851_v11 = vpack.c.bf16 %v2247_v62, %v2239_v5  ;;  %v2286_v62 = vld [vmem:[%s6634_s15 + $0x1830] sm:$0xff]  ;;  %v2335_v60 = vld [vmem:[%s6634_s15 + $0x19b8] sm:$0xff] }
 0x3e7   : > { %5838 = vmatpush1.bf16.msra.mxu1 %v5837_v41  ;;  %v2421_v41 = vld [vmem:[%s6634_s15 + $0x1c68] sm:$0xff]  ;;  %v5637_v12 = vpack.c.bf16 %v2404_v37, %v2396_v6  ;;  %v2303_v37 = vld [vmem:[%s6634_s15 + $0x18b8] sm:$0xff] }
 0x3e8   : > { %5840 = vmatprep.subr.bf16.mxu1 %v5839_v54  ;;  %v2246_v54 = vld [vmem:[%s6634_s15 + $0x16f0] sm:$0xff]  ;;  %v5639_v17 = vpack.c.bf16 %v2421_v41, %v2413_v14  ;;  %v2460_v41 = vld [vmem:[%s6634_s15 + $0x1da0] sm:$0xff]  ;;  %v2343_v45 = vld [vmem:[%s6634_s15 + $0x19f8] sm:$0xff] }
 0x3e9   : > { %5626 = vmatpush1.bf16.msra.mxu0 %v5625_v20  ;;  %v2263_v20 = vld [vmem:[%s6634_s15 + $0x1778] sm:$0xff]  ;;  %v5853_v46 = vpack.c.bf16 %v2246_v54, %v2238_v1  ;;  %v2477_v54 = vld [vmem:[%s6634_s15 + $0x1e28] sm:$0xff] }
 0x3ea   : > { %5628 = vmatprep.subr.bf16.mxu0 %v5627_v16  ;;  %v2420_v16 = vld [vmem:[%s6634_s15 + $0x1c60] sm:$0xff]  ;;  %v5855_v0 = vpack.c.bf16 %v2263_v20, %v2255_v44  ;;  %v2302_v20 = vld [vmem:[%s6634_s15 + $0x18b0] sm:$0xff] }
 0x3eb   : > { %v2815_v39 = vpop.f32.mrb[4].mxu0  ;;  %5842 = vmatpush1.bf16.msra.mxu1 %v5841_v42  ;;  %v2437_v42 = vld [vmem:[%s6634_s15 + $0x1ce8] sm:$0xff]  ;;  %v5641_v52 = vpack.c.bf16 %v2420_v16, %v2412_v10  ;;  %v2319_v16 = vld [vmem:[%s6634_s15 + $0x1938] sm:$0xff] }
 0x3ec   : > { %v3672_v4 = vadd.f32 %v2815_v39, %v1504_v57  ;;  %v2817_v47 = vpop.f32.mrb[5].mxu0  ;;  %5844 = vmatprep.subr.bf16.mxu1 %v5843_v33  ;;  %v2262_v33 = vld [vmem:[%s6634_s15 + $0x1770] sm:$0xff]  ;;  %v2279_v57 = vld [vmem:[%s6634_s15 + $0x17f8] sm:$0xff] }
 0x3ed   : > { %v3673_v61 = vadd.f32 %v2817_v47, %v1505_v8  ;;  %5630 = vmatpush1.bf16.msra.mxu0 %v5629_v19  ;;  %v5643_v19 = vpack.c.bf16 %v2437_v42, %v2429_v9  ;;  %v5857_v8 = vpack.c.bf16 %v2262_v33, %v2254_v63  ;;  %v5859_v2 = vpack.c.bf16 %v2279_v57, %v2271_v49  ;;  %v2270_v39 = vld [vmem:[%s6634_s15 + $0x17b0] sm:$0xff]  ;;  %v2476_v42 = vld [vmem:[%s6634_s15 + $0x1e20] sm:$0xff]  ;;  %v2493_v33 = vld [vmem:[%s6634_s15 + $0x1ea8] sm:$0xff] }
 0x3ee   : > { %3680 = vst [vmem:[#allocation2] sm:$0xff] %v3672_v4  ;;  %5632 = vmatprep.subr.bf16.mxu0 %v5631_v38  ;;  %v2445_v38 = vld [vmem:[%s6634_s15 + $0x1d28] sm:$0xff]  ;;  %v2295_v4 = vld [vmem:[%s6634_s15 + $0x1878] sm:$0xff]  ;;  %v2318_v57 = vld [vmem:[%s6634_s15 + $0x1930] sm:$0xff] }
 0x3ef   : > { %3681 = vst [vmem:[#allocation2 + $0x8] sm:$0xff] %v3673_v61  ;;  %5846 = vmatpush1.bf16.msra.mxu1 %v5845_v48  ;;  %v2278_v48 = vld [vmem:[%s6634_s15 + $0x17f0] sm:$0xff]  ;;  %v5647_v47 = vpack.c.bf16 %v2453_v53, %v2445_v38  ;;  %v2461_v61 = vld [vmem:[%s6634_s15 + $0x1da8] sm:$0xff]  ;;  %v5863_v5 = vpack.c.bf16 %v2295_v4, %v2287_v43  ;;  %v2500_v38 = vld [vmem:[%s6634_s15 + $0x1ee0] sm:$0xff] }
 0x3f0   : > { %5848 = vmatprep.subr.bf16.mxu1 %v5847_v51  ;;  %v2444_v51 = vld [vmem:[%s6634_s15 + $0x1d20] sm:$0xff]  ;;  %v5861_v15 = vpack.c.bf16 %v2278_v48, %v2270_v39  ;;  %v2517_v39 = vld [vmem:[%s6634_s15 + $0x1f68] sm:$0xff]  ;;  %v5875_v48 = vpack.c.bf16 %v2343_v45, %v2335_v60  ;;  %v2342_v43 = vld [vmem:[%s6634_s15 + $0x19f0] sm:$0xff] }
 0x3f1   : > { %5634 = vmatpush1.bf16.msra.mxu0 %v5633_v59  ;;  %v2469_v59 = vld [vmem:[%s6634_s15 + $0x1de8] sm:$0xff]  ;;  %v5649_v6 = vpack.c.bf16 %v2452_v58, %v2444_v51  ;;  %v2359_v51 = vld [vmem:[%s6634_s15 + $0x1a78] sm:$0xff] }
 0x3f2   : > { %5636 = vmatprep.subr.bf16.mxu0 %v5635_v3  ;;  %v2294_v3 = vld [vmem:[%s6634_s15 + $0x1870] sm:$0xff]  ;;  %v5651_v14 = vpack.c.bf16 %v2469_v59, %v2461_v61  ;;  %v2516_v61 = vld [vmem:[%s6634_s15 + $0x1f60] sm:$0xff] }
 0x3f3   : > { %5850 = vmatpush1.bf16.msra.mxu1 %v5849_v50  ;;  %v2311_v50 = vld [vmem:[%s6634_s15 + $0x18f8] sm:$0xff]  ;;  %v5865_v1 = vpack.c.bf16 %v2294_v3, %v2286_v62  ;;  %v2533_v62 = vld [vmem:[%s6634_s15 + $0x1fe8] sm:$0xff] }
 0x3f4   : > { %5852 = vmatprep.subr.bf16.mxu1 %v5851_v11  ;;  %v2468_v11 = vld [vmem:[%s6634_s15 + $0x1de0] sm:$0xff]  ;;  %v5867_v44 = vpack.c.bf16 %v2311_v50, %v2303_v37  ;;  %v2358_v37 = vld [vmem:[%s6634_s15 + $0x1a70] sm:$0xff] }
 0x3f5   : > { %5638 = vmatpush1.bf16.msra.mxu0 %v5637_v12  ;;  %v2485_v12 = vld [vmem:[%s6634_s15 + $0x1e68] sm:$0xff]  ;;  %v5653_v10 = vpack.c.bf16 %v2468_v11, %v2460_v41  ;;  %v2375_v41 = vld [vmem:[%s6634_s15 + $0x1af8] sm:$0xff] }
 0x3f6   : > { %5640 = vmatprep.subr.bf16.mxu0 %v5639_v17  ;;  %v2310_v17 = vld [vmem:[%s6634_s15 + $0x18f0] sm:$0xff]  ;;  %v5655_v9 = vpack.c.bf16 %v2485_v12, %v2477_v54  ;;  %v2532_v54 = vld [vmem:[%s6634_s15 + $0x1fe0] sm:$0xff] }
 0x3f7   : > { %5854 = vmatpush1.bf16.msra.mxu1 %v5853_v46  ;;  %v2327_v46 = vld [vmem:[%s6634_s15 + $0x1978] sm:$0xff]  ;;  %v5869_v63 = vpack.c.bf16 %v2310_v17, %v2302_v20  ;;  %v2366_v20 = vld [vmem:[%s6634_s15 + $0x1ab0] sm:$0xff] }
 0x3f8   : > { %5856 = vmatprep.subr.bf16.mxu1 %v5855_v0  ;;  %v2484_v0 = vld [vmem:[%s6634_s15 + $0x1e60] sm:$0xff]  ;;  %v5871_v49 = vpack.c.bf16 %v2327_v46, %v2319_v16  ;;  %v2374_v17 = vld [vmem:[%s6634_s15 + $0x1af0] sm:$0xff]  ;;  %v2383_v16 = vld [vmem:[%s6634_s15 + $0x1b38] sm:$0xff] }
 0x3f9   : > { %5642 = vmatpush1.bf16.msra.mxu0 %v5641_v52  ;;  %v2501_v52 = vld [vmem:[%s6634_s15 + $0x1ee8] sm:$0xff]  ;;  %v2391_v46 = vld [vmem:[%s6634_s15 + $0x1b78] sm:$0xff] }
 0x3fa   : > { %5644 = vmatprep.subr.bf16.mxu0 %v5643_v19  ;;  %v5657_v19 = vpack.c.bf16 %v2484_v0, %v2476_v42  ;;  %v5885_v42 = vpack.c.bf16 %v2374_v17, %v2366_v20  ;;  %v1507_v0 = vld [vmem:[#allocation2 + $0x18] sm:$0xff] }
 0x3fb   : > { %5858 = vmatpush1.bf16.msra.mxu1 %v5857_v8  ;;  %v5659_v8 = vpack.c.bf16 %v2501_v52, %v2493_v33  ;;  %v2382_v33 = vld [vmem:[%s6634_s15 + $0x1b30] sm:$0xff]  ;;  %v2487_v20 = vld [vmem:[%s6634_s15 + $0x1e78] sm:$0xff] }
 0x3fc   : > { %5860 = vmatprep.subr.bf16.mxu1 %v5859_v2  ;;  %v2509_v2 = vld [vmem:[%s6634_s15 + $0x1f28] sm:$0xff]  ;;  %v2390_v52 = vld [vmem:[%s6634_s15 + $0x1b70] sm:$0xff] }
 0x3fd   : > { %5646 = vmatpush1.bf16.msra.mxu0 %v5645_v55  ;;  %v2334_v55 = vld [vmem:[%s6634_s15 + $0x19b0] sm:$0xff]  ;;  %v5663_v58 = vpack.c.bf16 %v2517_v39, %v2509_v2  ;;  %v2415_v2 = vld [vmem:[%s6634_s15 + $0x1c38] sm:$0xff] }
 0x3fe   : > { %5648 = vmatprep.subr.bf16.mxu0 %v5647_v47  ;;  %v2351_v47 = vld [vmem:[%s6634_s15 + $0x1a38] sm:$0xff]  ;;  %v5877_v59 = vpack.c.bf16 %v2342_v43, %v2334_v55  ;;  %v2414_v43 = vld [vmem:[%s6634_s15 + $0x1c30] sm:$0xff] }
 0x3ff   : > { %5862 = vmatpush1.bf16.msra.mxu1 %v5861_v15  ;;  %v2508_v15 = vld [vmem:[%s6634_s15 + $0x1f20] sm:$0xff]  ;;  %v5879_v3 = vpack.c.bf16 %v2359_v51, %v2351_v47  ;;  %v2423_v39 = vld [vmem:[%s6634_s15 + $0x1c78] sm:$0xff] }
 0x400   : > { %5864 = vmatprep.subr.bf16.mxu1 %v5863_v5  ;;  %v2525_v5 = vld [vmem:[%s6634_s15 + $0x1fa8] sm:$0xff]  ;;  %v5665_v50 = vpack.c.bf16 %v2516_v61, %v2508_v15  ;;  %v5895_v55 = vpack.c.bf16 %v2423_v39, %v2415_v2  ;;  %v2431_v47 = vld [vmem:[%s6634_s15 + $0x1cb8] sm:$0xff]  ;;  %v2430_v61 = vld [vmem:[%s6634_s15 + $0x1cb0] sm:$0xff] }
 0x401   : > { %5650 = vmatpush1.bf16.msra.mxu0 %v5649_v6  ;;  %v2350_v6 = vld [vmem:[%s6634_s15 + $0x1a30] sm:$0xff]  ;;  %v5667_v11 = vpack.c.bf16 %v2533_v62, %v2525_v5  ;;  %v2439_v51 = vld [vmem:[%s6634_s15 + $0x1cf8] sm:$0xff] }
 0x402   : > { %3595 = vmatmul.mubr.f32.vlgmr.msra.gmra.mrb[6].mxu1 %v7527_v13  ;;  %5652 = vmatprep.subr.bf16.mxu0 %v5651_v14  ;;  %v2326_v13 = vld [vmem:[%s6634_s15 + $0x1970] sm:$0xff]  ;;  %v2367_v14 = vld [vmem:[%s6634_s15 + $0x1ab8] sm:$0xff]  ;;  %v5881_v12 = vpack.c.bf16 %v2358_v37, %v2350_v6  ;;  %v5899_v15 = vpack.c.bf16 %v2439_v51, %v2431_v47 }
 0x403   : > { %5866 = vmatpush1.bf16.msra.mxu1 %v5865_v1  ;;  %3665 = vmatprep.mubr.f32.mxu1 %v7675_v56  ;;  %v2492_v56 = vld [vmem:[%s6634_s15 + $0x1ea0] sm:$0xff]  ;;  %v5873_v53 = vpack.c.bf16 %v2326_v13, %v2318_v57  ;;  %v2399_v57 = vld [vmem:[%s6634_s15 + $0x1bb8] sm:$0xff]  ;;  %v2446_v37 = vld [vmem:[%s6634_s15 + $0x1d30] sm:$0xff] }
 0x404   : > { %5868 = vmatprep.subr.bf16.mxu1 %v5867_v44  ;;  %v5661_v4 = vpack.c.bf16 %v2500_v38, %v2492_v56  ;;  %v2524_v1 = vld [vmem:[%s6634_s15 + $0x1fa0] sm:$0xff]  ;;  %v5883_v44 = vpack.c.bf16 %v2375_v41, %v2367_v14  ;;  %v2407_v13 = vld [vmem:[%s6634_s15 + $0x1bf8] sm:$0xff]  ;;  %v2398_v38 = vld [vmem:[%s6634_s15 + $0x1bb0] sm:$0xff] }
 0x405   : > { %5654 = vmatpush1.bf16.msra.mxu0 %v5653_v10  ;;  %v5669_v10 = vpack.c.bf16 %v2532_v54, %v2524_v1  ;;  %v5891_v56 = vpack.c.bf16 %v2407_v13, %v2399_v57  ;;  %v2447_v5 = vld [vmem:[%s6634_s15 + $0x1d38] sm:$0xff]  ;;  %v2462_v54 = vld [vmem:[%s6634_s15 + $0x1db0] sm:$0xff] }
 0x406   : > { %5656 = vmatprep.subr.bf16.mxu0 %v5655_v9  ;;  %v1506_v9 = vld [vmem:[#allocation2 + $0x10] sm:$0xff]  ;;  %v2455_v62 = vld [vmem:[%s6634_s15 + $0x1d78] sm:$0xff] }
 0x407   : > { %5870 = vmatpush1.bf16.msra.mxu1 %v5869_v63  ;;  %v5887_v63 = vpack.c.bf16 %v2391_v46, %v2383_v16  ;;  %v5903_v6 = vpack.c.bf16 %v2455_v62, %v2447_v5  ;;  %v2463_v14 = vld [vmem:[%s6634_s15 + $0x1db8] sm:$0xff]  ;;  %v2478_v16 = vld [vmem:[%s6634_s15 + $0x1e30] sm:$0xff] }
 0x408   : > { %5872 = vmatprep.subr.bf16.mxu1 %v5871_v49  ;;  %v2471_v41 = vld [vmem:[%s6634_s15 + $0x1df8] sm:$0xff]  ;;  %v2486_v46 = vld [vmem:[%s6634_s15 + $0x1e70] sm:$0xff] }
 0x409   : > { %5658 = vmatpush1.bf16.msra.mxu0 %v5657_v19  ;;  %v5907_v1 = vpack.c.bf16 %v2471_v41, %v2463_v14  ;;  %v2519_v57 = vld [vmem:[%s6634_s15 + $0x1f78] sm:$0xff]  ;;  %v2526_v2 = vld [vmem:[%s6634_s15 + $0x1fb0] sm:$0xff]  ;;  %v3693_v14 = vsel (!%p4683_p13), %vm3692_vm0, %v6650_v18, 0.0  ;;  %v3947_v18 = vld [vmem:[%s9217_s5 + $0x220] sm:$0xff] (!%p4683_p13) }
 0x40a   : > { %5660 = vmatprep.subr.bf16.mxu0 %v5659_v8  ;;  %v5889_v8 = vpack.c.bf16 %v2390_v52, %v2382_v33  ;;  %v2494_v33 = vld [vmem:[%s6634_s15 + $0x1eb0] sm:$0xff]  ;;  %3694 = vadd.xlane.f32.xlu0 (!%p4683_p13), %v3693_v14  ;;  %v3729_v14 = vsel (!%p4683_p13), %vm3692_vm0, %v6764_v35, 0.0  ;;  %v3978_v35 = vld [vmem:[%s9217_s5 + $0x318] sm:$0xff] (!%p4683_p13) }
 0x40b   : > { %5874 = vmatpush1.bf16.msra.mxu1 %v5873_v53  ;;  %v2406_v53 = vld [vmem:[%s6634_s15 + $0x1bf0] sm:$0xff] }
 0x40c   : > { %5876 = vmatprep.subr.bf16.mxu1 %v5875_v48  ;;  %v5893_v48 = vpack.c.bf16 %v2406_v53, %v2398_v38  ;;  %v2502_v52 = vld [vmem:[%s6634_s15 + $0x1ef0] sm:$0xff] }
 0x40d   : > { %5662 = vmatpush1.bf16.msra.mxu0 %v5661_v4  ;;  %v2422_v4 = vld [vmem:[%s6634_s15 + $0x1c70] sm:$0xff]  ;;  %v5917_v13 = vpack.c.bf16 %v2502_v52, %v2494_v33  ;;  %v3705_v33 = vsel (!%p4683_p13), %vm3692_vm0, %v6693_v26, 0.0  ;;  %v3962_v26 = vld [vmem:[%s9217_s5 + $0x298] sm:$0xff] (!%p4683_p13) }
 0x40e   : > { %5664 = vmatprep.subr.bf16.mxu0 %v5663_v58  ;;  %v5897_v58 = vpack.c.bf16 %v2422_v4, %v2414_v43  ;;  %v2534_v39 = vld [vmem:[%s6634_s15 + $0x1ff0] sm:$0xff]  ;;  %v1509_v43 = vld [vmem:[#allocation2 + $0x28] sm:$0xff] }
 0x40f   : > { %5878 = vmatpush1.bf16.msra.mxu1 %v5877_v59  ;;  %v2438_v59 = vld [vmem:[%s6634_s15 + $0x1cf0] sm:$0xff] }
 0x410   : > { %5880 = vmatprep.subr.bf16.mxu1 %v5879_v3  ;;  %v5901_v3 = vpack.c.bf16 %v2438_v59, %v2430_v61  ;;  %v1511_v61 = vld [vmem:[#allocation2 + $0x38] sm:$0xff] }
 0x411   : > { %5666 = vmatpush1.bf16.msra.mxu0 %v5665_v50  ;;  %v2454_v50 = vld [vmem:[%s6634_s15 + $0x1d70] sm:$0xff] }
 0x412   : > { %5668 = vmatprep.subr.bf16.mxu0 %v5667_v11  ;;  %v5905_v11 = vpack.c.bf16 %v2454_v50, %v2446_v37  ;;  %v3943_v37 = vld [vmem:[%s9217_s5 + $0x200] sm:$0xff] (!%p4683_p13)  ;;  %v3699_v50 = vsel (!%p4683_p13), %vm3692_vm0, %v6666_v22, 0.0 }
 0x413   : > { %5882 = vmatpush1.bf16.msra.mxu1 %v5881_v12  ;;  %v2470_v12 = vld [vmem:[%s6634_s15 + $0x1df0] sm:$0xff]  ;;  %3700 = vadd.xlane.f32.xlu1 (!%p4683_p13), %v3699_v50  ;;  %v3732_v50 = vsel (!%p4683_p13), %vm3692_vm0, %v6714_v29, 0.0  ;;  %v3976_v29 = vld [vmem:[%s9217_s5 + $0x308] sm:$0xff] (!%p4683_p13) }
 0x414   : > { %5884 = vmatprep.subr.bf16.mxu1 %v5883_v44  ;;  %v2479_v44 = vld [vmem:[%s6634_s15 + $0x1e38] sm:$0xff]  ;;  %v5909_v17 = vpack.c.bf16 %v2470_v12, %v2462_v54 }
 0x415   : > { %5670 = vmatpush1.bf16.msra.mxu0 %v5669_v10  ;;  %v3099_v49 = vpop.f32.mrb[4].mxu1  ;;  %v5911_v10 = vpack.c.bf16 %v2487_v20, %v2479_v44  ;;  %v3950_v54 = vld [vmem:[%s9217_s5 + $0x238] sm:$0xff] (!%p4683_p13)  ;;  %v3949_v44 = vld [vmem:[%s9217_s5 + $0x230] sm:$0xff] (!%p4683_p13)  ;;  %v3952_v20 = vld [vmem:[%s9217_s5 + $0x248] sm:$0xff] (!%p4683_p13) }
 0x416   : > { %v3674_v19 = vadd.f32 %v3099_v49, %v1506_v9  ;;  %v3101_v60 = vpop.f32.mrb[5].mxu1  ;;  %v2495_v9 = vld [vmem:[%s6634_s15 + $0x1eb8] sm:$0xff] }
 0x417   : > { %v3675_v45 = vadd.f32 %v3101_v60, %v1507_v0  ;;  %5886 = vmatpush1.bf16.msra.mxu1 %v5885_v42  ;;  %v2503_v42 = vld [vmem:[%s6634_s15 + $0x1ef8] sm:$0xff]  ;;  %v5913_v0 = vpack.c.bf16 %v2486_v46, %v2478_v16  ;;  %v2510_v60 = vld [vmem:[%s6634_s15 + $0x1f30] sm:$0xff]  ;;  %v6021_v46 = vpack.c.bf16 (!%p4683_p13), %v3949_v44, %v3947_v18  ;;  %v3738_v18 = vsel (!%p4683_p13), %vm3692_vm0, %v6777_v36, 0.0  ;;  %v3980_v36 = vld [vmem:[%s9217_s5 + $0x328] sm:$0xff] (!%p4683_p13) }
 0x418   : > { %3682 = vst [vmem:[#allocation2 + $0x10] sm:$0xff] %v3674_v19  ;;  %3382 = vmatmul.mubr.f32.vlgmr.msra.gmra.mrb[6].mxu0 %v7671_v7  ;;  %5888 = vmatprep.subr.bf16.mxu1 %v5887_v63  ;;  %v5915_v63 = vpack.c.bf16 %v2503_v42, %v2495_v9  ;;  %v2511_v49 = vld [vmem:[%s6634_s15 + $0x1f38] sm:$0xff]  ;;  %v3951_v42 = vld [vmem:[%s9217_s5 + $0x240] sm:$0xff] (!%p4683_p13)  ;;  %v3735_v44 = vsel (!%p4683_p13), %vm3692_vm0, %v6721_v30, 0.0 }
 0x419   : > { %3683 = vst [vmem:[#allocation2 + $0x18] sm:$0xff] %v3675_v45  ;;  %v5919_v19 = vpack.c.bf16 %v2519_v57, %v2511_v49  ;;  %v2518_v45 = vld [vmem:[%s6634_s15 + $0x1f70] sm:$0xff]  ;;  %v3954_v16 = vld [vmem:[%s9217_s5 + $0x258] sm:$0xff] (!%p4683_p13)  ;;  %v3955_v57 = vld [vmem:[%s9217_s5 + $0x260] sm:$0xff] (!%p4683_p13) }
 0x41a   : > { %v5921_v38 = vpack.c.bf16 %v2518_v45, %v2510_v60  ;;  %v6023_v9 = vpack.c.bf16 (!%p4683_p13), %v3954_v16, %v3952_v20  ;;  %v3714_v60 = vsel (!%p4683_p13), %vm3692_vm0, %v6726_v31, 0.0  ;;  %v3711_v45 = vsel (!%p4683_p13), %vm3692_vm0, %v6686_v25, 0.0  ;;  %v3964_v31 = vld [vmem:[%s9217_s5 + $0x2a8] sm:$0xff] (!%p4683_p13)  ;;  %v3966_v25 = vld [vmem:[%s9217_s5 + $0x2b8] sm:$0xff] (!%p4683_p13)  ;;  %v3977_v16 = vld [vmem:[%s9217_s5 + $0x310] sm:$0xff] (!%p4683_p13) }
 0x41b   : > { %5890 = vmatpush1.bf16.msra.mxu1 %v5889_v8  ;;  %v2527_v8 = vld [vmem:[%s6634_s15 + $0x1fb8] sm:$0xff] }
 0x41c   : > { %5892 = vmatprep.subr.bf16.mxu1 %v5891_v56  ;;  %v2535_v56 = vld [vmem:[%s6634_s15 + $0x1ff8] sm:$0xff] }
 0x41d   : > { %v5923_v53 = vpack.c.bf16 %v2535_v56, %v2527_v8  ;;  %v3982_v30 = vld [vmem:[%s9217_s5 + $0x338] sm:$0xff] (!%p4683_p13) }
 0x41f   : > { %5894 = vmatpush1.bf16.msra.mxu1 %v5893_v48  ;;  %v5925_v48 = vpack.c.bf16 %v2534_v39, %v2526_v2  ;;  %v3720_v39 = vsel (!%p4683_p13), %vm3692_vm0, %v6698_v27, 0.0  ;;  %v3968_v27 = vld [vmem:[%s9217_s5 + $0x2c8] sm:$0xff] (!%p4683_p13) }
 0x420   : > { %5896 = vmatprep.subr.bf16.mxu1 %v5895_v55  ;;  %v1508_v55 = vld [vmem:[#allocation2 + $0x20] sm:$0xff] }
 0x423   : > { %5898 = vmatpush1.bf16.msra.mxu1 %v5897_v58 }
 0x424   : > { %5900 = vmatprep.subr.bf16.mxu1 %v5899_v15  ;;  %v1510_v15 = vld [vmem:[#allocation2 + $0x30] sm:$0xff] }
 0x427   : > { %5902 = vmatpush1.bf16.msra.mxu1 %v5901_v3 }
 0x428   : > { %5904 = vmatprep.subr.bf16.mxu1 %v5903_v6  ;;  %v3946_v6 = vld [vmem:[%s9217_s5 + $0x218] sm:$0xff] (!%p4683_p13) }
 0x42b   : > { %5906 = vmatpush1.bf16.msra.mxu1 %v5905_v11  ;;  %v3945_v11 = vld [vmem:[%s9217_s5 + $0x210] sm:$0xff] (!%p4683_p13) }
 0x42c   : > { %5908 = vmatprep.subr.bf16.mxu1 %v5907_v1  ;;  %v3948_v1 = vld [vmem:[%s9217_s5 + $0x228] sm:$0xff] (!%p4683_p13)  ;;  %v6017_v12 = vpack.c.bf16 (!%p4683_p13), %v3945_v11, %v3943_v37 }
 0x42d   : > { %v6019_v22 = vpack.c.bf16 (!%p4683_p13), %v3950_v54, %v3948_v1  ;;  %v3971_v54 = vld [vmem:[%s9217_s5 + $0x2e0] sm:$0xff] (!%p4683_p13) }
 0x42f   : > { %5910 = vmatpush1.bf16.msra.mxu1 %v5909_v17  ;;  %v3702_v17 = vsel (!%p4683_p13), %vm3692_vm0, %v6671_v23, 0.0  ;;  %v3958_v23 = vld [vmem:[%s9217_s5 + $0x278] sm:$0xff] (!%p4683_p13) }
 0x430   : > { %5912 = vmatprep.subr.bf16.mxu1 %v5911_v10  ;;  %v3696_v10 = vsel (!%p4683_p13), %vm3692_vm0, %v6659_v21, 0.0  ;;  %3703 = vadd.xlane.f32.xlu1 (!%p4683_p13), %v3702_v17  ;;  %v3956_v21 = vld [vmem:[%s9217_s5 + $0x268] sm:$0xff] (!%p4683_p13)  ;;  %v6047_v17 = vpack.c.bf16 (!%p4683_p13), %v3978_v35, %v3976_v29 }
 0x431   : > { %3697 = vadd.xlane.f32.xlu0 (!%p4683_p13), %v3696_v10  ;;  %v6027_v49 = vpack.c.bf16 (!%p4683_p13), %v3958_v23, %v3956_v21  ;;  %v3975_v10 = vld [vmem:[%s9217_s5 + $0x300] sm:$0xff] (!%p4683_p13)  ;;  %v3984_v21 = vld [vmem:[%s9217_s5 + $0x348] sm:$0xff] (!%p4683_p13)  ;;  %v3986_v23 = vld [vmem:[%s9217_s5 + $0x358] sm:$0xff] (!%p4683_p13) }
 0x433   : > { %5914 = vmatpush1.bf16.msra.mxu1 %v5913_v0  ;;  %v3953_v0 = vld [vmem:[%s9217_s5 + $0x250] sm:$0xff] (!%p4683_p13) }
 0x434   : > { %5916 = vmatprep.subr.bf16.mxu1 %v5915_v63  ;;  %v3708_v63 = vsel (!%p4683_p13), %vm3692_vm0, %v6679_v24, 0.0  ;;  %v6025_v52 = vpack.c.bf16 (!%p4683_p13), %v3953_v0, %v3951_v42  ;;  %v3960_v24 = vld [vmem:[%s9217_s5 + $0x288] sm:$0xff] (!%p4683_p13)  ;;  %v3979_v42 = vld [vmem:[%s9217_s5 + $0x320] sm:$0xff] (!%p4683_p13)  ;;  %v3981_v0 = vld [vmem:[%s9217_s5 + $0x330] sm:$0xff] (!%p4683_p13) }
 0x435   : > { %3709 = vadd.xlane.f32.xlu1 (!%p4683_p13), %v3708_v63  ;;  %3706 = vadd.xlane.f32.xlu0 (!%p4683_p13), %v3705_v33  ;;  %v6031_v56 = vpack.c.bf16 (!%p4683_p13), %v3962_v26, %v3960_v24  ;;  %v6053_v63 = vpack.c.bf16 (!%p4683_p13), %v3981_v0, %v3979_v42  ;;  %v6055_v33 = vpack.c.bf16 (!%p4683_p13), %v3986_v23, %v3984_v21  ;;  %v4013_v42 = vld [vmem:[%s9217_s5 + $0x430] sm:$0xff] (!%p4683_p13)  ;;  %v4016_v0 = vld [vmem:[%s9217_s5 + $0x448] sm:$0xff] (!%p4683_p13)  ;;  %v4018_v21 = vld [vmem:[%s9217_s5 + $0x458] sm:$0xff] (!%p4683_p13) }
 0x437   : > { %5918 = vmatpush1.bf16.msra.mxu1 %v5917_v13  ;;  %v3957_v13 = vld [vmem:[%s9217_s5 + $0x270] sm:$0xff] (!%p4683_p13) }
 0x438   : > { %5920 = vmatprep.subr.bf16.mxu1 %v5919_v19  ;;  %v3823_v19 = vlaneseq (!%p4683_p13)  ;;  %v6029_v8 = vpack.c.bf16 (!%p4683_p13), %v3957_v13, %v3955_v57  ;;  %v3988_v57 = vld [vmem:[%s9217_s5 + $0x368] sm:$0xff] (!%p4683_p13)  ;;  %v3990_v13 = vld [vmem:[%s9217_s5 + $0x378] sm:$0xff] (!%p4683_p13) }
 0x439   : > { %3715 = vadd.xlane.f32.xlu1 (!%p4683_p13), %v3714_v60  ;;  %3712 = vadd.xlane.f32.xlu0 (!%p4683_p13), %v3711_v45  ;;  %v6059_v26 = vpack.c.bf16 (!%p4683_p13), %v3990_v13, %v3988_v57  ;;  %v3989_v60 = vld [vmem:[%s9217_s5 + $0x370] sm:$0xff] (!%p4683_p13)  ;;  %v3992_v45 = vld [vmem:[%s9217_s5 + $0x388] sm:$0xff] (!%p4683_p13)  ;;  %v4022_v57 = vld [vmem:[%s9217_s5 + $0x478] sm:$0xff] (!%p4683_p13) }
 0x43a   : > { %v8320_v2 = vshrl.u32 (!%p4683_p13), %v3823_v19, 7  ;;  %v3987_v19 = vld [vmem:[%s9217_s5 + $0x360] sm:$0xff] (!%p4683_p13) }
 0x43b   : > { %5922 = vmatpush1.bf16.msra.mxu1 %v5921_v38  ;;  %v3959_v38 = vld [vmem:[%s9217_s5 + $0x280] sm:$0xff] (!%p4683_p13) }
 0x43c   : > { %5924 = vmatprep.subr.bf16.mxu1 %v5923_v53  ;;  %v3961_v53 = vld [vmem:[%s9217_s5 + $0x290] sm:$0xff] (!%p4683_p13) }
 0x43d   : > { %3721 = vadd.xlane.f32.xlu1 (!%p4683_p13), %v3720_v39  ;;  %v3998_v39 = vld [vmem:[%s9217_s5 + $0x3b8] sm:$0xff] (!%p4683_p13) }
 0x43f   : > { %5926 = vmatpush1.bf16.msra.mxu1 %v5925_v48  ;;  %v3717_v48 = vsel (!%p4683_p13), %vm3692_vm0, %v6738_v32, 0.0  ;;  %v3970_v32 = vld [vmem:[%s9217_s5 + $0x2d8] sm:$0xff] (!%p4683_p13) }
 0x440   : > { %3718 = vadd.xlane.f32.xlu0 (!%p4683_p13), %v3717_v48 }
 0x442   : > { %3666 = vmatmul.mubr.f32.vlgmr.msra.gmra.mrb[6].mxu1 %v7671_v7  ;;  %v3944_v7 = vld [vmem:[%s9217_s5 + $0x208] sm:$0xff] (!%p4683_p13) }
 0x443   : > { %v6015_v41 = vpack.c.bf16 (!%p4683_p13), %v3946_v6, %v3944_v7  ;;  %v6481_v7 = vmov (!%p4683_p13), 0.0|0.0   ;;  %v3974_v6 = vld [vmem:[%s9217_s5 + $0x2f8] sm:$0xff] (!%p4683_p13) }
 0x444   : > { %5927 = vmatprep.subr.bf16.mxu0 (!%p4683_p13), %v6481_v7 }
 0x445   : > { %6016 = vmatprep.subr.bf16.mxu1 (!%p4683_p13), %v6015_v41 }
 0x446   : > { %6018 = vmatpush1.bf16.msra.mxu1 (!%p4683_p13), %v6017_v12  ;;  %v3973_v12 = vld [vmem:[%s9217_s5 + $0x2f0] sm:$0xff] (!%p4683_p13) }
 0x447   : > { %6020 = vmatprep.subr.bf16.mxu1 (!%p4683_p13), %v6019_v22  ;;  %v6045_v20 = vpack.c.bf16 (!%p4683_p13), %v3973_v12, %v3971_v54  ;;  %v4008_v54 = vld [vmem:[%s9217_s5 + $0x408] sm:$0xff] (!%p4683_p13)  ;;  %v4010_v12 = vld [vmem:[%s9217_s5 + $0x418] sm:$0xff] (!%p4683_p13) }
 0x44a   : > { %6022 = vmatpush1.bf16.msra.mxu1 (!%p4683_p13), %v6021_v46  ;;  %v6049_v46 = vpack.c.bf16 (!%p4683_p13), %v3977_v16, %v3975_v10  ;;  %v4014_v10 = vld [vmem:[%s9217_s5 + $0x438] sm:$0xff] (!%p4683_p13) }
 0x44b   : > { %6024 = vmatprep.subr.bf16.mxu1 (!%p4683_p13), %v6023_v9  ;;  %v6051_v9 = vpack.c.bf16 (!%p4683_p13), %v3982_v30, %v3980_v36 }
 0x44e   : > { %6026 = vmatpush1.bf16.msra.mxu1 (!%p4683_p13), %v6025_v52  ;;  %v3983_v52 = vld [vmem:[%s9217_s5 + $0x340] sm:$0xff] (!%p4683_p13) }
 0x44f   : > { %6028 = vmatprep.subr.bf16.mxu1 (!%p4683_p13), %v6027_v49  ;;  %v3985_v49 = vld [vmem:[%s9217_s5 + $0x350] sm:$0xff] (!%p4683_p13) }
 0x450   : > { %v6057_v24 = vpack.c.bf16 (!%p4683_p13), %v3985_v49, %v3983_v52  ;;  %v4017_v52 = vld [vmem:[%s9217_s5 + $0x450] sm:$0xff] (!%p4683_p13)  ;;  %v4020_v49 = vld [vmem:[%s9217_s5 + $0x468] sm:$0xff] (!%p4683_p13) }
 0x452   : > { %6030 = vmatpush1.bf16.msra.mxu1 (!%p4683_p13), %v6029_v8  ;;  %v3994_v8 = vld [vmem:[%s9217_s5 + $0x398] sm:$0xff] (!%p4683_p13) }
 0x453   : > { %6032 = vmatprep.subr.bf16.mxu1 (!%p4683_p13), %v6031_v56  ;;  %v6061_v56 = vpack.c.bf16 (!%p4683_p13), %v3989_v60, %v3987_v19  ;;  %v4021_v19 = vld [vmem:[%s9217_s5 + $0x470] sm:$0xff] (!%p4683_p13)  ;;  %v4024_v60 = vld [vmem:[%s9217_s5 + $0x488] sm:$0xff] (!%p4683_p13) }
 0x4eb   : > { %v3383_v4 = vpop.f32.mrb[6].mxu0 }
 0x4ec   : > { %v3676_v47 = vadd.f32 %v3383_v4, %v1508_v55  ;;  %v3385_v51 = vpop.f32.mrb[7].mxu0  ;;  %v6033_v55 = vpack.c.bf16 (!%p4683_p13), %v3961_v53, %v3959_v38  ;;  %v3963_v4 = vld [vmem:[%s9217_s5 + $0x2a0] sm:$0xff] (!%p4683_p13)  ;;  %v6063_v38 = vpack.c.bf16 (!%p4683_p13), %v3994_v8, %v3992_v45  ;;  %v4026_v45 = vld [vmem:[%s9217_s5 + $0x498] sm:$0xff] (!%p4683_p13) }
 0x4ed   : > { %v3677_v58 = vadd.f32 %v3385_v51, %v1509_v43  ;;  %v6035_v43 = vpack.c.bf16 (!%p4683_p13), %v3966_v25, %v3964_v31  ;;  %v3837_v51 = vsub.s32 (!%p4683_p13), 3, %v8320_v2  ;;  %v3991_v53 = vld [vmem:[%s9217_s5 + $0x380] sm:$0xff] (!%p4683_p13)  ;;  %v3993_v31 = vld [vmem:[%s9217_s5 + $0x390] sm:$0xff] (!%p4683_p13)  ;;  %v3996_v25 = vld [vmem:[%s9217_s5 + $0x3a8] sm:$0xff] (!%p4683_p13) }
 0x4ee   : > { %3684 = vst [vmem:[#allocation2 + $0x20] sm:$0xff] %v3676_v47  ;;  %v3965_v47 = vld [vmem:[%s9217_s5 + $0x2b0] sm:$0xff] (!%p4683_p13)  ;;  %6034 = vmatpush1.bf16.msra.mxu1 (!%p4683_p13), %v6033_v55  ;;  %v6065_v48 = vpack.c.bf16 (!%p4683_p13), %v3993_v31, %v3991_v53  ;;  %v6067_v55 = vpack.c.bf16 (!%p4683_p13), %v3998_v39, %v3996_v25  ;;  %v4028_v31 = vld [vmem:[%s9217_s5 + $0x4a8] sm:$0xff] (!%p4683_p13)  ;;  %v4030_v25 = vld [vmem:[%s9217_s5 + $0x4b8] sm:$0xff] (!%p4683_p13) }
 0x4ef   : > { %3685 = vst [vmem:[#allocation2 + $0x28] sm:$0xff] %v3677_v58  ;;  %v3726_v58 = vsel (!%p4683_p13), %vm3692_vm0, %v6752_v34, 0.0  ;;  %6036 = vmatprep.subr.bf16.mxu1 (!%p4683_p13), %v6035_v43  ;;  %v8352_v34 = vld [vmem:[%s9216_s4] sm:$0xff] (!%p4683_p13)  ;;  %v4025_v53 = vld [vmem:[%s9217_s5 + $0x490] sm:$0xff] (!%p4683_p13) }
 0x4f0   : > { %3727 = vadd.xlane.f32.xlu1 (!%p4683_p13), %v3726_v58  ;;  %v3838_v37 = vrot.slane (!%p4683_p13), %v8352_v34, %v3837_v51  ;;  %v3995_v43 = vld [vmem:[%s9217_s5 + $0x3a0] sm:$0xff] (!%p4683_p13)  ;;  %v6483_v51 = vmov (!%p4683_p13), 0.0  }
 0x4f1   : > { %4772 = vmatprep.mubr.msk.f32.mxu0 (!%p4683_p13), %vm6482_vm1, %v6483_v51  ;;  %v4031_v51 = vld [vmem:[%s9217_s5 + $0x4c0] sm:$0xff] (!%p4683_p13) }
 0x4f4   : > { %3733 = vadd.xlane.f32.xlu1 (!%p4683_p13), %v3732_v50 }
 0x4f8   : > { %3739 = vadd.xlane.f32.xlu1 (!%p4683_p13), %v3738_v18  ;;  %v6079_v18 = vpack.c.bf16 (!%p4683_p13), %v4010_v12, %v4008_v54 }
 0x513   : > { %3691 = sbr.rel (%p4683_p13) target bundleno = 1960 (0x7a8), region = 102 }
 0x515   : > { %v3667_v59 = vpop.f32.mrb[6].mxu1 }
 0x516   : > { %v3678_v5 = vadd.f32 %v3667_v59, %v1510_v15  ;;  %v3669_v62 = vpop.f32.mrb[7].mxu1  ;;  %v3723_v15 = vsel (!%p4683_p13), %vm3692_vm0, %v6706_v28, 0.0  ;;  %v3967_v59 = vld [vmem:[%s9217_s5 + $0x2c0] sm:$0xff] (!%p4683_p13)  ;;  %v3972_v28 = vld [vmem:[%s9217_s5 + $0x2e8] sm:$0xff] (!%p4683_p13) }
 0x517   : > { %v3679_v3 = vadd.f32 %v3669_v62, %v1511_v61  ;;  %v6037_v61 = vpack.c.bf16 (!%p4683_p13), %v3965_v47, %v3963_v4  ;;  %v3969_v62 = vld [vmem:[%s9217_s5 + $0x2d0] sm:$0xff] (!%p4683_p13)  ;;  %3724 = vadd.xlane.f32.xlu0 (!%p4683_p13), %v3723_v15  ;;  %v6043_v1 = vpack.c.bf16 (!%p4683_p13), %v3974_v6, %v3972_v28  ;;  %v4000_v47 = vld [vmem:[%s9217_s5 + $0x3c8] sm:$0xff] (!%p4683_p13)  ;;  %v3845_v15 = vsub.s32 (!%p4683_p13), 5, %v8320_v2 }
 0x518   : > { %3686 = vst [vmem:[#allocation2 + $0x30] sm:$0xff] %v3678_v5  ;;  %v6039_v5 = vpack.c.bf16 (!%p4683_p13), %v3970_v32, %v3968_v27  ;;  %v6041_v41 = vpack.c.bf16 (!%p4683_p13), %v3969_v62, %v3967_v59  ;;  %v3997_v4 = vld [vmem:[%s9217_s5 + $0x3b0] sm:$0xff] (!%p4683_p13)  ;;  %v4002_v27 = vld [vmem:[%s9217_s5 + $0x3d8] sm:$0xff] (!%p4683_p13)  ;;  %v3833_v32 = vsub.s32 (!%p4683_p13), 2, %v8320_v2  ;;  %v3999_v59 = vld [vmem:[%s9217_s5 + $0x3c0] sm:$0xff] (!%p4683_p13) }
 0x519   : > { %3687 = vst [vmem:[#allocation2 + $0x38] sm:$0xff] %v3679_v3  ;;  %v3816_v3 = vld [vmem:[#allocation2 + $0x18] sm:$0xff] (!%p4683_p13)  ;;  %6038 = vmatpush1.bf16.msra.mxu1 (!%p4683_p13), %v6037_v61  ;;  %v6069_v58 = vpack.c.bf16 (!%p4683_p13), %v3997_v4, %v3995_v43  ;;  %v6071_v61 = vpack.c.bf16 (!%p4683_p13), %v4002_v27, %v4000_v47  ;;  %v4004_v62 = vld [vmem:[%s9217_s5 + $0x3e8] sm:$0xff] (!%p4683_p13)  ;;  %v3846_v50 = vrot.slane (!%p4683_p13), %v8352_v34, %v3845_v15  ;;  %v4029_v43 = vld [vmem:[%s9217_s5 + $0x4b0] sm:$0xff] (!%p4683_p13) }
 0x51a   : > { %v3866_v11 = vadd.f32 %v3838_v37, %v3816_v3  ;;  %6040 = vmatprep.subr.bf16.mxu1 %v6039_v5  ;;  %v4001_v5 = vld [vmem:[%s9217_s5 + $0x3d0] sm:$0xff]  ;;  %v4006_v3 = vld [vmem:[%s9217_s5 + $0x3f8] sm:$0xff]  ;;  %v3834_v28 = vrot.slane %v8352_v34, %v3833_v32  ;;  %v4032_v4 = vld [vmem:[%s9217_s5 + $0x4c8] sm:$0xff] }
 0x51b   : > { %3730 = vadd.xlane.f32.xlu0 %v3729_v14  ;;  %v6073_v6 = vpack.c.bf16 %v4001_v5, %v3999_v59  ;;  %v3815_v37 = vld [vmem:[#allocation2 + $0x10] sm:$0xff]  ;;  %v6075_v14 = vpack.c.bf16 %v4006_v3, %v4004_v62  ;;  %v4034_v47 = vld [vmem:[%s9217_s5 + $0x4d8] sm:$0xff]  ;;  %v4036_v15 = vld [vmem:[%s9217_s5 + $0x4e8] sm:$0xff] }
 0x51c   : > { %v3874_v22 = vmax.f32 %v3866_v11, 0.0  ;;  %v4005_v11 = vld [vmem:[%s9217_s5 + $0x3f0] sm:$0xff]  ;;  %v3865_v29 = vadd.f32 %v3834_v28, %v3815_v37  ;;  %v6103_v32 = vpack.c.bf16 %v4034_v47, %v4032_v4  ;;  %v4035_v62 = vld [vmem:[%s9217_s5 + $0x4e0] sm:$0xff]  ;;  %v4040_v28 = vld [vmem:[%s9217_s5 + $0x508] sm:$0xff] }
 0x51d   : > { %6042 = vmatpush1.bf16.msra.mxu1 %v6041_v41  ;;  %v4003_v41 = vld [vmem:[%s9217_s5 + $0x3e0] sm:$0xff]  ;;  %v4037_v3 = vld [vmem:[%s9217_s5 + $0x4f0] sm:$0xff] }
 0x51e   : > { %4282 = vmatprep.mubr.f32.mxu1 %v3874_v22  ;;  %6044 = vmatprep.subr.bf16.mxu1 %v6043_v1  ;;  %v3818_v1 = vld [vmem:[#allocation2 + $0x28] sm:$0xff]  ;;  %v6077_v35 = vpack.c.bf16 %v4005_v11, %v4003_v41  ;;  %v3873_v16 = vmax.f32 %v3865_v29, 0.0  ;;  %v6109_v37 = vpack.c.bf16 %v4037_v3, %v4035_v62  ;;  %v4041_v41 = vld [vmem:[%s9217_s5 + $0x510] sm:$0xff]  ;;  %v4043_v29 = vld [vmem:[%s9217_s5 + $0x520] sm:$0xff] }
 0x51f   : > { %3736 = vadd.xlane.f32.xlu0 %v3735_v44  ;;  %v3868_v22 = vadd.f32 %v3846_v50, %v3818_v1  ;;  %v4007_v44 = vld [vmem:[%s9217_s5 + $0x400] sm:$0xff]  ;;  %v4044_v11 = vld [vmem:[%s9217_s5 + $0x528] sm:$0xff]  ;;  %v4046_v1 = vld [vmem:[%s9217_s5 + $0x538] sm:$0xff] }
 0x520   : > { %v6115_v12 = vpack.c.bf16 %v4046_v1, %v4044_v11  ;;  %v3817_v4 = vld [vmem:[#allocation2 + $0x20] sm:$0xff] }
 0x521   : > { %6046 = vmatpush1.bf16.msra.mxu1 %v6045_v20  ;;  %v4009_v20 = vld [vmem:[%s9217_s5 + $0x410] sm:$0xff]  ;;  %v3876_v30 = vmax.f32 %v3868_v22, 0.0  ;;  %v4048_v22 = vld [vmem:[%s9217_s5 + $0x548] sm:$0xff] }
 0x522   : > { %6048 = vmatprep.subr.bf16.mxu1 %v6047_v17  ;;  %v4012_v17 = vld [vmem:[%s9217_s5 + $0x428] sm:$0xff]  ;;  %v6081_v36 = vpack.c.bf16 %v4009_v20, %v4007_v44 }
 0x525   : > { %6050 = vmatpush1.bf16.msra.mxu1 %v6049_v46  ;;  %v6083_v46 = vpack.c.bf16 %v4014_v10, %v4012_v17  ;;  %v4047_v17 = vld [vmem:[%s9217_s5 + $0x540] sm:$0xff]  ;;  %v4049_v10 = vld [vmem:[%s9217_s5 + $0x550] sm:$0xff] }
 0x526   : > { %6052 = vmatprep.subr.bf16.mxu1 %v6051_v9  ;;  %v4011_v9 = vld [vmem:[%s9217_s5 + $0x420] sm:$0xff] }
 0x527   : > { %v6085_v23 = vpack.c.bf16 %v4013_v42, %v4011_v9  ;;  %v4051_v9 = vld [vmem:[%s9217_s5 + $0x560] sm:$0xff]  ;;  %v4053_v42 = vld [vmem:[%s9217_s5 + $0x570] sm:$0xff] }
 0x529   : > { %6054 = vmatpush1.bf16.msra.mxu1 %v6053_v63  ;;  %v6087_v63 = vpack.c.bf16 %v4018_v21, %v4016_v0  ;;  %v4056_v0 = vld [vmem:[%s9217_s5 + $0x588] sm:$0xff]  ;;  %v4058_v21 = vld [vmem:[%s9217_s5 + $0x598] sm:$0xff] }
 0x52a   : > { %6056 = vmatprep.subr.bf16.mxu1 %v6055_v33  ;;  %v4015_v33 = vld [vmem:[%s9217_s5 + $0x440] sm:$0xff] }
 0x52b   : > { %v6089_v13 = vpack.c.bf16 %v4017_v52, %v4015_v33  ;;  %v4055_v33 = vld [vmem:[%s9217_s5 + $0x580] sm:$0xff]  ;;  %v4057_v52 = vld [vmem:[%s9217_s5 + $0x590] sm:$0xff] }
 0x52d   : > { %6058 = vmatpush1.bf16.msra.mxu1 %v6057_v24  ;;  %v6091_v24 = vpack.c.bf16 %v4022_v57, %v4020_v49  ;;  %v4060_v49 = vld [vmem:[%s9217_s5 + $0x5a8] sm:$0xff]  ;;  %v4062_v57 = vld [vmem:[%s9217_s5 + $0x5b8] sm:$0xff] }
 0x52e   : > { %6060 = vmatprep.subr.bf16.mxu1 %v6059_v26  ;;  %v4019_v26 = vld [vmem:[%s9217_s5 + $0x460] sm:$0xff] }
 0x52f   : > { %v6093_v8 = vpack.c.bf16 %v4021_v19, %v4019_v26  ;;  %v4059_v26 = vld [vmem:[%s9217_s5 + $0x5a0] sm:$0xff]  ;;  %v4061_v19 = vld [vmem:[%s9217_s5 + $0x5b0] sm:$0xff] }
 0x531   : > { %6062 = vmatpush1.bf16.msra.mxu1 %v6061_v56  ;;  %v6095_v56 = vpack.c.bf16 %v4026_v45, %v4024_v60  ;;  %v4064_v60 = vld [vmem:[%s9217_s5 + $0x5c8] sm:$0xff]  ;;  %v4066_v45 = vld [vmem:[%s9217_s5 + $0x5d8] sm:$0xff] }
 0x532   : > { %6064 = vmatprep.subr.bf16.mxu1 %v6063_v38  ;;  %v4023_v38 = vld [vmem:[%s9217_s5 + $0x480] sm:$0xff] }
 0x533   : > { %v6097_v39 = vpack.c.bf16 %v4025_v53, %v4023_v38  ;;  %v3853_v38 = vsub.s32 7, %v8320_v2  ;;  %v6135_v53 = vpack.c.bf16 %v4066_v45, %v4064_v60  ;;  %v4096_v60 = vld [vmem:[%s9217_s5 + $0x6c8] sm:$0xff]  ;;  %v4098_v45 = vld [vmem:[%s9217_s5 + $0x6d8] sm:$0xff] }
 0x535   : > { %6066 = vmatpush1.bf16.msra.mxu1 %v6065_v48  ;;  %v6099_v48 = vpack.c.bf16 %v4030_v25, %v4028_v31  ;;  %v4063_v31 = vld [vmem:[%s9217_s5 + $0x5c0] sm:$0xff]  ;;  %v4065_v25 = vld [vmem:[%s9217_s5 + $0x5d0] sm:$0xff]  ;;  %v3854_v47 = vrot.slane %v8352_v34, %v3853_v38 }
 0x536   : > { %6068 = vmatprep.subr.bf16.mxu1 %v6067_v55  ;;  %v4027_v55 = vld [vmem:[%s9217_s5 + $0x4a0] sm:$0xff] }
 0x537   : > { %v6101_v27 = vpack.c.bf16 %v4029_v43, %v4027_v55  ;;  %v6137_v43 = vpack.c.bf16 %v4065_v25, %v4063_v31  ;;  %v6167_v31 = vpack.c.bf16 %v4098_v45, %v4096_v60  ;;  %v4095_v25 = vld [vmem:[%s9217_s5 + $0x6c0] sm:$0xff]  ;;  %v3814_v45 = vld [vmem:[#allocation2 + $0x8] sm:$0xff] }
 0x539   : > { %6070 = vmatpush1.bf16.msra.mxu1 %v6069_v58  ;;  %v4033_v58 = vld [vmem:[%s9217_s5 + $0x4d0] sm:$0xff] }
 0x53a   : > { %6072 = vmatprep.subr.bf16.mxu1 %v6071_v61  ;;  %v4038_v61 = vld [vmem:[%s9217_s5 + $0x4f8] sm:$0xff]  ;;  %v6105_v59 = vpack.c.bf16 %v4033_v58, %v4031_v51  ;;  %v4069_v51 = vld [vmem:[%s9217_s5 + $0x5f0] sm:$0xff] }
 0x53b   : > { %v6107_v5 = vpack.c.bf16 %v4038_v61, %v4036_v15  ;;  %v3820_v58 = vld [vmem:[#allocation2 + $0x38] sm:$0xff]  ;;  %v4072_v15 = vld [vmem:[%s9217_s5 + $0x608] sm:$0xff] }
 0x53c   : > { %v4074_v61 = vld [vmem:[%s9217_s5 + $0x618] sm:$0xff]  ;;  %v3870_v62 = vadd.f32 %v3854_v47, %v3820_v58  ;;  %v4101_v58 = vld [vmem:[%s9217_s5 + $0x6f0] sm:$0xff] }
 0x53d   : > { %6074 = vmatpush1.bf16.msra.mxu1 %v6073_v6  ;;  %v4042_v6 = vld [vmem:[%s9217_s5 + $0x518] sm:$0xff]  ;;  %v6143_v3 = vpack.c.bf16 %v4074_v61, %v4072_v15  ;;  %v4104_v61 = vld [vmem:[%s9217_s5 + $0x708] sm:$0xff] }
 0x53e   : > { %6076 = vmatprep.subr.bf16.mxu1 %v6075_v14  ;;  %v6111_v50 = vpack.c.bf16 %v4042_v6, %v4040_v28  ;;  %v4039_v14 = vld [vmem:[%s9217_s5 + $0x500] sm:$0xff]  ;;  %v4073_v6 = vld [vmem:[%s9217_s5 + $0x610] sm:$0xff]  ;;  %v3878_v11 = vmax.f32 %v3870_v62, 0.0 }
 0x53f   : > { %v6113_v54 = vpack.c.bf16 %v4041_v41, %v4039_v14  ;;  %v4071_v28 = vld [vmem:[%s9217_s5 + $0x600] sm:$0xff] }
 0x540   : > { %v6145_v41 = vpack.c.bf16 %v4073_v6, %v4071_v28  ;;  %v4103_v6 = vld [vmem:[%s9217_s5 + $0x700] sm:$0xff] }
 0x541   : > { %6078 = vmatpush1.bf16.msra.mxu1 %v6077_v35  ;;  %v4045_v35 = vld [vmem:[%s9217_s5 + $0x530] sm:$0xff] }
 0x542   : > { %6080 = vmatprep.subr.bf16.mxu1 %v6079_v18  ;;  %v4050_v18 = vld [vmem:[%s9217_s5 + $0x558] sm:$0xff]  ;;  %v6117_v44 = vpack.c.bf16 %v4045_v35, %v4043_v29  ;;  %v4080_v29 = vld [vmem:[%s9217_s5 + $0x648] sm:$0xff] }
 0x543   : > { %v6119_v20 = vpack.c.bf16 %v4050_v18, %v4048_v22  ;;  %v4082_v35 = vld [vmem:[%s9217_s5 + $0x658] sm:$0xff] }
 0x544   : > { %4283 = vmatmul.mubr.f32.vlgmr.msra.gmra.mrb[0].mxu1 %v3873_v16  ;;  %v4052_v16 = vld [vmem:[%s9217_s5 + $0x568] sm:$0xff]  ;;  %v6151_v18 = vpack.c.bf16 %v4082_v35, %v4080_v29  ;;  %v4107_v29 = vld [vmem:[%s9217_s5 + $0x720] sm:$0xff]  ;;  %v4109_v35 = vld [vmem:[%s9217_s5 + $0x730] sm:$0xff] }
 0x545   : > { %6082 = vmatpush1.bf16.msra.mxu1 %v6081_v36  ;;  %4353 = vmatprep.mubr.f32.mxu1 %v3876_v30  ;;  %v4054_v36 = vld [vmem:[%s9217_s5 + $0x578] sm:$0xff]  ;;  %v6121_v30 = vpack.c.bf16 %v4049_v10, %v4047_v17  ;;  %v4084_v17 = vld [vmem:[%s9217_s5 + $0x668] sm:$0xff] }
 0x546   : > { %6084 = vmatprep.subr.bf16.mxu1 %v6083_v46  ;;  %v6123_v46 = vpack.c.bf16 %v4054_v36, %v4052_v16  ;;  %v4086_v10 = vld [vmem:[%s9217_s5 + $0x678] sm:$0xff] }
 0x547   : > { %v6155_v36 = vpack.c.bf16 %v4086_v10, %v4084_v17  ;;  %v6181_v10 = vpack.c.bf16 %v4109_v35, %v4107_v29  ;;  %v4132_v35 = vld [vmem:[%s9217_s5 + $0x7e8] sm:$0xff] }
 0x549   : > { %6086 = vmatpush1.bf16.msra.mxu1 %v6085_v23  ;;  %v6125_v23 = vpack.c.bf16 %v4053_v42, %v4051_v9  ;;  %v4088_v9 = vld [vmem:[%s9217_s5 + $0x688] sm:$0xff]  ;;  %v4090_v42 = vld [vmem:[%s9217_s5 + $0x698] sm:$0xff] }
 0x54a   : > { %6088 = vmatprep.subr.bf16.mxu1 %v6087_v63  ;;  %v6127_v63 = vpack.c.bf16 %v4058_v21, %v4056_v0  ;;  %v6159_v21 = vpack.c.bf16 %v4090_v42, %v4088_v9  ;;  %v4116_v9 = vld [vmem:[%s9217_s5 + $0x768] sm:$0xff]  ;;  %v4118_v42 = vld [vmem:[%s9217_s5 + $0x778] sm:$0xff] }
 0x54d   : > { %6090 = vmatpush1.bf16.msra.mxu1 %v6089_v13  ;;  %v6129_v13 = vpack.c.bf16 %v4057_v52, %v4055_v33  ;;  %v4092_v33 = vld [vmem:[%s9217_s5 + $0x6a8] sm:$0xff]  ;;  %v4094_v52 = vld [vmem:[%s9217_s5 + $0x6b8] sm:$0xff] }
 0x54e   : > { %6092 = vmatprep.subr.bf16.mxu1 %v6091_v24  ;;  %v6131_v24 = vpack.c.bf16 %v4062_v57, %v4060_v49  ;;  %v3701_v49 = vpop.xlane.xlu1 %3700  ;;  %v3695_v57 = vpop.xlane.xlu0 %3694 }
 0x551   : > { %6094 = vmatpush1.bf16.msra.mxu1 %v6093_v8  ;;  %v3841_v8 = vsub.s32 4, %v8320_v2 }
 0x552   : > { %6096 = vmatprep.subr.bf16.mxu1 %v6095_v56  ;;  %v6133_v56 = vpack.c.bf16 %v4061_v19, %v4059_v26  ;;  %v4091_v26 = vld [vmem:[%s9217_s5 + $0x6a0] sm:$0xff]  ;;  %v4093_v19 = vld [vmem:[%s9217_s5 + $0x6b0] sm:$0xff] }
 0x553   : > { %v3842_v55 = vrot.slane %v8352_v34, %v3841_v8  ;;  %v3704_v8 = vpop.xlane.xlu1 %3703 }
 0x554   : > { %v5931_v47 = vpack.c.bf16 %v3704_v8, %v3701_v49  ;;  %v4117_v49 = vld [vmem:[%s9217_s5 + $0x770] sm:$0xff] }
 0x555   : > { %6098 = vmatpush1.bf16.msra.mxu1 %v6097_v39  ;;  %v4068_v39 = vld [vmem:[%s9217_s5 + $0x5e8] sm:$0xff] }
 0x556   : > { %6100 = vmatprep.subr.bf16.mxu1 %v6099_v48  ;;  %v4070_v48 = vld [vmem:[%s9217_s5 + $0x5f8] sm:$0xff] }
 0x559   : > { %6102 = vmatpush1.bf16.msra.mxu1 %v6101_v27  ;;  %v6139_v27 = vpack.c.bf16 %v4070_v48, %v4068_v39  ;;  %v4097_v39 = vld [vmem:[%s9217_s5 + $0x6d0] sm:$0xff]  ;;  %v4100_v48 = vld [vmem:[%s9217_s5 + $0x6e8] sm:$0xff] }
 0x55a   : > { %6104 = vmatprep.subr.bf16.mxu1 %v6103_v32  ;;  %v4067_v32 = vld [vmem:[%s9217_s5 + $0x5e0] sm:$0xff] }
 0x55d   : > { %6106 = vmatpush1.bf16.msra.mxu1 %v6105_v59  ;;  %v3867_v59 = vadd.f32 %v3842_v55, %v3817_v4  ;;  %v4102_v55 = vld [vmem:[%s9217_s5 + $0x6f8] sm:$0xff] }
 0x55e   : > { %6108 = vmatprep.subr.bf16.mxu1 %v6107_v5  ;;  %v6141_v5 = vpack.c.bf16 %v4069_v51, %v4067_v32  ;;  %v6171_v32 = vpack.c.bf16 %v4102_v55, %v4100_v48  ;;  %v4099_v51 = vld [vmem:[%s9217_s5 + $0x6e0] sm:$0xff]  ;;  %v4124_v48 = vld [vmem:[%s9217_s5 + $0x7a8] sm:$0xff]  ;;  %v4126_v55 = vld [vmem:[%s9217_s5 + $0x7b8] sm:$0xff] }
 0x55f   : > { %v3875_v14 = vmax.f32 %v3867_v59, 0.0  ;;  %v4106_v59 = vld [vmem:[%s9217_s5 + $0x718] sm:$0xff] }
 0x560   : > { %v6175_v28 = vpack.c.bf16 %v4106_v59, %v4104_v61  ;;  %v4125_v61 = vld [vmem:[%s9217_s5 + $0x7b0] sm:$0xff] }
 0x561   : > { %6110 = vmatpush1.bf16.msra.mxu1 %v6109_v37  ;;  %v4076_v37 = vld [vmem:[%s9217_s5 + $0x628] sm:$0xff] }
 0x562   : > { %6112 = vmatprep.subr.bf16.mxu1 %v6111_v50  ;;  %v4078_v50 = vld [vmem:[%s9217_s5 + $0x638] sm:$0xff] }
 0x563   : > { %v6147_v1 = vpack.c.bf16 %v4078_v50, %v4076_v37  ;;  %v4105_v37 = vld [vmem:[%s9217_s5 + $0x710] sm:$0xff] }
 0x565   : > { %6114 = vmatpush1.bf16.msra.mxu1 %v6113_v54  ;;  %v4075_v54 = vld [vmem:[%s9217_s5 + $0x620] sm:$0xff] }
 0x566   : > { %6116 = vmatprep.subr.bf16.mxu1 %v6115_v12  ;;  %v4077_v12 = vld [vmem:[%s9217_s5 + $0x630] sm:$0xff] }
 0x567   : > { %v6149_v22 = vpack.c.bf16 %v4077_v12, %v4075_v54  ;;  %v6177_v54 = vpack.c.bf16 %v4105_v37, %v4103_v6  ;;  %v3883_v6 = vld [vmem:[%s9217_s5 + $0x20] sm:$0xff]  ;;  %v3885_v37 = vld [vmem:[%s9217_s5 + $0x30] sm:$0xff] }
 0x568   : > { %v5957_v29 = vpack.c.bf16 %v3885_v37, %v3883_v6 }
 0x569   : > { %6118 = vmatpush1.bf16.msra.mxu1 %v6117_v44  ;;  %v4079_v44 = vld [vmem:[%s9217_s5 + $0x640] sm:$0xff] }
 0x56a   : > { %6120 = vmatprep.subr.bf16.mxu1 %v6119_v20  ;;  %v4081_v20 = vld [vmem:[%s9217_s5 + $0x650] sm:$0xff] }
 0x56b   : > { %v6153_v16 = vpack.c.bf16 %v4081_v20, %v4079_v44  ;;  %v4114_v44 = vld [vmem:[%s9217_s5 + $0x758] sm:$0xff] }
 0x56d   : > { %6122 = vmatpush1.bf16.msra.mxu1 %v6121_v30  ;;  %v4083_v30 = vld [vmem:[%s9217_s5 + $0x660] sm:$0xff] }
 0x56e   : > { %6124 = vmatprep.subr.bf16.mxu1 %v6123_v46  ;;  %v4085_v46 = vld [vmem:[%s9217_s5 + $0x670] sm:$0xff] }
 0x56f   : > { %v6157_v0 = vpack.c.bf16 %v4085_v46, %v4083_v30  ;;  %v4113_v30 = vld [vmem:[%s9217_s5 + $0x750] sm:$0xff] }
 0x571   : > { %6126 = vmatpush1.bf16.msra.mxu1 %v6125_v23  ;;  %v4087_v23 = vld [vmem:[%s9217_s5 + $0x680] sm:$0xff] }
 0x572   : > { %6128 = vmatprep.subr.bf16.mxu1 %v6127_v63  ;;  %v4089_v63 = vld [vmem:[%s9217_s5 + $0x690] sm:$0xff] }
 0x575   : > { %6130 = vmatpush1.bf16.msra.mxu1 %v6129_v13  ;;  %v6161_v13 = vpack.c.bf16 %v4089_v63, %v4087_v23 }
 0x576   : > { %6132 = vmatprep.subr.bf16.mxu1 %v6131_v24  ;;  %v6163_v24 = vpack.c.bf16 %v4094_v52, %v4092_v33  ;;  %v6187_v33 = vpack.c.bf16 %v4118_v42, %v4116_v9  ;;  %v4115_v52 = vld [vmem:[%s9217_s5 + $0x760] sm:$0xff] }
 0x577   : > { %v6189_v8 = vpack.c.bf16 %v4117_v49, %v4115_v52  ;;  %v3896_v52 = vld [vmem:[%s9217_s5 + $0x88] sm:$0xff]  ;;  %v3898_v49 = vld [vmem:[%s9217_s5 + $0x98] sm:$0xff] }
 0x579   : > { %6134 = vmatpush1.bf16.msra.mxu1 %v6133_v56  ;;  %v3698_v56 = vpop.xlane.xlu0 %3697 }
 0x57a   : > { %6136 = vmatprep.subr.bf16.mxu1 %v6135_v53  ;;  %v5928_v38 = vpack.c.bf16 %v3698_v56, %v3695_v57  ;;  %v6165_v53 = vpack.c.bf16 %v4093_v19, %v4091_v26  ;;  %v3880_v56 = vld [vmem:[%s9217_s5 + $0x8] sm:$0xff] }
 0x57c   : > { %5929 = vmatpush3.bf16.msra.mxu0 %v5928_v38  ;;  %v3882_v38 = vld [vmem:[%s9217_s5 + $0x18] sm:$0xff] }
 0x57d   : > { %6138 = vmatpush1.bf16.msra.mxu1 %v6137_v43  ;;  %5930 = vmatprep.subr.bf16.mxu0 %v6481_v7  ;;  %v3710_v43 = vpop.xlane.xlu1 %3709  ;;  %v3707_v4 = vpop.xlane.xlu0 %3706 }
 0x57e   : > { %6140 = vmatprep.subr.bf16.mxu1 %v6139_v27  ;;  %v6169_v27 = vpack.c.bf16 %v4097_v39, %v4095_v25  ;;  %v5934_v15 = vpack.c.bf16 %v3710_v43, %v3707_v4  ;;  %v4121_v25 = vld [vmem:[%s9217_s5 + $0x790] sm:$0xff]  ;;  %v5951_v4 = vpack.c.bf16 %v3882_v38, %v3880_v56  ;;  %v3899_v38 = vld [vmem:[%s9217_s5 + $0xa0] sm:$0xff] }
 0x580   : > { %5932 = vmatpush3.bf16.msra.mxu0 %v5931_v47  ;;  %v3879_v47 = vld [vmem:[%s9217_s5] sm:$0xff] }
 0x581   : > { %6142 = vmatpush1.bf16.msra.mxu1 %v6141_v5  ;;  %5933 = vmatprep.subr.bf16.mxu0 %v6481_v7  ;;  %v3716_v5 = vpop.xlane.xlu1 %3715  ;;  %v3713_v62 = vpop.xlane.xlu0 %3712 }
 0x582   : > { %6144 = vmatprep.subr.bf16.mxu1 %v6143_v3  ;;  %v6173_v3 = vpack.c.bf16 %v4101_v58, %v4099_v51  ;;  %v5937_v50 = vpack.c.bf16 %v3716_v5, %v3713_v62  ;;  %v3884_v51 = vld [vmem:[%s9217_s5 + $0x28] sm:$0xff]  ;;  %v3886_v58 = vld [vmem:[%s9217_s5 + $0x38] sm:$0xff] }
 0x583   : > { %v4128_v5 = vld [vmem:[%s9217_s5 + $0x7c8] sm:$0xff]  ;;  %v4130_v62 = vld [vmem:[%s9217_s5 + $0x7d8] sm:$0xff] }
 0x584   : > { %4354 = vmatmul.mubr.f32.vlgmr.msra.gmra.mrb[0].mxu1 %v3875_v14  ;;  %5935 = vmatpush3.bf16.msra.mxu0 %v5934_v15  ;;  %v4108_v14 = vld [vmem:[%s9217_s5 + $0x728] sm:$0xff]  ;;  %v4123_v15 = vld [vmem:[%s9217_s5 + $0x7a0] sm:$0xff] }
 0x585   : > { %6146 = vmatpush1.bf16.msra.mxu1 %v6145_v41  ;;  %4424 = vmatprep.mubr.f32.mxu1 %v3878_v11  ;;  %v4110_v41 = vld [vmem:[%s9217_s5 + $0x738] sm:$0xff]  ;;  %v3722_v11 = vpop.xlane.xlu1 %3721 }
 0x586   : > { %6148 = vmatprep.subr.bf16.mxu1 %v6147_v1  ;;  %5936 = vmatprep.subr.bf16.mxu0 %v6481_v7  ;;  %v3719_v1 = vpop.xlane.xlu0 %3718  ;;  %v6179_v12 = vpack.c.bf16 %v4110_v41, %v4108_v14  ;;  %v6197_v14 = vpack.c.bf16 %v4125_v61, %v4123_v15  ;;  %v3888_v41 = vld [vmem:[%s9217_s5 + $0x48] sm:$0xff]  ;;  %v3914_v15 = vld [vmem:[%s9217_s5 + $0x118] sm:$0xff] }
 0x588   : > { %5938 = vmatpush3.bf16.msra.mxu0 %v5937_v50  ;;  %v3849_v50 = vsub.s32 6, %v8320_v2 }
 0x589   : > { %6150 = vmatpush1.bf16.msra.mxu1 %v6149_v22  ;;  %v5940_v22 = vpack.c.bf16 %v3722_v11, %v3719_v1  ;;  %5939 = vmatprep.subr.bf16.mxu0 %v6481_v7  ;;  %v3728_v20 = vpop.xlane.xlu1 %3727  ;;  %v3890_v11 = vld [vmem:[%s9217_s5 + $0x58] sm:$0xff]  ;;  %v6199_v1 = vpack.c.bf16 %v4130_v62, %v4128_v5  ;;  %v3911_v5 = vld [vmem:[%s9217_s5 + $0x100] sm:$0xff]  ;;  %v3913_v62 = vld [vmem:[%s9217_s5 + $0x110] sm:$0xff] }
 0x58a   : > { %6152 = vmatprep.subr.bf16.mxu1 %v6151_v18  ;;  %v4112_v18 = vld [vmem:[%s9217_s5 + $0x748] sm:$0xff]  ;;  %v5985_v6 = vpack.c.bf16 %v3913_v62, %v3911_v5  ;;  %v4453_v5 = vld [vmem:[%s9219_s7 + $0xa0] sm:$0xff] }
 0x58b   : > { %v4454_v62 = vld [vmem:[%s9219_s7 + $0xa8] sm:$0xff] }
 0x58c   : > { %5941 = vmatpush3.bf16.msra.mxu0 %v5940_v22  ;;  %v5959_v22 = vpack.c.bf16 %v3890_v11, %v3888_v41  ;;  %v3920_v41 = vld [vmem:[%s9217_s5 + $0x148] sm:$0xff]  ;;  %v3922_v11 = vld [vmem:[%s9217_s5 + $0x158] sm:$0xff] }
 0x58d   : > { %6154 = vmatpush1.bf16.msra.mxu1 %v6153_v16  ;;  %v6183_v16 = vpack.c.bf16 %v4114_v44, %v4112_v18  ;;  %5942 = vmatprep.subr.bf16.mxu0 %v6481_v7  ;;  %v3887_v18 = vld [vmem:[%s9217_s5 + $0x40] sm:$0xff]  ;;  %v3889_v44 = vld [vmem:[%s9217_s5 + $0x50] sm:$0xff] }
 0x58e   : > { %6156 = vmatprep.subr.bf16.mxu1 %v6155_v36  ;;  %v4111_v36 = vld [vmem:[%s9217_s5 + $0x740] sm:$0xff]  ;;  %v5961_v9 = vpack.c.bf16 %v3889_v44, %v3887_v18 }
 0x58f   : > { %v6185_v63 = vpack.c.bf16 %v4113_v30, %v4111_v36  ;;  %v3819_v36 = vld [vmem:[#allocation2 + $0x30] sm:$0xff]  ;;  %v3923_v44 = vld [vmem:[%s9217_s5 + $0x160] sm:$0xff] }
 0x591   : > { %6158 = vmatpush1.bf16.msra.mxu1 %v6157_v0  ;;  %v3829_v0 = vsub.s32 1, %v8320_v2 }
 0x592   : > { %6160 = vmatprep.subr.bf16.mxu1 %v6159_v21  ;;  %v3734_v21 = vpop.xlane.xlu1 %3733 }
 0x593   : > { %v3830_v26 = vrot.slane %v8352_v34, %v3829_v0 }
 0x595   : > { %6162 = vmatpush1.bf16.msra.mxu1 %v6161_v13  ;;  %v4120_v13 = vld [vmem:[%s9217_s5 + $0x788] sm:$0xff]  ;;  %v3864_v43 = vadd.f32 %v3830_v26, %v3814_v45  ;;  %v3895_v26 = vld [vmem:[%s9217_s5 + $0x80] sm:$0xff]  ;;  %v3902_v45 = vld [vmem:[%s9217_s5 + $0xb8] sm:$0xff] }
 0x596   : > { %6164 = vmatprep.subr.bf16.mxu1 %v6163_v24  ;;  %v4122_v24 = vld [vmem:[%s9217_s5 + $0x798] sm:$0xff]  ;;  %v3740_v19 = vpop.xlane.xlu1 %3739 }
 0x599   : > { %6166 = vmatpush1.bf16.msra.mxu1 %v6165_v53  ;;  %v6191_v53 = vpack.c.bf16 %v4122_v24, %v4120_v13  ;;  %v5967_v24 = vpack.c.bf16 %v3898_v49, %v3896_v52  ;;  %v3938_v52 = vld [vmem:[%s9217_s5 + $0x1d8] sm:$0xff]  ;;  %v3825_v49 = vsub.s32 0, %v8320_v2 }
 0x59a   : > { %6168 = vmatprep.subr.bf16.mxu1 %v6167_v31  ;;  %v4119_v31 = vld [vmem:[%s9217_s5 + $0x780] sm:$0xff] }
 0x59d   : > { %6170 = vmatpush1.bf16.msra.mxu1 %v6169_v27  ;;  %v3881_v27 = vld [vmem:[%s9217_s5 + $0x10] sm:$0xff] }
 0x59e   : > { %6172 = vmatprep.subr.bf16.mxu1 %v6171_v32  ;;  %v6193_v32 = vpack.c.bf16 %v4121_v25, %v4119_v31  ;;  %v5953_v59 = vpack.c.bf16 %v3881_v27, %v3879_v47  ;;  %v3904_v31 = vld [vmem:[%s9217_s5 + $0xc8] sm:$0xff]  ;;  %v3906_v25 = vld [vmem:[%s9217_s5 + $0xd8] sm:$0xff] }
 0x59f   : > { %v3910_v47 = vld [vmem:[%s9217_s5 + $0xf8] sm:$0xff] }
 0x5a1   : > { %6174 = vmatpush1.bf16.msra.mxu1 %v6173_v3  ;;  %v3872_v3 = vmax.f32 %v3864_v43, 0.0  ;;  %v3905_v43 = vld [vmem:[%s9217_s5 + $0xd0] sm:$0xff] }
 0x5a2   : > { %6176 = vmatprep.subr.bf16.mxu1 %v6175_v28  ;;  %v5955_v28 = vpack.c.bf16 %v3886_v58, %v3884_v51  ;;  %v3907_v51 = vld [vmem:[%s9217_s5 + $0xe0] sm:$0xff]  ;;  %v3909_v58 = vld [vmem:[%s9217_s5 + $0xf0] sm:$0xff] }
 0x5a3   : > { %v5981_v61 = vpack.c.bf16 %v3909_v58, %v3907_v51  ;;  %v4451_v51 = vld [vmem:[%s9219_s7 + $0x90] sm:$0xff]  ;;  %v4452_v58 = vld [vmem:[%s9219_s7 + $0x98] sm:$0xff] }
 0x5a4   : > { %v3725_v17 = vpop.xlane.xlu0 %3724 }
 0x5a5   : > { %6178 = vmatpush1.bf16.msra.mxu1 %v6177_v54  ;;  %v5943_v46 = vpack.c.bf16 %v3728_v20, %v3725_v17  ;;  %v4127_v54 = vld [vmem:[%s9217_s5 + $0x7c0] sm:$0xff]  ;;  %v3850_v20 = vrot.slane %v8352_v34, %v3849_v50  ;;  %v4133_v34 = vld [vmem:[%s9217_s5 + $0x7f0] sm:$0xff] }
 0x5a6   : > { %6180 = vmatprep.subr.bf16.mxu1 %v6179_v12  ;;  %v4129_v12 = vld [vmem:[%s9217_s5 + $0x7d0] sm:$0xff]  ;;  %v3915_v50 = vld [vmem:[%s9217_s5 + $0x120] sm:$0xff] }
 0x5a7   : > { %5944 = vmatpush3.bf16.msra.mxu0 %v5943_v46  ;;  %v6201_v17 = vpack.c.bf16 %v4129_v12, %v4127_v54  ;;  %v4131_v46 = vld [vmem:[%s9217_s5 + $0x7e0] sm:$0xff]  ;;  %v5991_v54 = vpack.c.bf16 %v3922_v11, %v3920_v41 }
 0x5a8   : > { %v3731_v23 = vpop.xlane.xlu0 %3730  ;;  %5945 = vmatprep.subr.bf16.mxu0 %v6481_v7  ;;  %v3919_v12 = vld [vmem:[%s9217_s5 + $0x140] sm:$0xff] }
 0x5a9   : > { %6182 = vmatpush1.bf16.msra.mxu1 %v6181_v10  ;;  %v5946_v57 = vpack.c.bf16 %v3734_v21, %v3731_v23  ;;  %v3892_v10 = vld [vmem:[%s9217_s5 + $0x68] sm:$0xff]  ;;  %v3891_v21 = vld [vmem:[%s9217_s5 + $0x60] sm:$0xff]  ;;  %v3893_v23 = vld [vmem:[%s9217_s5 + $0x70] sm:$0xff] }
 0x5aa   : > { %6184 = vmatprep.subr.bf16.mxu1 %v6183_v16  ;;  %v3894_v16 = vld [vmem:[%s9217_s5 + $0x78] sm:$0xff] }
 0x5ab   : > { %5947 = vmatpush3.bf16.msra.mxu0 %v5946_v57  ;;  %v5963_v42 = vpack.c.bf16 %v3894_v16, %v3892_v10  ;;  %v5965_v57 = vpack.c.bf16 %v3893_v23, %v3891_v21  ;;  %v3930_v10 = vld [vmem:[%s9217_s5 + $0x198] sm:$0xff]  ;;  %v3931_v23 = vld [vmem:[%s9217_s5 + $0x1a0] sm:$0xff] }
 0x5ac   : > { %v3737_v60 = vpop.xlane.xlu0 %3736  ;;  %5948 = vmatprep.subr.bf16.mxu0 %v6481_v7  ;;  %v6195_v7 = vpack.c.bf16 %v4126_v55, %v4124_v48  ;;  %v5975_v48 = vpack.c.bf16 %v3906_v25, %v3904_v31  ;;  %v3903_v55 = vld [vmem:[%s9217_s5 + $0xc0] sm:$0xff]  ;;  %v3941_v25 = vld [vmem:[%s9217_s5 + $0x1f0] sm:$0xff] }
 0x5ad   : > { %6186 = vmatpush1.bf16.msra.mxu1 %v6185_v63  ;;  %v5949_v39 = vpack.c.bf16 %v3740_v19, %v3737_v60  ;;  %v3869_v63 = vadd.f32 %v3850_v20, %v3819_v36  ;;  %v3897_v19 = vld [vmem:[%s9217_s5 + $0x90] sm:$0xff]  ;;  %v3900_v60 = vld [vmem:[%s9217_s5 + $0xa8] sm:$0xff]  ;;  %v5977_v27 = vpack.c.bf16 %v3905_v43, %v3903_v55  ;;  %v3939_v31 = vld [vmem:[%s9217_s5 + $0x1e0] sm:$0xff] }
 0x5ae   : > { %6188 = vmatprep.subr.bf16.mxu1 %v6187_v33  ;;  %v6205_v33 = vpack.c.bf16 %v4133_v34, %v4131_v46  ;;  %v5971_v56 = vpack.c.bf16 %v3902_v45, %v3900_v60  ;;  %v3925_v20 = vld [vmem:[%s9217_s5 + $0x170] sm:$0xff]  ;;  %v3932_v34 = vld [vmem:[%s9217_s5 + $0x1a8] sm:$0xff]  ;;  %v3942_v60 = vld [vmem:[%s9217_s5 + $0x1f8] sm:$0xff] }
 0x5af   : > { %5950 = vmatpush3.bf16.msra.mxu0 %v5949_v39  ;;  %v3877_v13 = vmax.f32 %v3869_v63, 0.0  ;;  %v5997_v16 = vpack.c.bf16 %v3925_v20, %v3923_v44  ;;  %v3929_v46 = vld [vmem:[%s9217_s5 + $0x190] sm:$0xff]  ;;  %v6414_v45 = vld [vmem:[%s9216_s4] sm:$0xff]  ;;  %v4460_v20 = vld [vmem:[%s9219_s7 + $0xd8] sm:$0xff] }
 0x5b0   : > { %5952 = vmatprep.subr.bf16.mxu0 %v5951_v4  ;;  %v3908_v4 = vld [vmem:[%s9217_s5 + $0xe8] sm:$0xff]  ;;  %v3933_v63 = vld [vmem:[%s9217_s5 + $0x1b0] sm:$0xff]  ;;  %v4449_v43 = vld [vmem:[%s9219_s7 + $0x80] sm:$0xff] }
 0x5b1   : > { %6190 = vmatpush1.bf16.msra.mxu1 %v6189_v8  ;;  %v5969_v8 = vpack.c.bf16 %v3897_v19, %v3895_v26  ;;  %v3937_v26 = vld [vmem:[%s9217_s5 + $0x1d0] sm:$0xff]  ;;  %v3940_v19 = vld [vmem:[%s9217_s5 + $0x1e8] sm:$0xff] }
 0x5b2   : > { %6192 = vmatprep.subr.bf16.mxu1 %v6191_v53  ;;  %4773 = vmatmul.mubr.f32.vlgmr.msra.gmra.mrb[0].mxu0 %v6973_v40  ;;  %v4134_v40 = vld [vmem:[%s9217_s5 + $0x7f8] sm:$0xff]  ;;  %v3901_v53 = vld [vmem:[%s9217_s5 + $0xb0] sm:$0xff] }
 0x5b3   : > { %5954 = vmatpush1.bf16.msra.mxu0 %v5953_v59  ;;  %4211 = vmatprep.mubr.f32.mxu0 %v3872_v3  ;;  %v6203_v30 = vpack.c.bf16 %v4134_v40, %v4132_v35  ;;  %v5973_v39 = vpack.c.bf16 %v3901_v53, %v3899_v38  ;;  %v3916_v3 = vld [vmem:[%s9217_s5 + $0x128] sm:$0xff]  ;;  %v3926_v40 = vld [vmem:[%s9217_s5 + $0x178] sm:$0xff]  ;;  %v3813_v38 = vld [vmem:[#allocation2] sm:$0xff]  ;;  %v6011_v53 = vpack.c.bf16 %v3942_v60, %v3940_v19 }
 0x5b4   : > { %5956 = vmatprep.subr.bf16.mxu0 %v5955_v28  ;;  %v3918_v28 = vld [vmem:[%s9217_s5 + $0x138] sm:$0xff]  ;;  %v3924_v35 = vld [vmem:[%s9217_s5 + $0x168] sm:$0xff]  ;;  %v4459_v44 = vld [vmem:[%s9219_s7 + $0xd0] sm:$0xff] }
 0x5b5   : > { %6194 = vmatpush1.bf16.msra.mxu1 %v6193_v32  ;;  %v5979_v32 = vpack.c.bf16 %v3910_v47, %v3908_v4  ;;  %v5987_v37 = vpack.c.bf16 %v3918_v28, %v3916_v3  ;;  %v5995_v18 = vpack.c.bf16 %v3926_v40, %v3924_v35  ;;  %v4450_v4 = vld [vmem:[%s9219_s7 + $0x88] sm:$0xff]  ;;  %v4433_v47 = vld [vmem:[%s9219_s7] sm:$0xff]  ;;  %v6215_v28 = vpack.c.bf16 %v4454_v62, %v4453_v5 }
 0x5b6   : > { %6196 = vmatprep.subr.bf16.mxu1 %v6195_v7  ;;  %v3912_v7 = vld [vmem:[%s9217_s5 + $0x108] sm:$0xff] }
 0x5b7   : > { %5958 = vmatpush1.bf16.msra.mxu0 %v5957_v29  ;;  %v5983_v59 = vpack.c.bf16 %v3914_v15, %v3912_v7  ;;  %v3921_v29 = vld [vmem:[%s9217_s5 + $0x150] sm:$0xff]  ;;  %v6211_v15 = vpack.c.bf16 %v4452_v58, %v4451_v51 }
 0x5b8   : > { %5960 = vmatprep.subr.bf16.mxu0 %v5959_v22  ;;  %v5993_v22 = vpack.c.bf16 %v3921_v29, %v3919_v12  ;;  %v4457_v12 = vld [vmem:[%s9219_s7 + $0xc0] sm:$0xff]  ;;  %v4458_v29 = vld [vmem:[%s9219_s7 + $0xc8] sm:$0xff] }
 0x5b9   : > { %6198 = vmatpush1.bf16.msra.mxu1 %v6197_v14  ;;  %v3917_v14 = vld [vmem:[%s9217_s5 + $0x130] sm:$0xff]  ;;  %v6223_v40 = vpack.c.bf16 %v4458_v29, %v4457_v12 }
 0x5ba   : > { %6200 = vmatprep.subr.bf16.mxu1 %v6199_v1  ;;  %v5989_v1 = vpack.c.bf16 %v3917_v14, %v3915_v50  ;;  %v4455_v50 = vld [vmem:[%s9219_s7 + $0xb0] sm:$0xff]  ;;  %v4456_v14 = vld [vmem:[%s9219_s7 + $0xb8] sm:$0xff] }
 0x5bb   : > { %5962 = vmatpush1.bf16.msra.mxu0 %v5961_v9  ;;  %v3934_v9 = vld [vmem:[%s9217_s5 + $0x1b8] sm:$0xff]  ;;  %v6219_v11 = vpack.c.bf16 %v4456_v14, %v4455_v50 }
 0x5bc   : > { %5964 = vmatprep.subr.bf16.mxu0 %v5963_v42  ;;  %v6003_v21 = vpack.c.bf16 %v3934_v9, %v3932_v34  ;;  %v4462_v34 = vld [vmem:[%s9219_s7 + $0xe8] sm:$0xff] }
 0x5bd   : > { %6202 = vmatpush1.bf16.msra.mxu1 %v6201_v17  ;;  %v3928_v17 = vld [vmem:[%s9217_s5 + $0x188] sm:$0xff] }
 0x5be   : > { %6204 = vmatprep.subr.bf16.mxu1 %v6203_v30  ;;  %v5999_v36 = vpack.c.bf16 %v3930_v10, %v3928_v17  ;;  %v3927_v30 = vld [vmem:[%s9217_s5 + $0x180] sm:$0xff]  ;;  %v6227_v10 = vpack.c.bf16 %v4460_v20, %v4459_v44 }
 0x5bf   : > { %5966 = vmatpush1.bf16.msra.mxu0 %v5965_v57  ;;  %v6001_v42 = vpack.c.bf16 %v3929_v46, %v3927_v30  ;;  %v6005_v57 = vpack.c.bf16 %v3933_v63, %v3931_v23  ;;  %v4461_v46 = vld [vmem:[%s9219_s7 + $0xe0] sm:$0xff]  ;;  %v4463_v63 = vld [vmem:[%s9219_s7 + $0xf0] sm:$0xff] }
 0x5c0   : > { %5968 = vmatprep.subr.bf16.mxu0 %v5967_v24  ;;  %v3935_v24 = vld [vmem:[%s9217_s5 + $0x1c0] sm:$0xff]  ;;  %v6231_v9 = vpack.c.bf16 %v4462_v34, %v4461_v46 }
 0x5c1   : > { %6206 = vmatpush1.bf16.msra.mxu1 %v6205_v33  ;;  %v3936_v33 = vld [vmem:[%s9217_s5 + $0x1c8] sm:$0xff] }
 0x5c3   : > { %5970 = vmatpush1.bf16.msra.mxu0 %v5969_v8  ;;  %v3826_v8 = vrot.slane %v6414_v45, %v3825_v49 }
 0x5c4   : > { %4425 = vmatmul.mubr.f32.vlgmr.msra.gmra.mrb[0].mxu1 %v3877_v13  ;;  %5972 = vmatprep.subr.bf16.mxu0 %v5971_v56  ;;  %v6007_v13 = vpack.c.bf16 %v3938_v52, %v3936_v33  ;;  %v6009_v56 = vpack.c.bf16 %v3937_v26, %v3935_v24  ;;  %v4464_v33 = vld [vmem:[%s9219_s7 + $0xf8] sm:$0xff] }
 0x5c5   : > { %v6235_v52 = vpack.c.bf16 %v4464_v33, %v4463_v63 }
 0x5c7   : > { %5974 = vmatpush1.bf16.msra.mxu0 %v5973_v39  ;;  %v3863_v39 = vadd.f32 %v3826_v8, %v3813_v38  ;;  %v4135_v8 = vld [vmem:[%s9218_s6] sm:$0x3] }
 0x5c8   : > { %5976 = vmatprep.subr.bf16.mxu0 %v5975_v48  ;;  %v6013_v48 = vpack.c.bf16 %v3941_v25, %v3939_v31  ;;  %v4144_v38 = vrot.slane %v4135_v8, %v3829_v0 }
 0x5c9   : > { %v3871_v55 = vmax.f32 %v3863_v39, 0.0 }
 0x5cb   : > { %5978 = vmatpush1.bf16.msra.mxu0 %v5977_v27  ;;  %v6207_v27 = vpack.c.bf16 %v4450_v4, %v4449_v43 }
 0x5cc   : > { %5980 = vmatprep.subr.bf16.mxu0 %v5979_v32  ;;  %v4434_v32 = vld [vmem:[%s9219_s7 + $0x8] sm:$0xff] }
 0x5cd   : > { %v6209_v7 = vpack.c.bf16 %v4434_v32, %v4433_v47 }
 0x5cf   : > { %5982 = vmatpush1.bf16.msra.mxu0 %v5981_v61  ;;  %v4435_v61 = vld [vmem:[%s9219_s7 + $0x10] sm:$0xff] }
 0x5d0   : > { %5984 = vmatprep.subr.bf16.mxu0 %v5983_v59  ;;  %v4436_v59 = vld [vmem:[%s9219_s7 + $0x18] sm:$0xff] }
 0x5d1   : > { %v6213_v3 = vpack.c.bf16 %v4436_v59, %v4435_v61 }
 0x5d3   : > { %5986 = vmatpush1.bf16.msra.mxu0 %v5985_v6  ;;  %v4437_v6 = vld [vmem:[%s9219_s7 + $0x20] sm:$0xff] }
 0x5d4   : > { %5988 = vmatprep.subr.bf16.mxu0 %v5987_v37  ;;  %v4438_v37 = vld [vmem:[%s9219_s7 + $0x28] sm:$0xff] }
 0x5d5   : > { %v6217_v41 = vpack.c.bf16 %v4438_v37, %v4437_v6 }
 0x5d7   : > { %5990 = vmatpush1.bf16.msra.mxu0 %v5989_v1  ;;  %v4439_v1 = vld [vmem:[%s9219_s7 + $0x30] sm:$0xff] }
 0x5d8   : > { %5992 = vmatprep.subr.bf16.mxu0 %v5991_v54  ;;  %v4440_v54 = vld [vmem:[%s9219_s7 + $0x38] sm:$0xff] }
 0x5d9   : > { %v6221_v35 = vpack.c.bf16 %v4440_v54, %v4439_v1 }
 0x5db   : > { %5994 = vmatpush1.bf16.msra.mxu0 %v5993_v22  ;;  %v4441_v22 = vld [vmem:[%s9219_s7 + $0x40] sm:$0xff] }
 0x5dc   : > { %5996 = vmatprep.subr.bf16.mxu0 %v5995_v18  ;;  %v4442_v18 = vld [vmem:[%s9219_s7 + $0x48] sm:$0xff] }
 0x5dd   : > { %v6225_v17 = vpack.c.bf16 %v4442_v18, %v4441_v22 }
 0x5df   : > { %5998 = vmatpush1.bf16.msra.mxu0 %v5997_v16  ;;  %v4443_v16 = vld [vmem:[%s9219_s7 + $0x50] sm:$0xff] }
 0x5e0   : > { %6000 = vmatprep.subr.bf16.mxu0 %v5999_v36  ;;  %v4444_v36 = vld [vmem:[%s9219_s7 + $0x58] sm:$0xff] }
 0x5e1   : > { %v6229_v30 = vpack.c.bf16 %v4444_v36, %v4443_v16 }
 0x5e3   : > { %6002 = vmatpush1.bf16.msra.mxu0 %v6001_v42  ;;  %v4445_v42 = vld [vmem:[%s9219_s7 + $0x60] sm:$0xff] }
 0x5e4   : > { %6004 = vmatprep.subr.bf16.mxu0 %v6003_v21  ;;  %v4446_v21 = vld [vmem:[%s9219_s7 + $0x68] sm:$0xff] }
 0x5e5   : > { %v6233_v23 = vpack.c.bf16 %v4446_v21, %v4445_v42 }
 0x5e7   : > { %6006 = vmatpush1.bf16.msra.mxu0 %v6005_v57  ;;  %v4447_v57 = vld [vmem:[%s9219_s7 + $0x70] sm:$0xff] }
 0x5e8   : > { %6008 = vmatprep.subr.bf16.mxu0 %v6007_v13  ;;  %v4448_v13 = vld [vmem:[%s9219_s7 + $0x78] sm:$0xff] }
 0x5e9   : > { %v6237_v24 = vpack.c.bf16 %v4448_v13, %v4447_v57 }
 0x5eb   : > { %6010 = vmatpush1.bf16.msra.mxu0 %v6009_v56  ;;  %v4140_v56 = vrot.slane %v4135_v8, %v3825_v49 }
 0x5ec   : > { %6012 = vmatprep.subr.bf16.mxu0 %v6011_v53 }
 0x5ef   : > { %6014 = vmatpush1.bf16.msra.mxu0 %v6013_v48 }
 0x5f0   : > { %6208 = vmatprep.subr.bf16.mxu0 %v6207_v27  ;;  %v4684_v27 = vld [vmem:[#allocation3] ss:$0 sm:$0xff] }
 0x5f2   : > { %4212 = vmatmul.mubr.f32.vlgmr.msra.gmra.mrb[2].mxu0 %v3871_v55 }
 0x5f3   : > { %6210 = vmatpush3.bf16.msra.mxu0 %v6209_v7 }
 0x5f4   : > { %6212 = vmatprep.subr.bf16.mxu0 %v6211_v15 }
 0x5f7   : > { %6214 = vmatpush3.bf16.msra.mxu0 %v6213_v3 }
 0x5f8   : > { %6216 = vmatprep.subr.bf16.mxu0 %v6215_v28 }
 0x5fb   : > { %6218 = vmatpush3.bf16.msra.mxu0 %v6217_v41 }
 0x5fc   : > { %6220 = vmatprep.subr.bf16.mxu0 %v6219_v11 }
 0x5ff   : > { %6222 = vmatpush3.bf16.msra.mxu0 %v6221_v35 }
 0x600   : > { %6224 = vmatprep.subr.bf16.mxu0 %v6223_v40 }
 0x603   : > { %6226 = vmatpush3.bf16.msra.mxu0 %v6225_v17 }
 0x604   : > { %6228 = vmatprep.subr.bf16.mxu0 %v6227_v10 }
 0x607   : > { %6230 = vmatpush3.bf16.msra.mxu0 %v6229_v30 }
 0x608   : > { %6232 = vmatprep.subr.bf16.mxu0 %v6231_v9 }
 0x60b   : > { %6234 = vmatpush3.bf16.msra.mxu0 %v6233_v23 }
 0x60c   : > { %6236 = vmatprep.subr.bf16.mxu0 %v6235_v52 }
 0x60f   : > { %6238 = vmatpush3.bf16.msra.mxu0 %v6237_v24 }
 0x685   : > { %v3807_v26 = vpop.f32.mrb[0].mxu0 }
 0x686   : > { %3812 = vst.msk [vmem:[%s514_s2] sm:$0xff] %vm3811_vm2, %v3807_v26  ;;  %v4774_v19 = vpop.f32.mrb[1].mxu0 }
 0x697   : > { %v4426_v60 = vpop.f32.mrb[0].mxu1 }
 0x698   : > { %v4428_v45 = vpop.f32.mrb[1].mxu1 }
 0x6c5   : > { %v4213_v53 = vpop.f32.mrb[2].mxu0 }
 0x6c6   : > { %v4214_v31 = vadd.f32 %v4213_v53, %v4140_v56  ;;  %v4215_v25 = vpop.f32.mrb[3].mxu0 }
 0x6c7   : > { %v4216_v39 = vadd.f32 %v4215_v25, %v4144_v38 }
 0x6c8   : > { %v6264_v48 = vadd.f32 %v4426_v60, %v4214_v31 }
 0x6c9   : > { %v6266_v55 = vadd.f32 %v4428_v45, %v4216_v39 }
 0x6ca   : > { %v4431_v4 = vmax.f32 %v6264_v48, 0.0 }
 0x6cb   : > { %v4432_v43 = vmax.f32 %v6266_v55, 0.0 }
 0x6cd   : > { %4536 = vmatprep.mubr.f32.mxu0 %v4432_v43 }
 0x6ce   : > { %4537 = vmatmul.mubr.f32.vlgmr.msra.gmra.mrb[4].mxu0 %v4431_v4 }
 0x7a1   : > { %v4737_v47 = vpop.f32.mrb[4].mxu0 }
 0x7a2   : > { %v4738_v32 = vpop.f32.mrb[5].mxu0 }
 0x7a3   : > { %v4739_v51 = vadd.f32 %v4738_v32, %v4737_v47 }
 0x7a5   : > { %v4539_v58 = vadd.f32 %v4739_v51, %v4684_v27 }
 0x7a7   : > { %4542 = vst.msk [vmem:[%s518_s8] sm:$0xff] %vm3811_vm2, %v4539_v58 }
 0x7a8 PF: > { %s23_s21 = sadd.s32 1, %s6469_s21   ;;  %s9230_s18 = sld [smem:[#allocation5_spill]] }
 0x7a9   : > { %p20_p0 = scmp.ge.s32.totalorder %s23_s21, 6   ;;  %s9231_s20 = sld [smem:[#allocation6_spill]] }
 0x7aa   : > { %s9232_s28 = sld [smem:[#allocation7_spill]]  ;;  %s9233_s15 = smov %s6449_s16 }
 0x7ab   : > { %s9234_s16 = smov %s6591_s25  ;;  %s9235_s17 = smov %s6461_s19 }
 0x7ac   :  { %22 = sbr.rel (!%p20_p0) target bundleno = 7 (0x7), region = 155 }
 0x7af   : > { %s9236_s19 = smov %s9231_s20 }
 0x7b0   : > { %s9237_s20 = smov %s9232_s28 }

</bundles_post_ra>
